<compile_context>
chip_gen: v5e
topology: v5e:2x2
jax: 0.10.0
libtpu: 0.0.40
codegen_flags: <defaults>
</compile_context>

<pallas_src>
import math
import functools

import jax
import jax.numpy as jnp
from jax.experimental import pallas as pl
from jax.experimental.pallas import tpu as pltpu

_MiB = 1024 * 1024


# ----------------------------- device / tiling helpers ------------------------------

def _vmem_capacity_bytes():
    """Physical per-core VMEM; falls back to 64 MiB if the query is unavailable."""
    try:
        cap = getattr(pltpu.get_tpu_info(), "vmem_capacity_bytes", None)
        if cap:
            return int(cap)
    except Exception:
        pass
    return 64 * _MiB


def _vmem_limit(need_bytes):
    """Scoped-VMEM limit: requested bytes + headroom, capped below physical capacity."""
    cap = _vmem_capacity_bytes()
    return int(min(0.9 * cap, max(int(need_bytes) + 16 * _MiB, 32 * _MiB)))


def _pick_q_tile(n, target=None):
    """Query tile: must divide n (keeps fused pooling stats exact) and be a
    multiple of 8 (or equal n) to satisfy the (8,128) block constraint.
    Target is VMEM-capacity dependent: smaller tiles on 64 MiB parts (v7x)."""
    if target is None:
        target = 16 if _vmem_capacity_bytes() <= 64 * _MiB else 48
    if n <= target:
        return n
    for cand in range(min(target, n), 7, -1):
        if n % cand == 0 and cand % 8 == 0:
            return cand
    return n


def _pick_m_tile(m, target=512):
    """Row tile for the row-parallel kernels (multiple of 8 or full extent)."""
    if m <= target:
        return m
    return max(8, (target // 8) * 8)


# ------------------------ fused Q/K/V projection ---------------------------

def _qkv_kernel(x_ref, m_ref, w_ref, b_ref, q_ref, k_ref, v_ref, *, dx, mxu_dtype):
    f32 = jnp.float32
    acc = jnp.dot(x_ref[...].astype(mxu_dtype), w_ref[...],
                  preferred_element_type=f32) + b_ref[...]
    m = m_ref[...].astype(f32)
    q_ref[...] = (acc[:, 0 * dx:1 * dx] * m).astype(q_ref.dtype)
    k_ref[...] = (acc[:, 1 * dx:2 * dx] * m).astype(k_ref.dtype)
    v_ref[...] = (acc[:, 2 * dx:3 * dx] * m).astype(v_ref.dtype)


def qkv_proj(X2, mask2, w_qkv, b_qkv, dx, m_tile=512, mxu_dtype=jnp.bfloat16):
    """X2: (M, dx); w_qkv: (dx, 3*dx) bf16 concat of q/k/v weights; masked Q,K,V."""
    M, din = X2.shape
    tm = _pick_m_tile(M, m_tile)
    row = lambda i: (i, 0)
    const = lambda i: (0, 0)
    out_sds = jax.ShapeDtypeStruct((M, dx), X2.dtype)

    itemsize = jnp.dtype(X2.dtype).itemsize
    need = (2 * ((tm * din + tm) * itemsize + 3 * tm * dx * itemsize
                 + int(w_qkv.size) * jnp.dtype(w_qkv.dtype).itemsize
                 + int(b_qkv.size) * 4)
            + 4 * tm * 3 * dx * 4)

    return pl.pallas_call(
        functools.partial(_qkv_kernel, dx=dx, mxu_dtype=mxu_dtype),
        grid=(pl.cdiv(M, tm),),
        in_specs=[pl.BlockSpec((tm, din), row),
                  pl.BlockSpec((tm, 1), row),
                  pl.BlockSpec(w_qkv.shape, const),
                  pl.BlockSpec(b_qkv.shape, const)],
        out_specs=(pl.BlockSpec((tm, dx), row),) * 3,
        out_shape=(out_sds,) * 3,
        compiler_params=pltpu.CompilerParams(
            dimension_semantics=("parallel",),
            vmem_limit_bytes=_vmem_limit(need)),
    )(X2, mask2, w_qkv, b_qkv)


# ------ fused attention + full E path (+ Etoy pooling stats) kernel --------

def _attn_e_kernel(q_ref, k_ref, v_ref, e_ref, mr_ref, mc_ref,
                   yea_ref, yem_ref, yxa_ref, yxm_ref,
                   wee_ref, bee_ref, weo_ref, beo_ref,
                   g1_ref, bt1_ref, wf1_ref, bf1_ref, wf2_ref, bf2_ref,
                   g2_ref, bt2_ref,
                   eo_ref, nx_ref, st_ref,
                   s_sum, s_sq, s_min, s_max,
                   *, inv_sqrt_df, eps, n_edges, mxu_dtype):
    f32 = jnp.float32
    it = pl.program_id(1)
    n_it = pl.num_programs(1)

    Qb = q_ref[...].astype(f32)          # (ti, dx)   pre-masked
    Kb = k_ref[...].astype(f32)          # (n,  dx)   pre-masked
    Vb = v_ref[...].astype(f32)          # (n,  dx)   pre-masked
    Eb = e_ref[...].astype(f32)          # (ti, n, de)
    mr = mr_ref[...].astype(f32)         # (ti, 1)    query-row node mask
    mc = mc_ref[...].astype(f32)         # (1,  n)    key-col  node mask

    ti, n, de = Eb.shape
    dx = Qb.shape[-1]
    Ef = Eb.reshape(ti * n, de)

    # ---- Etoy pooling stats (mean / min / max / unbiased std over all edges) ----
    # NOTE: one-pass sum / sum-of-squares in f32; fine for normalized features,
    # may cancel for very large-magnitude E (reference is two-pass).
    @pl.when(it == 0)
    def _():
        s_sum[...] = jnp.zeros_like(s_sum)
        s_sq[...] = jnp.zeros_like(s_sq)
        s_min[...] = jnp.full(s_min.shape, jnp.inf, f32)
        s_max[...] = jnp.full(s_max.shape, -jnp.inf, f32)

    s_sum[...] += jnp.sum(Ef, axis=0, keepdims=True)
    s_sq[...] += jnp.sum(Ef * Ef, axis=0, keepdims=True)
    s_min[...] = jnp.minimum(s_min[...], jnp.min(Ef, axis=0, keepdims=True))
    s_max[...] = jnp.maximum(s_max[...], jnp.max(Ef, axis=0, keepdims=True))

    @pl.when(it == n_it - 1)
    def _():
        mean = s_sum[...] / n_edges
        var = (s_sq[...] - n_edges * mean * mean) / max(n_edges - 1.0, 1.0)
        std = jnp.sqrt(jnp.maximum(var, 0.0))
        st_ref[...] = jnp.concatenate([mean, s_min[...], s_max[...], std], axis=-1)

    # ---- edge-conditioned per-feature attention scores ----
    # e_mul / e_add fused into one (de, 2*dx) matmul with bf16 operands.
    E12 = (jnp.dot(Ef.astype(mxu_dtype), wee_ref[...],
                   preferred_element_type=f32) + bee_ref[...])         # (ti*n, 2dx)
    E1m = E12[:, :dx].reshape(ti, n, dx)
    E2m = E12[:, dx:].reshape(ti, n, dx)

    # Edge-masking of E1m/E2m is dropped: Q,K are pre-masked (so the
    # multiplicative term stays zero), newE is re-masked after e_out, and the
    # softmax key-bias removes the additive leak.  Valid for finite padded E.
    Y = Qb[:, None, :] * Kb[None, :, :] * inv_sqrt_df                  # (ti, n, dx)
    Y = Y * (E1m + 1.0) + E2m

    # ---- new edges: y-FiLM -> e_out -> mask -> +E -> LN1 -> FF -> +res -> LN2 ----
    emask3 = mr[:, None, :] * mc[:, :, None]                           # (ti, n, 1)
    newE_pre = yea_ref[...] + (yem_ref[...] + 1.0) * Y
    newE = (jnp.dot(newE_pre.reshape(ti * n, dx).astype(mxu_dtype), weo_ref[...],
                    preferred_element_type=f32)
            + beo_ref[...]).reshape(ti, n, de) * emask3                # (ti, n, de)

    r1 = Eb + newE
    mu1 = jnp.mean(r1, axis=-1, keepdims=True)
    v1 = jnp.mean((r1 - mu1) ** 2, axis=-1, keepdims=True)
    e1 = (r1 - mu1) * jax.lax.rsqrt(v1 + eps) * g1_ref[...] + bt1_ref[...]

    h = jnp.maximum(
        jnp.dot(e1.reshape(ti * n, de).astype(mxu_dtype), wf1_ref[...],
                preferred_element_type=f32) + bf1_ref[...], 0.0)
    ffe = (jnp.dot(h.astype(mxu_dtype), wf2_ref[...],
                   preferred_element_type=f32)
           + bf2_ref[...]).reshape(ti, n, de)
    r2 = e1 + ffe
    mu2 = jnp.mean(r2, axis=-1, keepdims=True)
    v2 = jnp.mean((r2 - mu2) ** 2, axis=-1, keepdims=True)
    eo_ref[...] = ((r2 - mu2) * jax.lax.rsqrt(v2 + eps) * g2_ref[...]
                   + bt2_ref[...]).astype(eo_ref.dtype)

    # ---- masked softmax over keys (per head-feature) + weighted V (f32) ----
    bias = jnp.where(mc > 0, jnp.float32(0.0), jnp.float32(-1e30))[:, :, None]
    logits = Y + bias
    mmax = jnp.max(logits, axis=1, keepdims=True)
    pexp = jnp.exp(logits - mmax)
    denom = jnp.sum(pexp, axis=1, keepdims=True)
    inv = pl.reciprocal(denom, approx=True)          # EUP slot instead of VALU divide
    inv = inv * (2.0 - denom * inv)                  # one Newton step -> ~f32-exact
    attn = pexp * inv
    wV = jnp.sum(attn * Vb[None, :, :], axis=1)                        # (ti, dx)
    nx_ref[...] = (yxa_ref[...] + (yxm_ref[...] + 1.0) * wV).astype(nx_ref.dtype)


def attn_e_fused(Q, K, V, E, node_mask, ye_add, ye_mul, yx_add, yx_mul,
                 p_emul, p_eadd, p_eout, p_ln1, p_ff1, p_ff2, p_ln2,
                 df, eps, q_tile=None, mxu_dtype=jnp.bfloat16):
    bs, n, dx = Q.shape
    de = E.shape[-1]
    dtype = Q.dtype
    f32 = jnp.float32

    ti = _pick_q_tile(n) if q_tile is None else q_tile
    assert n % ti == 0, "query tile must divide n"
    n_it = n // ti

    mr = node_mask.reshape(bs, n, 1).astype(dtype)
    mc = node_mask.reshape(bs, 1, n).astype(dtype)

    wem, bem = p_emul
    wea, bea = p_eadd
    weo, beo = p_eout
    g1, bt1 = p_ln1
    wf1, bf1 = p_ff1
    wf2, bf2 = p_ff2
    g2, bt2 = p_ln2
    dim_ffE = wf1.shape[1]

    # e_mul / e_add fused into one weight; all matmul weights pre-cast to bf16,
    # biases / LayerNorm params stay f32 (added to the f32 accumulator).
    wee = jnp.concatenate([wem, wea], axis=1).astype(mxu_dtype)
    bee = jnp.concatenate([bem, bea], axis=0).reshape(1, 2 * dx).astype(f32)

    weights = (wee, bee,
               weo.astype(mxu_dtype), beo.reshape(1, de).astype(f32),
               g1.reshape(1, de).astype(f32), bt1.reshape(1, de).astype(f32),
               wf1.astype(mxu_dtype), bf1.reshape(1, dim_ffE).astype(f32),
               wf2.astype(mxu_dtype), bf2.reshape(1, de).astype(f32),
               g2.reshape(1, de).astype(f32), bt2.reshape(1, de).astype(f32))

    row_x = pl.BlockSpec((None, ti, dx), lambda b, i: (b, i, 0))
    all_x = pl.BlockSpec((None, n, dx), lambda b, i: (b, 0, 0))
    row_e = pl.BlockSpec((None, ti, n, de), lambda b, i: (b, i, 0, 0))
    row_m = pl.BlockSpec((None, ti, 1), lambda b, i: (b, i, 0))
    col_m = pl.BlockSpec((None, 1, n), lambda b, i: (b, 0, 0))
    y_vec = pl.BlockSpec((None, 1, dx), lambda b, i: (b, 0, 0))

    def const(a):
        nd = a.ndim
        return pl.BlockSpec(a.shape, lambda b, i, _nd=nd: (0,) * _nd)

    kernel = functools.partial(_attn_e_kernel,
                               inv_sqrt_df=1.0 / math.sqrt(df),
                               eps=eps, n_edges=float(n * n),
                               mxu_dtype=mxu_dtype)

    itemsize = jnp.dtype(dtype).itemsize
    w_bytes = sum(int(w.size) * jnp.dtype(w.dtype).itemsize for w in weights)
    blk_bytes = ((ti * dx + 2 * n * dx + ti * n * de + ti + n + 4 * dx) * itemsize
                 + (ti * n * de + ti * dx) * itemsize + 4 * de * 4)
    tmp_bytes = (6 * ti * n * dx + 5 * ti * n * de + 2 * ti * n * dim_ffE) * 4
    need = 2 * (blk_bytes + w_bytes) + tmp_bytes

    flops = int(bs * n * n * (2 * de * 2 * dx + 2 * dx * de + 4 * de * dim_ffE
                              + 12 * dx + 16 * de))
    bytes_accessed = int(2 * bs * n * n * de * itemsize
                         + 4 * bs * n * dx * itemsize + w_bytes)

    Eo, newX_pre, e_stats = pl.pallas_call(
        kernel,
        grid=(bs, n_it),
        in_specs=[row_x, all_x, all_x, row_e, row_m, col_m,
                  y_vec, y_vec, y_vec, y_vec] + [const(w) for w in weights],
        out_specs=(row_e, row_x,
                   pl.BlockSpec((None, 1, 4 * de), lambda b, i: (b, 0, 0))),
        out_shape=(jax.ShapeDtypeStruct((bs, n, n, de), dtype),
                   jax.ShapeDtypeStruct((bs, n, dx), dtype),
                   jax.ShapeDtypeStruct((bs, 1, 4 * de), jnp.float32)),
        scratch_shapes=[pltpu.VMEM((1, de), jnp.float32) for _ in range(4)],
        compiler_params=pltpu.CompilerParams(
            dimension_semantics=("parallel", "arbitrary"),
            vmem_limit_bytes=_vmem_limit(need)),
        cost_estimate=pl.CostEstimate(flops=flops,
                                      transcendentals=int(bs * n * n * dx),
                                      bytes_accessed=bytes_accessed),
    )(Q, K, V, E, mr, mc, ye_add, ye_mul, yx_add, yx_mul, *weights)

    return Eo, newX_pre, e_stats.reshape(bs, 4 * de)


# ----- fused X tail: x_out + mask + residual + LN1 + FF + residual + LN2 ----

def _x_tail_kernel(nx_ref, x_ref, m_ref, wo_ref, bo_ref, g1_ref, be1_ref,
                   w1_ref, b1_ref, w2_ref, b2_ref, g2_ref, be2_ref, o_ref,
                   *, eps, mxu_dtype):
    f32 = jnp.float32
    newX = (jnp.dot(nx_ref[...].astype(mxu_dtype), wo_ref[...],
                    preferred_element_type=f32)
            + bo_ref[...]) * m_ref[...].astype(f32)
    r1 = x_ref[...].astype(f32) + newX
    mu1 = jnp.mean(r1, axis=-1, keepdims=True)
    v1 = jnp.mean((r1 - mu1) ** 2, axis=-1, keepdims=True)
    x1 = (r1 - mu1) * jax.lax.rsqrt(v1 + eps) * g1_ref[...] + be1_ref[...]
    h = jnp.maximum(jnp.dot(x1.astype(mxu_dtype), w1_ref[...],
                            preferred_element_type=f32) + b1_ref[...], 0.0)
    ff = jnp.dot(h.astype(mxu_dtype), w2_ref[...],
                 preferred_element_type=f32) + b2_ref[...]
    r2 = x1 + ff
    mu2 = jnp.mean(r2, axis=-1, keepdims=True)
    v2 = jnp.mean((r2 - mu2) ** 2, axis=-1, keepdims=True)
    o_ref[...] = ((r2 - mu2) * jax.lax.rsqrt(v2 + eps) * g2_ref[...]
                  + be2_ref[...]).astype(o_ref.dtype)


def x_tail(newX_pre2, X2, mask2, p_xout, p_ln1, p_ff1, p_ff2, p_ln2, eps,
           m_tile=512, mxu_dtype=jnp.bfloat16):
    M, dx = X2.shape
    tm = _pick_m_tile(M, m_tile)
    row = lambda i: (i, 0)
    const = lambda i: (0, 0)
    f32 = jnp.float32
    wo, bo = p_xout
    g1, be1 = p_ln1
    w1, b1 = p_ff1
    w2, b2 = p_ff2
    g2, be2 = p_ln2
    dim_ffX = w1.shape[1]
    args = (newX_pre2, X2, mask2,
            wo.astype(mxu_dtype), bo.reshape(1, -1).astype(f32),
            g1.reshape(1, -1).astype(f32), be1.reshape(1, -1).astype(f32),
            w1.astype(mxu_dtype), b1.reshape(1, -1).astype(f32),
            w2.astype(mxu_dtype), b2.reshape(1, -1).astype(f32),
            g2.reshape(1, -1).astype(f32), be2.reshape(1, -1).astype(f32))
    in_specs = ([pl.BlockSpec((tm, dx), row), pl.BlockSpec((tm, dx), row),
                 pl.BlockSpec((tm, 1), row)]
                + [pl.BlockSpec(a.shape, const) for a in args[3:]])

    itemsize = jnp.dtype(X2.dtype).itemsize
    w_bytes = sum(int(a.size) * jnp.dtype(a.dtype).itemsize for a in args[3:])
    need = (2 * ((2 * tm * dx + tm) * itemsize + tm * dx * itemsize + w_bytes)
            + (4 * tm * dx + 2 * tm * dim_ffX) * 4)

    return pl.pallas_call(
        functools.partial(_x_tail_kernel, eps=eps, mxu_dtype=mxu_dtype),
        grid=(pl.cdiv(M, tm),),
        in_specs=in_specs,
        out_specs=pl.BlockSpec((tm, dx), row),
        out_shape=jax.ShapeDtypeStruct((M, dx), X2.dtype),
        compiler_params=pltpu.CompilerParams(
            dimension_semantics=("parallel",),
            vmem_limit_bytes=_vmem_limit(need)),
    )(*args)


# ----------------------------- model wrapper --------------------------------

def xey_transformer_layer(p, X, E, y, node_mask, n_head, eps=1e-5,
                          q_tile=None, m_tile=512, mxu_dtype=jnp.bfloat16):
    bs, n, dx = X.shape
    de = E.shape[-1]
    dtype = X.dtype
    df = dx // n_head
    Mx = bs * n

    mask2 = node_mask.reshape(Mx, 1).astype(dtype)
    X2 = X.reshape(Mx, dx)

    # fused Q/K/V projection with node-mask folded in (one wide bf16 MXU matmul)
    w_qkv = jnp.concatenate([p['q'][0], p['k'][0], p['v'][0]], axis=1).astype(mxu_dtype)
    b_qkv = jnp.concatenate([p['q'][1], p['k'][1], p['v'][1]],
                            axis=0).reshape(1, 3 * dx).astype(jnp.float32)
    Q2, K2, V2 = qkv_proj(X2, mask2, w_qkv, b_qkv, dx, m_tile, mxu_dtype)
    Q = Q2.reshape(bs, n, dx)
    K = K2.reshape(bs, n, dx)
    V = V2.reshape(bs, n, dx)

    def lin(v, wb, relu=False):
        w, b = wb
        o = v @ w + b
        return jnp.maximum(o, 0.0) if relu else o

    def ln(v, gb):
        g, b = gb
        mu = v.mean(-1, keepdims=True)
        var = ((v - mu) ** 2).mean(-1, keepdims=True)
        return (v - mu) * jax.lax.rsqrt(var + eps) * g + b

    # tiny y-conditioned FiLM vectors (plain XLA, (bs, dx))
    ye_add = lin(y, p['y_e_add'])[:, None, :]
    ye_mul = lin(y, p['y_e_mul'])[:, None, :]
    yx_add = lin(y, p['y_x_add'])[:, None, :]
    yx_mul = lin(y, p['y_x_mul'])[:, None, :]

    # one fused kernel: attention + complete E path + Etoy pooling stats
    Eo, newX_pre, e_stats = attn_e_fused(
        Q, K, V, E, node_mask, ye_add, ye_mul, yx_add, yx_mul,
        p['e_mul'], p['e_add'], p['e_out'], p['normE1'],
        p['linE1'], p['linE2'], p['normE2'], df, eps, q_tile, mxu_dtype)

    # fused X tail: x_out -> mask -> +X -> normX1 -> FF -> +res -> normX2
    Xo = x_tail(newX_pre.reshape(Mx, dx), X2, mask2,
                p['x_out'], p['normX1'], p['linX1'], p['linX2'], p['normX2'],
                eps, m_tile, mxu_dtype).reshape(bs, n, dx)

    # y path: tiny (bs, dy) tensors -> plain XLA
    xmean = X.mean(1)
    xmin = X.min(1)
    xmax = X.max(1)
    xstd = jnp.sqrt(((X - X.mean(1, keepdims=True)) ** 2).sum(1) / max(n - 1, 1))
    x_stats = jnp.concatenate([xmean, xmin, xmax, xstd], axis=-1)

    new_y = (lin(y, p['y_y']) + lin(x_stats, p['x_y'])
             + lin(e_stats.astype(y.dtype), p['e_y']))
    new_y = lin(lin(new_y, p['y_out1'], relu=True), p['y_out2'])
    y1 = ln(y + new_y, p['norm_y1'])
    yo = ln(y1 + lin(lin(y1, p['lin_y1'], relu=True), p['lin_y2']), p['norm_y2'])

    return Xo, Eo, yo


# ----------------------- pure-JAX reference (check) ------------------------

def ref_forward(p, X, E, y, node_mask, n_head, eps=1e-5):
    def lin(x, wb, relu=False):
        w, b = wb
        o = x @ w + b
        return jnp.maximum(o, 0.0) if relu else o

    def ln(x, gb):
        g, b = gb
        mu = x.mean(-1, keepdims=True)
        var = ((x - mu) ** 2).mean(-1, keepdims=True)
        return (x - mu) / jnp.sqrt(var + eps) * g + b

    bs, n, dx = X.shape
    de = E.shape[-1]
    df = dx // n_head
    x_mask = node_mask[..., None]
    e_mask = x_mask[:, :, None, :] * x_mask[:, None, :, :]
    Q = lin(X, p['q']) * x_mask
    K = lin(X, p['k']) * x_mask
    V = lin(X, p['v']) * x_mask
    Y = Q[:, :, None, :] * K[:, None, :, :] / math.sqrt(df)
    E1m = lin(E, p['e_mul']) * e_mask
    E2m = lin(E, p['e_add']) * e_mask
    Y = Y * (E1m + 1.0) + E2m
    newE = (lin(y, p['y_e_add'])[:, None, None, :]
            + (lin(y, p['y_e_mul'])[:, None, None, :] + 1.0) * Y)
    newE = lin(newE, p['e_out']) * e_mask
    bias = jnp.where(node_mask > 0, 0.0, -1e30)[:, None, :, None]
    attn = jax.nn.softmax(Y + bias, axis=2)
    wV = (attn * V[:, None, :, :]).sum(axis=2)
    newX = (lin(y, p['y_x_add'])[:, None, :]
            + (lin(y, p['y_x_mul'])[:, None, :] + 1.0) * wV)
    newX = lin(newX, p['x_out']) * x_mask

    def stats(t):
        mean = t.mean(1)
        mn = t.min(1)
        mx = t.max(1)
        std = jnp.sqrt(((t - t.mean(1, keepdims=True)) ** 2).sum(1) / (t.shape[1] - 1))
        return jnp.concatenate([mean, mn, mx, std], axis=-1)

    new_y = (lin(y, p['y_y']) + lin(stats(X), p['x_y'])
             + lin(stats(E.reshape(bs, n * n, de)), p['e_y']))
    new_y = lin(lin(new_y, p['y_out1'], relu=True), p['y_out2'])

    X1 = ln(X + newX, p['normX1'])
    E1 = ln(E + newE, p['normE1'])
    y1 = ln(y + new_y, p['norm_y1'])
    Xo = ln(X1 + lin(lin(X1, p['linX1'], relu=True), p['linX2']), p['normX2'])
    Eo = ln(E1 + lin(lin(E1, p['linE1'], relu=True), p['linE2']), p['normE2'])
    yo = ln(y1 + lin(lin(y1, p['lin_y1'], relu=True), p['lin_y2']), p['norm_y2'])
    return Xo, Eo, yo


# ------------------------------ param init ---------------------------------

def init_params(key, dx, de, dy, dim_ffX, dim_ffE, dim_ffy):
    keys = iter(jax.random.split(key, 64))

    def lin_p(din, dout):
        k1, k2 = jax.random.split(next(keys))
        bound = 1.0 / math.sqrt(din)
        w = jax.random.uniform(k1, (din, dout), jnp.float32, -bound, bound)
        b = jax.random.uniform(k2, (dout,), jnp.float32, -bound, bound)
        return (w, b)

    def ln_p(d):
        return (jnp.ones((d,), jnp.float32), jnp.zeros((d,), jnp.float32))

    return {
        'q': lin_p(dx, dx), 'k': lin_p(dx, dx), 'v': lin_p(dx, dx),
        'e_add': lin_p(de, dx), 'e_mul': lin_p(de, dx),
        'y_e_mul': lin_p(dy, dx), 'y_e_add': lin_p(dy, dx),
        'y_x_mul': lin_p(dy, dx), 'y_x_add': lin_p(dy, dx),
        'y_y': lin_p(dy, dy),
        'x_y': lin_p(4 * dx, dy), 'e_y': lin_p(4 * de, dy),
        'x_out': lin_p(dx, dx), 'e_out': lin_p(dx, de),
        'y_out1': lin_p(dy, dy), 'y_out2': lin_p(dy, dy),
        'linX1': lin_p(dx, dim_ffX), 'linX2': lin_p(dim_ffX, dx),
        'normX1': ln_p(dx), 'normX2': ln_p(dx),
        'linE1': lin_p(de, dim_ffE), 'linE2': lin_p(dim_ffE, de),
        'normE1': ln_p(de), 'normE2': ln_p(de),
        'lin_y1': lin_p(dy, dim_ffy), 'lin_y2': lin_p(dim_ffy, dy),
        'norm_y1': ln_p(dy), 'norm_y2': ln_p(dy),
    }


# ---------------------------------- main ------------------------------------

if __name__ == "__main__":
    bs, n, dx, de, dy, n_head = 2, 8, 32, 16, 16, 4
    dim_ffX, dim_ffE, dim_ffy = 64, 32, 64

    root = jax.random.PRNGKey(0)
    kp, kx, ke, ky = jax.random.split(root, 4)
    params = init_params(kp, dx, de, dy, dim_ffX, dim_ffE, dim_ffy)

    X = jax.random.normal(kx, (bs, n, dx), jnp.float32)
    E = jax.random.normal(ke, (bs, n, n, de), jnp.float32)
    y = jax.random.normal(ky, (bs, dy), jnp.float32)
    node_mask = jnp.array([[1.0] * n, [1.0] * 6 + [0.0] * (n - 6)], jnp.float32)

    fwd = jax.jit(functools.partial(xey_transformer_layer, n_head=n_head))
    Xo, Eo, yo = fwd(params, X, E, y, node_mask)
    jax.block_until_ready((Xo, Eo, yo))

    # sanity-check against a pure-JAX f32 reference of the same math.
    # Tolerance reflects bf16 MXU operands inside the Pallas kernels vs the
    # f32 reference (operand rounding ~2^-9 through a handful of matmuls).
    Xr, Er, yr = ref_forward(params, X, E, y, node_mask, n_head)
    assert Xo.shape == X.shape and Eo.shape == E.shape and yo.shape == y.shape
    for a, r in ((Xo, Xr), (Eo, Er), (yo, yr)):
        assert bool(jnp.allclose(a, r, atol=3e-2, rtol=3e-2)), float(jnp.max(jnp.abs(a - r)))

    print("KERNEL_OK")
</pallas_src>

<mosaic_0001>
module attributes {stable_mosaic.version = 11 : i64} {
  func.func @_qkv_kernel(%arg0: i32, %arg1: memref<16x32xf32, #tpu.memory_space<vmem>>, %arg2: memref<16x1xf32, #tpu.memory_space<vmem>>, %arg3: memref<32x96xbf16, #tpu.memory_space<vmem>>, %arg4: memref<1x96xf32, #tpu.memory_space<vmem>>, %arg5: memref<16x32xf32, #tpu.memory_space<vmem>>, %arg6: memref<16x32xf32, #tpu.memory_space<vmem>>, %arg7: memref<16x32xf32, #tpu.memory_space<vmem>>) attributes {dimension_semantics = [#tpu.dimension_semantics<parallel>], iteration_bounds = array<i64: 1>, scalar_prefetch = 0 : i64, scratch_operands = 0 : i64, tpu.core_type = #tpu.core_type<tc>, window_params = [{transform_indices = @transform_0, window_bounds = array<i64: 16, 32>}, {transform_indices = @transform_1, window_bounds = array<i64: 16, 1>}, {pipeline_mode = #tpu.pipeline_mode<synchronous>, transform_indices = @transform_2, window_bounds = array<i64: 32, 96>}, {pipeline_mode = #tpu.pipeline_mode<synchronous>, transform_indices = @transform_3, window_bounds = array<i64: 1, 96>}, {transform_indices = @transform_4, window_bounds = array<i64: 16, 32>}, {transform_indices = @transform_5, window_bounds = array<i64: 16, 32>}, {transform_indices = @transform_6, window_bounds = array<i64: 16, 32>}]} {
    %c0 = arith.constant 0 : index
    %c0_0 = arith.constant 0 : index
    %0 = vector.load %arg1[%c0, %c0_0] : memref<16x32xf32, #tpu.memory_space<vmem>>, vector<16x32xf32>
    %1 = arith.truncf %0 : vector<16x32xf32> to vector<16x32xbf16>
    %c0_1 = arith.constant 0 : index
    %c0_2 = arith.constant 0 : index
    %2 = vector.load %arg3[%c0_1, %c0_2] : memref<32x96xbf16, #tpu.memory_space<vmem>>, vector<32x96xbf16>
    %cst = arith.constant dense<0.000000e+00> : vector<16x96xf32>
    %3 = tpu.matmul %1, %2, %cst {dimension_numbers = #tpu.dot_dimension_numbers<[1], [0], [0], [1], [0, 0, 1, 1], [], []>} : vector<16x32xbf16>, vector<32x96xbf16>, vector<16x96xf32> -> vector<16x96xf32>
    %c0_3 = arith.constant 0 : index
    %c0_4 = arith.constant 0 : index
    %4 = vector.load %arg4[%c0_3, %c0_4] : memref<1x96xf32, #tpu.memory_space<vmem>>, vector<1x96xf32>
    %5 = vector.broadcast %4 : vector<1x96xf32> to vector<16x96xf32>
    %6 = arith.addf %3, %5 : vector<16x96xf32>
    %c0_5 = arith.constant 0 : index
    %c0_6 = arith.constant 0 : index
    %7 = vector.load %arg2[%c0_5, %c0_6] : memref<16x1xf32, #tpu.memory_space<vmem>>, vector<16x1xf32>
    %8 = vector.extract_strided_slice %6 {offsets = [0, 0], sizes = [16, 32], strides = [1, 1]} : vector<16x96xf32> to vector<16x32xf32>
    %9 = vector.broadcast %7 : vector<16x1xf32> to vector<16x32xf32>
    %10 = arith.mulf %8, %9 : vector<16x32xf32>
    %c0_7 = arith.constant 0 : index
    %c0_8 = arith.constant 0 : index
    %11 = vector.load %arg5[%c0_7, %c0_8] : memref<16x32xf32, #tpu.memory_space<vmem>>, vector<16x32xf32>
    tpu.vector_store %arg5[%c0_7, %c0_8], %10 {strides = array<i32>} : memref<16x32xf32, #tpu.memory_space<vmem>>, vector<16x32xf32>,
    %12 = vector.extract_strided_slice %6 {offsets = [0, 32], sizes = [16, 32], strides = [1, 1]} : vector<16x96xf32> to vector<16x32xf32>
    %13 = vector.broadcast %7 : vector<16x1xf32> to vector<16x32xf32>
    %14 = arith.mulf %12, %13 : vector<16x32xf32>
    %c0_9 = arith.constant 0 : index
    %c0_10 = arith.constant 0 : index
    %15 = vector.load %arg6[%c0_9, %c0_10] : memref<16x32xf32, #tpu.memory_space<vmem>>, vector<16x32xf32>
    tpu.vector_store %arg6[%c0_9, %c0_10], %14 {strides = array<i32>} : memref<16x32xf32, #tpu.memory_space<vmem>>, vector<16x32xf32>,
    %16 = vector.extract_strided_slice %6 {offsets = [0, 64], sizes = [16, 32], strides = [1, 1]} : vector<16x96xf32> to vector<16x32xf32>
    %17 = vector.broadcast %7 : vector<16x1xf32> to vector<16x32xf32>
    %18 = arith.mulf %16, %17 : vector<16x32xf32>
    %c0_11 = arith.constant 0 : index
    %c0_12 = arith.constant 0 : index
    %19 = vector.load %arg7[%c0_11, %c0_12] : memref<16x32xf32, #tpu.memory_space<vmem>>, vector<16x32xf32>
    tpu.vector_store %arg7[%c0_11, %c0_12], %18 {strides = array<i32>} : memref<16x32xf32, #tpu.memory_space<vmem>>, vector<16x32xf32>,
    return
  }
  func.func @transform_0(%arg0: i32) -> (i32, i32) {
    %c0_i32 = arith.constant 0 : i32
    %c0_i32_0 = arith.constant 0 : i32
    return %arg0, %c0_i32 : i32, i32
  }
  func.func @transform_1(%arg0: i32) -> (i32, i32) {
    %c0_i32 = arith.constant 0 : i32
    %c0_i32_0 = arith.constant 0 : i32
    return %arg0, %c0_i32 : i32, i32
  }
  func.func @transform_2(%arg0: i32) -> (i32, i32) {
    %c0_i32 = arith.constant 0 : i32
    %c0_i32_0 = arith.constant 0 : i32
    %c0_i32_1 = arith.constant 0 : i32
    return %c0_i32, %c0_i32_0 : i32, i32
  }
  func.func @transform_3(%arg0: i32) -> (i32, i32) {
    %c0_i32 = arith.constant 0 : i32
    %c0_i32_0 = arith.constant 0 : i32
    %c0_i32_1 = arith.constant 0 : i32
    return %c0_i32, %c0_i32_0 : i32, i32
  }
  func.func @transform_4(%arg0: i32) -> (i32, i32) {
    %c0_i32 = arith.constant 0 : i32
    %c0_i32_0 = arith.constant 0 : i32
    return %arg0, %c0_i32 : i32, i32
  }
  func.func @transform_5(%arg0: i32) -> (i32, i32) {
    %c0_i32 = arith.constant 0 : i32
    %c0_i32_0 = arith.constant 0 : i32
    return %arg0, %c0_i32 : i32, i32
  }
  func.func @transform_6(%arg0: i32) -> (i32, i32) {
    %c0_i32 = arith.constant 0 : i32
    %c0_i32_0 = arith.constant 0 : i32
    return %arg0, %c0_i32 : i32, i32
  }
}

module attributes {stable_mosaic.version = 11 : i64} {
  func.func @_attn_e_kernel(%arg0: i32, %arg1: i32, %arg2: memref<1x8x32xf32, #tpu.memory_space<vmem>>, %arg3: memref<1x8x32xf32, #tpu.memory_space<vmem>>, %arg4: memref<1x8x32xf32, #tpu.memory_space<vmem>>, %arg5: memref<1x8x8x16xf32, #tpu.memory_space<vmem>>, %arg6: memref<1x8x1xf32, #tpu.memory_space<vmem>>, %arg7: memref<1x1x8xf32, #tpu.memory_space<vmem>>, %arg8: memref<1x1x32xf32, #tpu.memory_space<vmem>>, %arg9: memref<1x1x32xf32, #tpu.memory_space<vmem>>, %arg10: memref<1x1x32xf32, #tpu.memory_space<vmem>>, %arg11: memref<1x1x32xf32, #tpu.memory_space<vmem>>, %arg12: memref<16x64xbf16, #tpu.memory_space<vmem>>, %arg13: memref<1x64xf32, #tpu.memory_space<vmem>>, %arg14: memref<32x16xbf16, #tpu.memory_space<vmem>>, %arg15: memref<1x16xf32, #tpu.memory_space<vmem>>, %arg16: memref<1x16xf32, #tpu.memory_space<vmem>>, %arg17: memref<1x16xf32, #tpu.memory_space<vmem>>, %arg18: memref<16x32xbf16, #tpu.memory_space<vmem>>, %arg19: memref<1x32xf32, #tpu.memory_space<vmem>>, %arg20: memref<32x16xbf16, #tpu.memory_space<vmem>>, %arg21: memref<1x16xf32, #tpu.memory_space<vmem>>, %arg22: memref<1x16xf32, #tpu.memory_space<vmem>>, %arg23: memref<1x16xf32, #tpu.memory_space<vmem>>, %arg24: memref<1x8x8x16xf32, #tpu.memory_space<vmem>>, %arg25: memref<1x8x32xf32, #tpu.memory_space<vmem>>, %arg26: memref<1x1x64xf32, #tpu.memory_space<vmem>>, %arg27: memref<1x16xf32, #tpu.memory_space<vmem>>, %arg28: memref<1x16xf32, #tpu.memory_space<vmem>>, %arg29: memref<1x16xf32, #tpu.memory_space<vmem>>, %arg30: memref<1x16xf32, #tpu.memory_space<vmem>>) attributes {dimension_semantics = [#tpu.dimension_semantics<parallel>, #tpu.dimension_semantics<arbitrary>], iteration_bounds = array<i64: 2, 1>, scalar_prefetch = 0 : i64, scratch_operands = 4 : i64, tpu.core_type = #tpu.core_type<tc>, window_params = [{transform_indices = @transform_0, window_bounds = array<i64: 1, 8, 32>}, {transform_indices = @transform_1, window_bounds = array<i64: 1, 8, 32>}, {transform_indices = @transform_2, window_bounds = array<i64: 1, 8, 32>}, {transform_indices = @transform_3, window_bounds = array<i64: 1, 8, 8, 16>}, {transform_indices = @transform_4, window_bounds = array<i64: 1, 8, 1>}, {transform_indices = @transform_5, window_bounds = array<i64: 1, 1, 8>}, {transform_indices = @transform_6, window_bounds = array<i64: 1, 1, 32>}, {transform_indices = @transform_7, window_bounds = array<i64: 1, 1, 32>}, {transform_indices = @transform_8, window_bounds = array<i64: 1, 1, 32>}, {transform_indices = @transform_9, window_bounds = array<i64: 1, 1, 32>}, {pipeline_mode = #tpu.pipeline_mode<synchronous>, transform_indices = @transform_10, window_bounds = array<i64: 16, 64>}, {pipeline_mode = #tpu.pipeline_mode<synchronous>, transform_indices = @transform_11, window_bounds = array<i64: 1, 64>}, {pipeline_mode = #tpu.pipeline_mode<synchronous>, transform_indices = @transform_12, window_bounds = array<i64: 32, 16>}, {pipeline_mode = #tpu.pipeline_mode<synchronous>, transform_indices = @transform_13, window_bounds = array<i64: 1, 16>}, {pipeline_mode = #tpu.pipeline_mode<synchronous>, transform_indices = @transform_14, window_bounds = array<i64: 1, 16>}, {pipeline_mode = #tpu.pipeline_mode<synchronous>, transform_indices = @transform_15, window_bounds = array<i64: 1, 16>}, {pipeline_mode = #tpu.pipeline_mode<synchronous>, transform_indices = @transform_16, window_bounds = array<i64: 16, 32>}, {pipeline_mode = #tpu.pipeline_mode<synchronous>, transform_indices = @transform_17, window_bounds = array<i64: 1, 32>}, {pipeline_mode = #tpu.pipeline_mode<synchronous>, transform_indices = @transform_18, window_bounds = array<i64: 32, 16>}, {pipeline_mode = #tpu.pipeline_mode<synchronous>, transform_indices = @transform_19, window_bounds = array<i64: 1, 16>}, {pipeline_mode = #tpu.pipeline_mode<synchronous>, transform_indices = @transform_20, window_bounds = array<i64: 1, 16>}, {pipeline_mode = #tpu.pipeline_mode<synchronous>, transform_indices = @transform_21, window_bounds = array<i64: 1, 16>}, {transform_indices = @transform_22, window_bounds = array<i64: 1, 8, 8, 16>}, {transform_indices = @transform_23, window_bounds = array<i64: 1, 8, 32>}, {transform_indices = @transform_24, window_bounds = array<i64: 1, 1, 64>}]} {
    %c0 = arith.constant 0 : index
    %c0_0 = arith.constant 0 : index
    %c0_1 = arith.constant 0 : index
    %0 = vector.load %arg2[%c0, %c0_0, %c0_1] : memref<1x8x32xf32, #tpu.memory_space<vmem>>, vector<1x8x32xf32>
    %1 = vector.shape_cast %0 : vector<1x8x32xf32> to vector<8x32xf32>
    %c0_2 = arith.constant 0 : index
    %c0_3 = arith.constant 0 : index
    %c0_4 = arith.constant 0 : index
    %2 = vector.load %arg3[%c0_2, %c0_3, %c0_4] : memref<1x8x32xf32, #tpu.memory_space<vmem>>, vector<1x8x32xf32>
    %3 = vector.shape_cast %2 : vector<1x8x32xf32> to vector<8x32xf32>
    %c0_5 = arith.constant 0 : index
    %c0_6 = arith.constant 0 : index
    %c0_7 = arith.constant 0 : index
    %4 = vector.load %arg4[%c0_5, %c0_6, %c0_7] : memref<1x8x32xf32, #tpu.memory_space<vmem>>, vector<1x8x32xf32>
    %5 = vector.shape_cast %4 : vector<1x8x32xf32> to vector<8x32xf32>
    %c0_8 = arith.constant 0 : index
    %c0_9 = arith.constant 0 : index
    %c0_10 = arith.constant 0 : index
    %c0_11 = arith.constant 0 : index
    %6 = vector.load %arg5[%c0_8, %c0_9, %c0_10, %c0_11] : memref<1x8x8x16xf32, #tpu.memory_space<vmem>>, vector<1x8x8x16xf32>
    %7 = vector.shape_cast %6 : vector<1x8x8x16xf32> to vector<8x8x16xf32>
    %c0_12 = arith.constant 0 : index
    %c0_13 = arith.constant 0 : index
    %c0_14 = arith.constant 0 : index
    %8 = vector.load %arg6[%c0_12, %c0_13, %c0_14] : memref<1x8x1xf32, #tpu.memory_space<vmem>>, vector<1x8x1xf32>
    %9 = vector.shape_cast %8 : vector<1x8x1xf32> to vector<8x1xf32>
    %c0_15 = arith.constant 0 : index
    %c0_16 = arith.constant 0 : index
    %c0_17 = arith.constant 0 : index
    %10 = vector.load %arg7[%c0_15, %c0_16, %c0_17] : memref<1x1x8xf32, #tpu.memory_space<vmem>>, vector<1x1x8xf32>
    %11 = vector.shape_cast %10 : vector<1x1x8xf32> to vector<1x8xf32>
    %12 = vector.shape_cast %7 : vector<8x8x16xf32> to vector<64x16xf32>
    %c0_i32 = arith.constant 0 : i32
    %13 = arith.cmpi eq, %arg1, %c0_i32 : i32
    %14 = arith.extui %13 : i1 to i32
    %c0_i32_18 = arith.constant 0 : i32
    %15 = arith.cmpi ne, %14, %c0_i32_18 : i32
    scf.if %15 {
      %cst_109 = arith.constant 0.000000e+00 : f32
      %200 = vector.broadcast %cst_109 : f32 to vector<1x16xf32>
      %c0_110 = arith.constant 0 : index
      %c0_111 = arith.constant 0 : index
      %201 = vector.load %arg27[%c0_110, %c0_111] : memref<1x16xf32, #tpu.memory_space<vmem>>, vector<1x16xf32>
      tpu.vector_store %arg27[%c0_110, %c0_111], %200 {strides = array<i32>} : memref<1x16xf32, #tpu.memory_space<vmem>>, vector<1x16xf32>,
      %cst_112 = arith.constant 0.000000e+00 : f32
      %202 = vector.broadcast %cst_112 : f32 to vector<1x16xf32>
      %c0_113 = arith.constant 0 : index
      %c0_114 = arith.constant 0 : index
      %203 = vector.load %arg28[%c0_113, %c0_114] : memref<1x16xf32, #tpu.memory_space<vmem>>, vector<1x16xf32>
      tpu.vector_store %arg28[%c0_113, %c0_114], %202 {strides = array<i32>} : memref<1x16xf32, #tpu.memory_space<vmem>>, vector<1x16xf32>,
      %cst_115 = arith.constant 0x7F800000 : f32
      %204 = vector.broadcast %cst_115 : f32 to vector<1x16xf32>
      %c0_116 = arith.constant 0 : index
      %c0_117 = arith.constant 0 : index
      %205 = vector.load %arg29[%c0_116, %c0_117] : memref<1x16xf32, #tpu.memory_space<vmem>>, vector<1x16xf32>
      tpu.vector_store %arg29[%c0_116, %c0_117], %204 {strides = array<i32>} : memref<1x16xf32, #tpu.memory_space<vmem>>, vector<1x16xf32>,
      %cst_118 = arith.constant 0xFF800000 : f32
      %206 = vector.broadcast %cst_118 : f32 to vector<1x16xf32>
      %c0_119 = arith.constant 0 : index
      %c0_120 = arith.constant 0 : index
      %207 = vector.load %arg30[%c0_119, %c0_120] : memref<1x16xf32, #tpu.memory_space<vmem>>, vector<1x16xf32>
      tpu.vector_store %arg30[%c0_119, %c0_120], %206 {strides = array<i32>} : memref<1x16xf32, #tpu.memory_space<vmem>>, vector<1x16xf32>,
    } else {
    }
    %c0_19 = arith.constant 0 : index
    %c0_20 = arith.constant 0 : index
    %16 = vector.load %arg27[%c0_19, %c0_20] : memref<1x16xf32, #tpu.memory_space<vmem>>, vector<1x16xf32>
    %cst = arith.constant dense<0.000000e+00> : vector<16xf32>
    %17 = vector.multi_reduction <add>, %12, %cst [0] : vector<64x16xf32> to vector<16xf32>
    %18 = vector.shape_cast %17 : vector<16xf32> to vector<1x16xf32>
    %19 = arith.addf %16, %18 : vector<1x16xf32>
    %c0_21 = arith.constant 0 : index
    %c0_22 = arith.constant 0 : index
    %20 = vector.load %arg27[%c0_21, %c0_22] : memref<1x16xf32, #tpu.memory_space<vmem>>, vector<1x16xf32>
    tpu.vector_store %arg27[%c0_21, %c0_22], %19 {strides = array<i32>} : memref<1x16xf32, #tpu.memory_space<vmem>>, vector<1x16xf32>,
    %c0_23 = arith.constant 0 : index
    %c0_24 = arith.constant 0 : index
    %21 = vector.load %arg28[%c0_23, %c0_24] : memref<1x16xf32, #tpu.memory_space<vmem>>, vector<1x16xf32>
    %22 = arith.mulf %12, %12 : vector<64x16xf32>
    %cst_25 = arith.constant dense<0.000000e+00> : vector<16xf32>
    %23 = vector.multi_reduction <add>, %22, %cst_25 [0] : vector<64x16xf32> to vector<16xf32>
    %24 = vector.shape_cast %23 : vector<16xf32> to vector<1x16xf32>
    %25 = arith.addf %21, %24 : vector<1x16xf32>
    %c0_26 = arith.constant 0 : index
    %c0_27 = arith.constant 0 : index
    %26 = vector.load %arg28[%c0_26, %c0_27] : memref<1x16xf32, #tpu.memory_space<vmem>>, vector<1x16xf32>
    tpu.vector_store %arg28[%c0_26, %c0_27], %25 {strides = array<i32>} : memref<1x16xf32, #tpu.memory_space<vmem>>, vector<1x16xf32>,
    %c0_28 = arith.constant 0 : index
    %c0_29 = arith.constant 0 : index
    %27 = vector.load %arg29[%c0_28, %c0_29] : memref<1x16xf32, #tpu.memory_space<vmem>>, vector<1x16xf32>
    %cst_30 = arith.constant dense<0x7F800000> : vector<16xf32>
    %28 = vector.multi_reduction <minimumf>, %12, %cst_30 [0] : vector<64x16xf32> to vector<16xf32>
    %29 = vector.shape_cast %28 : vector<16xf32> to vector<1x16xf32>
    %30 = arith.minimumf %27, %29 : vector<1x16xf32>
    %c0_31 = arith.constant 0 : index
    %c0_32 = arith.constant 0 : index
    %31 = vector.load %arg29[%c0_31, %c0_32] : memref<1x16xf32, #tpu.memory_space<vmem>>, vector<1x16xf32>
    tpu.vector_store %arg29[%c0_31, %c0_32], %30 {strides = array<i32>} : memref<1x16xf32, #tpu.memory_space<vmem>>, vector<1x16xf32>,
    %c0_33 = arith.constant 0 : index
    %c0_34 = arith.constant 0 : index
    %32 = vector.load %arg30[%c0_33, %c0_34] : memref<1x16xf32, #tpu.memory_space<vmem>>, vector<1x16xf32>
    %cst_35 = arith.constant dense<0xFF800000> : vector<16xf32>
    %33 = vector.multi_reduction <maximumf>, %12, %cst_35 [0] : vector<64x16xf32> to vector<16xf32>
    %34 = vector.shape_cast %33 : vector<16xf32> to vector<1x16xf32>
    %35 = arith.maximumf %32, %34 : vector<1x16xf32>
    %c0_36 = arith.constant 0 : index
    %c0_37 = arith.constant 0 : index
    %36 = vector.load %arg30[%c0_36, %c0_37] : memref<1x16xf32, #tpu.memory_space<vmem>>, vector<1x16xf32>
    tpu.vector_store %arg30[%c0_36, %c0_37], %35 {strides = array<i32>} : memref<1x16xf32, #tpu.memory_space<vmem>>, vector<1x16xf32>,
    %c0_i32_38 = arith.constant 0 : i32
    %37 = arith.cmpi eq, %arg1, %c0_i32_38 : i32
    %38 = arith.extui %37 : i1 to i32
    %c0_i32_39 = arith.constant 0 : i32
    %39 = arith.cmpi ne, %38, %c0_i32_39 : i32
    scf.if %39 {
      %c0_109 = arith.constant 0 : index
      %c0_110 = arith.constant 0 : index
      %200 = vector.load %arg27[%c0_109, %c0_110] : memref<1x16xf32, #tpu.memory_space<vmem>>, vector<1x16xf32>
      %cst_111 = arith.constant 6.400000e+01 : f32
      %201 = vector.broadcast %cst_111 : f32 to vector<1x16xf32>
      %202 = arith.divf %200, %201 : vector<1x16xf32>
      %c0_112 = arith.constant 0 : index
      %c0_113 = arith.constant 0 : index
      %203 = vector.load %arg28[%c0_112, %c0_113] : memref<1x16xf32, #tpu.memory_space<vmem>>, vector<1x16xf32>
      %cst_114 = arith.constant 6.400000e+01 : f32
      %204 = vector.broadcast %cst_114 : f32 to vector<1x16xf32>
      %205 = arith.mulf %204, %202 : vector<1x16xf32>
      %206 = arith.mulf %205, %202 : vector<1x16xf32>
      %207 = arith.subf %203, %206 : vector<1x16xf32>
      %cst_115 = arith.constant 6.300000e+01 : f32
      %208 = vector.broadcast %cst_115 : f32 to vector<1x16xf32>
      %209 = arith.divf %207, %208 : vector<1x16xf32>
      %cst_116 = arith.constant 0.000000e+00 : f32
      %210 = vector.broadcast %cst_116 : f32 to vector<1x16xf32>
      %211 = arith.maximumf %209, %210 : vector<1x16xf32>
      %212 = math.sqrt %211 : vector<1x16xf32>
      %c0_117 = arith.constant 0 : index
      %c0_118 = arith.constant 0 : index
      %213 = vector.load %arg29[%c0_117, %c0_118] : memref<1x16xf32, #tpu.memory_space<vmem>>, vector<1x16xf32>
      %c0_119 = arith.constant 0 : index
      %c0_120 = arith.constant 0 : index
      %214 = vector.load %arg30[%c0_119, %c0_120] : memref<1x16xf32, #tpu.memory_space<vmem>>, vector<1x16xf32>
      %215 = tpu.concatenate %202, %213, %214, %212 in 1 : vector<1x16xf32>, vector<1x16xf32>, vector<1x16xf32>, vector<1x16xf32> -> vector<1x64xf32>
      %c0_121 = arith.constant 0 : index
      %c0_122 = arith.constant 0 : index
      %c0_123 = arith.constant 0 : index
      %216 = vector.load %arg26[%c0_121, %c0_122, %c0_123] : memref<1x1x64xf32, #tpu.memory_space<vmem>>, vector<1x1x64xf32>
      %217 = vector.shape_cast %216 : vector<1x1x64xf32> to vector<1x64xf32>
      %218 = vector.shape_cast %215 : vector<1x64xf32> to vector<1x1x64xf32>
      tpu.vector_store %arg26[%c0_121, %c0_122, %c0_123], %218 {strides = array<i32>} : memref<1x1x64xf32, #tpu.memory_space<vmem>>, vector<1x1x64xf32>,
    } else {
    }
    %40 = arith.truncf %12 : vector<64x16xf32> to vector<64x16xbf16>
    %c0_40 = arith.constant 0 : index
    %c0_41 = arith.constant 0 : index
    %41 = vector.load %arg12[%c0_40, %c0_41] : memref<16x64xbf16, #tpu.memory_space<vmem>>, vector<16x64xbf16>
    %cst_42 = arith.constant dense<0.000000e+00> : vector<64x64xf32>
    %42 = tpu.matmul %40, %41, %cst_42 {dimension_numbers = #tpu.dot_dimension_numbers<[1], [0], [0], [1], [0, 0, 1, 1], [], []>} : vector<64x16xbf16>, vector<16x64xbf16>, vector<64x64xf32> -> vector<64x64xf32>
    %c0_43 = arith.constant 0 : index
    %c0_44 = arith.constant 0 : index
    %43 = vector.load %arg13[%c0_43, %c0_44] : memref<1x64xf32, #tpu.memory_space<vmem>>, vector<1x64xf32>
    %44 = vector.broadcast %43 : vector<1x64xf32> to vector<64x64xf32>
    %45 = arith.addf %42, %44 : vector<64x64xf32>
    %46 = vector.extract_strided_slice %45 {offsets = [0, 0], sizes = [64, 32], strides = [1, 1]} : vector<64x64xf32> to vector<64x32xf32>
    %47 = vector.shape_cast %46 : vector<64x32xf32> to vector<8x8x32xf32>
    %48 = vector.extract_strided_slice %45 {offsets = [0, 32], sizes = [64, 32], strides = [1, 1]} : vector<64x64xf32> to vector<64x32xf32>
    %49 = vector.shape_cast %48 : vector<64x32xf32> to vector<8x8x32xf32>
    %50 = vector.shape_cast %1 : vector<8x32xf32> to vector<8x1x32xf32>
    %51 = vector.shape_cast %3 : vector<8x32xf32> to vector<1x8x32xf32>
    %52 = vector.broadcast %50 : vector<8x1x32xf32> to vector<8x8x32xf32>
    %53 = vector.broadcast %51 : vector<1x8x32xf32> to vector<8x8x32xf32>
    %54 = arith.mulf %52, %53 : vector<8x8x32xf32>
    %cst_45 = arith.constant 0.353553385 : f32
    %55 = vector.broadcast %cst_45 : f32 to vector<8x8x32xf32>
    %56 = arith.mulf %54, %55 : vector<8x8x32xf32>
    %cst_46 = arith.constant 1.000000e+00 : f32
    %57 = vector.broadcast %cst_46 : f32 to vector<8x8x32xf32>
    %58 = arith.addf %47, %57 : vector<8x8x32xf32>
    %59 = arith.mulf %56, %58 : vector<8x8x32xf32>
    %60 = arith.addf %59, %49 : vector<8x8x32xf32>
    %61 = vector.shape_cast %9 : vector<8x1xf32> to vector<8x1x1xf32>
    %62 = vector.shape_cast %11 : vector<1x8xf32> to vector<1x8x1xf32>
    %63 = vector.broadcast %61 : vector<8x1x1xf32> to vector<8x8x1xf32>
    %64 = vector.broadcast %62 : vector<1x8x1xf32> to vector<8x8x1xf32>
    %65 = arith.mulf %63, %64 : vector<8x8x1xf32>
    %c0_47 = arith.constant 0 : index
    %c0_48 = arith.constant 0 : index
    %c0_49 = arith.constant 0 : index
    %66 = vector.load %arg8[%c0_47, %c0_48, %c0_49] : memref<1x1x32xf32, #tpu.memory_space<vmem>>, vector<1x1x32xf32>
    %67 = vector.shape_cast %66 : vector<1x1x32xf32> to vector<1x32xf32>
    %c0_50 = arith.constant 0 : index
    %c0_51 = arith.constant 0 : index
    %c0_52 = arith.constant 0 : index
    %68 = vector.load %arg9[%c0_50, %c0_51, %c0_52] : memref<1x1x32xf32, #tpu.memory_space<vmem>>, vector<1x1x32xf32>
    %69 = vector.shape_cast %68 : vector<1x1x32xf32> to vector<1x32xf32>
    %cst_53 = arith.constant 1.000000e+00 : f32
    %70 = vector.broadcast %cst_53 : f32 to vector<1x32xf32>
    %71 = arith.addf %69, %70 : vector<1x32xf32>
    %72 = vector.shape_cast %71 : vector<1x32xf32> to vector<1x1x32xf32>
    %73 = vector.broadcast %72 : vector<1x1x32xf32> to vector<8x8x32xf32>
    %74 = arith.mulf %73, %60 : vector<8x8x32xf32>
    %75 = vector.shape_cast %67 : vector<1x32xf32> to vector<1x1x32xf32>
    %76 = vector.broadcast %75 : vector<1x1x32xf32> to vector<8x8x32xf32>
    %77 = arith.addf %76, %74 : vector<8x8x32xf32>
    %78 = vector.shape_cast %77 : vector<8x8x32xf32> to vector<64x32xf32>
    %79 = arith.truncf %78 : vector<64x32xf32> to vector<64x32xbf16>
    %c0_54 = arith.constant 0 : index
    %c0_55 = arith.constant 0 : index
    %80 = vector.load %arg14[%c0_54, %c0_55] : memref<32x16xbf16, #tpu.memory_space<vmem>>, vector<32x16xbf16>
    %cst_56 = arith.constant dense<0.000000e+00> : vector<64x16xf32>
    %81 = tpu.matmul %79, %80, %cst_56 {dimension_numbers = #tpu.dot_dimension_numbers<[1], [0], [0], [1], [0, 0, 1, 1], [], []>} : vector<64x32xbf16>, vector<32x16xbf16>, vector<64x16xf32> -> vector<64x16xf32>
    %c0_57 = arith.constant 0 : index
    %c0_58 = arith.constant 0 : index
    %82 = vector.load %arg15[%c0_57, %c0_58] : memref<1x16xf32, #tpu.memory_space<vmem>>, vector<1x16xf32>
    %83 = vector.broadcast %82 : vector<1x16xf32> to vector<64x16xf32>
    %84 = arith.addf %81, %83 : vector<64x16xf32>
    %85 = vector.shape_cast %84 : vector<64x16xf32> to vector<8x8x16xf32>
    %86 = vector.broadcast %65 : vector<8x8x1xf32> to vector<8x8x16xf32>
    %87 = arith.mulf %85, %86 : vector<8x8x16xf32>
    %88 = arith.addf %7, %87 : vector<8x8x16xf32>
    %cst_59 = arith.constant dense<0.000000e+00> : vector<8x8xf32>
    %89 = vector.multi_reduction <add>, %88, %cst_59 [2] : vector<8x8x16xf32> to vector<8x8xf32>
    %90 = vector.shape_cast %89 : vector<8x8xf32> to vector<8x8x1xf32>
    %cst_60 = arith.constant 1.600000e+01 : f32
    %91 = vector.broadcast %cst_60 : f32 to vector<8x8x1xf32>
    %92 = arith.divf %90, %91 : vector<8x8x1xf32>
    %93 = vector.broadcast %92 : vector<8x8x1xf32> to vector<8x8x16xf32>
    %94 = arith.subf %88, %93 : vector<8x8x16xf32>
    %95 = arith.mulf %94, %94 : vector<8x8x16xf32>
    %cst_61 = arith.constant dense<0.000000e+00> : vector<8x8xf32>
    %96 = vector.multi_reduction <add>, %95, %cst_61 [2] : vector<8x8x16xf32> to vector<8x8xf32>
    %97 = vector.shape_cast %96 : vector<8x8xf32> to vector<8x8x1xf32>
    %cst_62 = arith.constant 1.600000e+01 : f32
    %98 = vector.broadcast %cst_62 : f32 to vector<8x8x1xf32>
    %99 = arith.divf %97, %98 : vector<8x8x1xf32>
    %100 = vector.broadcast %92 : vector<8x8x1xf32> to vector<8x8x16xf32>
    %101 = arith.subf %88, %100 : vector<8x8x16xf32>
    %cst_63 = arith.constant 9.99999974E-6 : f32
    %102 = vector.broadcast %cst_63 : f32 to vector<8x8x1xf32>
    %103 = arith.addf %99, %102 : vector<8x8x1xf32>
    %104 = math.rsqrt %103 : vector<8x8x1xf32>
    %105 = vector.broadcast %104 : vector<8x8x1xf32> to vector<8x8x16xf32>
    %106 = arith.mulf %101, %105 : vector<8x8x16xf32>
    %c0_64 = arith.constant 0 : index
    %c0_65 = arith.constant 0 : index
    %107 = vector.load %arg16[%c0_64, %c0_65] : memref<1x16xf32, #tpu.memory_space<vmem>>, vector<1x16xf32>
    %108 = vector.shape_cast %107 : vector<1x16xf32> to vector<1x1x16xf32>
    %109 = vector.broadcast %108 : vector<1x1x16xf32> to vector<8x8x16xf32>
    %110 = arith.mulf %106, %109 : vector<8x8x16xf32>
    %c0_66 = arith.constant 0 : index
    %c0_67 = arith.constant 0 : index
    %111 = vector.load %arg17[%c0_66, %c0_67] : memref<1x16xf32, #tpu.memory_space<vmem>>, vector<1x16xf32>
    %112 = vector.shape_cast %111 : vector<1x16xf32> to vector<1x1x16xf32>
    %113 = vector.broadcast %112 : vector<1x1x16xf32> to vector<8x8x16xf32>
    %114 = arith.addf %110, %113 : vector<8x8x16xf32>
    %115 = vector.shape_cast %114 : vector<8x8x16xf32> to vector<64x16xf32>
    %116 = arith.truncf %115 : vector<64x16xf32> to vector<64x16xbf16>
    %c0_68 = arith.constant 0 : index
    %c0_69 = arith.constant 0 : index
    %117 = vector.load %arg18[%c0_68, %c0_69] : memref<16x32xbf16, #tpu.memory_space<vmem>>, vector<16x32xbf16>
    %cst_70 = arith.constant dense<0.000000e+00> : vector<64x32xf32>
    %118 = tpu.matmul %116, %117, %cst_70 {dimension_numbers = #tpu.dot_dimension_numbers<[1], [0], [0], [1], [0, 0, 1, 1], [], []>} : vector<64x16xbf16>, vector<16x32xbf16>, vector<64x32xf32> -> vector<64x32xf32>
    %c0_71 = arith.constant 0 : index
    %c0_72 = arith.constant 0 : index
    %119 = vector.load %arg19[%c0_71, %c0_72] : memref<1x32xf32, #tpu.memory_space<vmem>>, vector<1x32xf32>
    %120 = vector.broadcast %119 : vector<1x32xf32> to vector<64x32xf32>
    %121 = arith.addf %118, %120 : vector<64x32xf32>
    %cst_73 = arith.constant 0.000000e+00 : f32
    %122 = vector.broadcast %cst_73 : f32 to vector<64x32xf32>
    %123 = arith.maximumf %121, %122 : vector<64x32xf32>
    %124 = arith.truncf %123 : vector<64x32xf32> to vector<64x32xbf16>
    %c0_74 = arith.constant 0 : index
    %c0_75 = arith.constant 0 : index
    %125 = vector.load %arg20[%c0_74, %c0_75] : memref<32x16xbf16, #tpu.memory_space<vmem>>, vector<32x16xbf16>
    %cst_76 = arith.constant dense<0.000000e+00> : vector<64x16xf32>
    %126 = tpu.matmul %124, %125, %cst_76 {dimension_numbers = #tpu.dot_dimension_numbers<[1], [0], [0], [1], [0, 0, 1, 1], [], []>} : vector<64x32xbf16>, vector<32x16xbf16>, vector<64x16xf32> -> vector<64x16xf32>
    %c0_77 = arith.constant 0 : index
    %c0_78 = arith.constant 0 : index
    %127 = vector.load %arg21[%c0_77, %c0_78] : memref<1x16xf32, #tpu.memory_space<vmem>>, vector<1x16xf32>
    %128 = vector.broadcast %127 : vector<1x16xf32> to vector<64x16xf32>
    %129 = arith.addf %126, %128 : vector<64x16xf32>
    %130 = vector.shape_cast %129 : vector<64x16xf32> to vector<8x8x16xf32>
    %131 = arith.addf %114, %130 : vector<8x8x16xf32>
    %cst_79 = arith.constant dense<0.000000e+00> : vector<8x8xf32>
    %132 = vector.multi_reduction <add>, %131, %cst_79 [2] : vector<8x8x16xf32> to vector<8x8xf32>
    %133 = vector.shape_cast %132 : vector<8x8xf32> to vector<8x8x1xf32>
    %cst_80 = arith.constant 1.600000e+01 : f32
    %134 = vector.broadcast %cst_80 : f32 to vector<8x8x1xf32>
    %135 = arith.divf %133, %134 : vector<8x8x1xf32>
    %136 = vector.broadcast %135 : vector<8x8x1xf32> to vector<8x8x16xf32>
    %137 = arith.subf %131, %136 : vector<8x8x16xf32>
    %138 = arith.mulf %137, %137 : vector<8x8x16xf32>
    %cst_81 = arith.constant dense<0.000000e+00> : vector<8x8xf32>
    %139 = vector.multi_reduction <add>, %138, %cst_81 [2] : vector<8x8x16xf32> to vector<8x8xf32>
    %140 = vector.shape_cast %139 : vector<8x8xf32> to vector<8x8x1xf32>
    %cst_82 = arith.constant 1.600000e+01 : f32
    %141 = vector.broadcast %cst_82 : f32 to vector<8x8x1xf32>
    %142 = arith.divf %140, %141 : vector<8x8x1xf32>
    %143 = vector.broadcast %135 : vector<8x8x1xf32> to vector<8x8x16xf32>
    %144 = arith.subf %131, %143 : vector<8x8x16xf32>
    %cst_83 = arith.constant 9.99999974E-6 : f32
    %145 = vector.broadcast %cst_83 : f32 to vector<8x8x1xf32>
    %146 = arith.addf %142, %145 : vector<8x8x1xf32>
    %147 = math.rsqrt %146 : vector<8x8x1xf32>
    %148 = vector.broadcast %147 : vector<8x8x1xf32> to vector<8x8x16xf32>
    %149 = arith.mulf %144, %148 : vector<8x8x16xf32>
    %c0_84 = arith.constant 0 : index
    %c0_85 = arith.constant 0 : index
    %150 = vector.load %arg22[%c0_84, %c0_85] : memref<1x16xf32, #tpu.memory_space<vmem>>, vector<1x16xf32>
    %151 = vector.shape_cast %150 : vector<1x16xf32> to vector<1x1x16xf32>
    %152 = vector.broadcast %151 : vector<1x1x16xf32> to vector<8x8x16xf32>
    %153 = arith.mulf %149, %152 : vector<8x8x16xf32>
    %c0_86 = arith.constant 0 : index
    %c0_87 = arith.constant 0 : index
    %154 = vector.load %arg23[%c0_86, %c0_87] : memref<1x16xf32, #tpu.memory_space<vmem>>, vector<1x16xf32>
    %155 = vector.shape_cast %154 : vector<1x16xf32> to vector<1x1x16xf32>
    %156 = vector.broadcast %155 : vector<1x1x16xf32> to vector<8x8x16xf32>
    %157 = arith.addf %153, %156 : vector<8x8x16xf32>
    %c0_88 = arith.constant 0 : index
    %c0_89 = arith.constant 0 : index
    %c0_90 = arith.constant 0 : index
    %c0_91 = arith.constant 0 : index
    %158 = vector.load %arg24[%c0_88, %c0_89, %c0_90, %c0_91] : memref<1x8x8x16xf32, #tpu.memory_space<vmem>>, vector<1x8x8x16xf32>
    %159 = vector.shape_cast %158 : vector<1x8x8x16xf32> to vector<8x8x16xf32>
    %160 = vector.shape_cast %157 : vector<8x8x16xf32> to vector<1x8x8x16xf32>
    tpu.vector_store %arg24[%c0_88, %c0_89, %c0_90, %c0_91], %160 {strides = array<i32>} : memref<1x8x8x16xf32, #tpu.memory_space<vmem>>, vector<1x8x8x16xf32>,
    %cst_92 = arith.constant 0.000000e+00 : f32
    %161 = vector.broadcast %cst_92 : f32 to vector<1x8xf32>
    %162 = arith.cmpf ogt, %11, %161 : vector<1x8xf32>
    %cst_93 = arith.constant 0.000000e+00 : f32
    %cst_94 = arith.constant -1.000000e+30 : f32
    %163 = vector.broadcast %cst_93 : f32 to vector<1x8xf32>
    %164 = vector.broadcast %cst_94 : f32 to vector<1x8xf32>
    %165 = arith.select %162, %163, %164 : vector<1x8xi1>, vector<1x8xf32>
    %166 = vector.shape_cast %165 : vector<1x8xf32> to vector<1x8x1xf32>
    %167 = vector.broadcast %166 : vector<1x8x1xf32> to vector<8x8x32xf32>
    %168 = arith.addf %60, %167 : vector<8x8x32xf32>
    %cst_95 = arith.constant dense<0xFF800000> : vector<8x32xf32>
    %169 = vector.multi_reduction <maximumf>, %168, %cst_95 [1] : vector<8x8x32xf32> to vector<8x32xf32>
    %170 = vector.shape_cast %169 : vector<8x32xf32> to vector<8x1x32xf32>
    %171 = vector.broadcast %170 : vector<8x1x32xf32> to vector<8x8x32xf32>
    %172 = arith.subf %168, %171 : vector<8x8x32xf32>
    %173 = math.exp %172 : vector<8x8x32xf32>
    %cst_96 = arith.constant dense<0.000000e+00> : vector<8x32xf32>
    %174 = vector.multi_reduction <add>, %173, %cst_96 [1] : vector<8x8x32xf32> to vector<8x32xf32>
    %175 = vector.shape_cast %174 : vector<8x32xf32> to vector<8x1x32xf32>
    %176 = tpu.reciprocal %175 {approx = true} : vector<8x1x32xf32> -> vector<8x1x32xf32>
    %177 = arith.mulf %175, %176 : vector<8x1x32xf32>
    %cst_97 = arith.constant 2.000000e+00 : f32
    %178 = vector.broadcast %cst_97 : f32 to vector<8x1x32xf32>
    %179 = arith.subf %178, %177 : vector<8x1x32xf32>
    %180 = arith.mulf %176, %179 : vector<8x1x32xf32>
    %181 = vector.broadcast %180 : vector<8x1x32xf32> to vector<8x8x32xf32>
    %182 = arith.mulf %173, %181 : vector<8x8x32xf32>
    %183 = vector.shape_cast %5 : vector<8x32xf32> to vector<1x8x32xf32>
    %184 = vector.broadcast %183 : vector<1x8x32xf32> to vector<8x8x32xf32>
    %185 = arith.mulf %182, %184 : vector<8x8x32xf32>
    %cst_98 = arith.constant dense<0.000000e+00> : vector<8x32xf32>
    %186 = vector.multi_reduction <add>, %185, %cst_98 [1] : vector<8x8x32xf32> to vector<8x32xf32>
    %c0_99 = arith.constant 0 : index
    %c0_100 = arith.constant 0 : index
    %c0_101 = arith.constant 0 : index
    %187 = vector.load %arg10[%c0_99, %c0_100, %c0_101] : memref<1x1x32xf32, #tpu.memory_space<vmem>>, vector<1x1x32xf32>
    %188 = vector.shape_cast %187 : vector<1x1x32xf32> to vector<1x32xf32>
    %c0_102 = arith.constant 0 : index
    %c0_103 = arith.constant 0 : index
    %c0_104 = arith.constant 0 : index
    %189 = vector.load %arg11[%c0_102, %c0_103, %c0_104] : memref<1x1x32xf32, #tpu.memory_space<vmem>>, vector<1x1x32xf32>
    %190 = vector.shape_cast %189 : vector<1x1x32xf32> to vector<1x32xf32>
    %cst_105 = arith.constant 1.000000e+00 : f32
    %191 = vector.broadcast %cst_105 : f32 to vector<1x32xf32>
    %192 = arith.addf %190, %191 : vector<1x32xf32>
    %193 = vector.broadcast %192 : vector<1x32xf32> to vector<8x32xf32>
    %194 = arith.mulf %193, %186 : vector<8x32xf32>
    %195 = vector.broadcast %188 : vector<1x32xf32> to vector<8x32xf32>
    %196 = arith.addf %195, %194 : vector<8x32xf32>
    %c0_106 = arith.constant 0 : index
    %c0_107 = arith.constant 0 : index
    %c0_108 = arith.constant 0 : index
    %197 = vector.load %arg25[%c0_106, %c0_107, %c0_108] : memref<1x8x32xf32, #tpu.memory_space<vmem>>, vector<1x8x32xf32>
    %198 = vector.shape_cast %197 : vector<1x8x32xf32> to vector<8x32xf32>
    %199 = vector.shape_cast %196 : vector<8x32xf32> to vector<1x8x32xf32>
    tpu.vector_store %arg25[%c0_106, %c0_107, %c0_108], %199 {strides = array<i32>} : memref<1x8x32xf32, #tpu.memory_space<vmem>>, vector<1x8x32xf32>,
    return
  }
  func.func @transform_0(%arg0: i32, %arg1: i32) -> (i32, i32, i32) {
    %c0_i32 = arith.constant 0 : i32
    %c0_i32_0 = arith.constant 0 : i32
    return %arg0, %arg1, %c0_i32 : i32, i32, i32
  }
  func.func @transform_1(%arg0: i32, %arg1: i32) -> (i32, i32, i32) {
    %c0_i32 = arith.constant 0 : i32
    %c0_i32_0 = arith.constant 0 : i32
    %c0_i32_1 = arith.constant 0 : i32
    return %arg0, %c0_i32, %c0_i32_0 : i32, i32, i32
  }
  func.func @transform_2(%arg0: i32, %arg1: i32) -> (i32, i32, i32) {
    %c0_i32 = arith.constant 0 : i32
    %c0_i32_0 = arith.constant 0 : i32
    %c0_i32_1 = arith.constant 0 : i32
    return %arg0, %c0_i32, %c0_i32_0 : i32, i32, i32
  }
  func.func @transform_3(%arg0: i32, %arg1: i32) -> (i32, i32, i32, i32) {
    %c0_i32 = arith.constant 0 : i32
    %c0_i32_0 = arith.constant 0 : i32
    %c0_i32_1 = arith.constant 0 : i32
    return %arg0, %arg1, %c0_i32, %c0_i32_0 : i32, i32, i32, i32
  }
  func.func @transform_4(%arg0: i32, %arg1: i32) -> (i32, i32, i32) {
    %c0_i32 = arith.constant 0 : i32
    %c0_i32_0 = arith.constant 0 : i32
    return %arg0, %arg1, %c0_i32 : i32, i32, i32
  }
  func.func @transform_5(%arg0: i32, %arg1: i32) -> (i32, i32, i32) {
    %c0_i32 = arith.constant 0 : i32
    %c0_i32_0 = arith.constant 0 : i32
    %c0_i32_1 = arith.constant 0 : i32
    return %arg0, %c0_i32, %c0_i32_0 : i32, i32, i32
  }
  func.func @transform_6(%arg0: i32, %arg1: i32) -> (i32, i32, i32) {
    %c0_i32 = arith.constant 0 : i32
    %c0_i32_0 = arith.constant 0 : i32
    %c0_i32_1 = arith.constant 0 : i32
    return %arg0, %c0_i32, %c0_i32_0 : i32, i32, i32
  }
  func.func @transform_7(%arg0: i32, %arg1: i32) -> (i32, i32, i32) {
    %c0_i32 = arith.constant 0 : i32
    %c0_i32_0 = arith.constant 0 : i32
    %c0_i32_1 = arith.constant 0 : i32
    return %arg0, %c0_i32, %c0_i32_0 : i32, i32, i32
  }
  func.func @transform_8(%arg0: i32, %arg1: i32) -> (i32, i32, i32) {
    %c0_i32 = arith.constant 0 : i32
    %c0_i32_0 = arith.constant 0 : i32
    %c0_i32_1 = arith.constant 0 : i32
    return %arg0, %c0_i32, %c0_i32_0 : i32, i32, i32
  }
  func.func @transform_9(%arg0: i32, %arg1: i32) -> (i32, i32, i32) {
    %c0_i32 = arith.constant 0 : i32
    %c0_i32_0 = arith.constant 0 : i32
    %c0_i32_1 = arith.constant 0 : i32
    return %arg0, %c0_i32, %c0_i32_0 : i32, i32, i32
  }
  func.func @transform_10(%arg0: i32, %arg1: i32) -> (i32, i32) {
    %c0_i32 = arith.constant 0 : i32
    %c0_i32_0 = arith.constant 0 : i32
    %c0_i32_1 = arith.constant 0 : i32
    return %c0_i32, %c0_i32_0 : i32, i32
  }
  func.func @transform_11(%arg0: i32, %arg1: i32) -> (i32, i32) {
    %c0_i32 = arith.constant 0 : i32
    %c0_i32_0 = arith.constant 0 : i32
    %c0_i32_1 = arith.constant 0 : i32
    return %c0_i32, %c0_i32_0 : i32, i32
  }
  func.func @transform_12(%arg0: i32, %arg1: i32) -> (i32, i32) {
    %c0_i32 = arith.constant 0 : i32
    %c0_i32_0 = arith.constant 0 : i32
    %c0_i32_1 = arith.constant 0 : i32
    return %c0_i32, %c0_i32_0 : i32, i32
  }
  func.func @transform_13(%arg0: i32, %arg1: i32) -> (i32, i32) {
    %c0_i32 = arith.constant 0 : i32
    %c0_i32_0 = arith.constant 0 : i32
    %c0_i32_1 = arith.constant 0 : i32
    return %c0_i32, %c0_i32_0 : i32, i32
  }
  func.func @transform_14(%arg0: i32, %arg1: i32) -> (i32, i32) {
    %c0_i32 = arith.constant 0 : i32
    %c0_i32_0 = arith.constant 0 : i32
    %c0_i32_1 = arith.constant 0 : i32
    return %c0_i32, %c0_i32_0 : i32, i32
  }
  func.func @transform_15(%arg0: i32, %arg1: i32) -> (i32, i32) {
    %c0_i32 = arith.constant 0 : i32
    %c0_i32_0 = arith.constant 0 : i32
    %c0_i32_1 = arith.constant 0 : i32
    return %c0_i32, %c0_i32_0 : i32, i32
  }
  func.func @transform_16(%arg0: i32, %arg1: i32) -> (i32, i32) {
    %c0_i32 = arith.constant 0 : i32
    %c0_i32_0 = arith.constant 0 : i32
    %c0_i32_1 = arith.constant 0 : i32
    return %c0_i32, %c0_i32_0 : i32, i32
  }
  func.func @transform_17(%arg0: i32, %arg1: i32) -> (i32, i32) {
    %c0_i32 = arith.constant 0 : i32
    %c0_i32_0 = arith.constant 0 : i32
    %c0_i32_1 = arith.constant 0 : i32
    return %c0_i32, %c0_i32_0 : i32, i32
  }
  func.func @transform_18(%arg0: i32, %arg1: i32) -> (i32, i32) {
    %c0_i32 = arith.constant 0 : i32
    %c0_i32_0 = arith.constant 0 : i32
    %c0_i32_1 = arith.constant 0 : i32
    return %c0_i32, %c0_i32_0 : i32, i32
  }
  func.func @transform_19(%arg0: i32, %arg1: i32) -> (i32, i32) {
    %c0_i32 = arith.constant 0 : i32
    %c0_i32_0 = arith.constant 0 : i32
    %c0_i32_1 = arith.constant 0 : i32
    return %c0_i32, %c0_i32_0 : i32, i32
  }
  func.func @transform_20(%arg0: i32, %arg1: i32) -> (i32, i32) {
    %c0_i32 = arith.constant 0 : i32
    %c0_i32_0 = arith.constant 0 : i32
    %c0_i32_1 = arith.constant 0 : i32
    return %c0_i32, %c0_i32_0 : i32, i32
  }
  func.func @transform_21(%arg0: i32, %arg1: i32) -> (i32, i32) {
    %c0_i32 = arith.constant 0 : i32
    %c0_i32_0 = arith.constant 0 : i32
    %c0_i32_1 = arith.constant 0 : i32
    return %c0_i32, %c0_i32_0 : i32, i32
  }
  func.func @transform_22(%arg0: i32, %arg1: i32) -> (i32, i32, i32, i32) {
    %c0_i32 = arith.constant 0 : i32
    %c0_i32_0 = arith.constant 0 : i32
    %c0_i32_1 = arith.constant 0 : i32
    return %arg0, %arg1, %c0_i32, %c0_i32_0 : i32, i32, i32, i32
  }
  func.func @transform_23(%arg0: i32, %arg1: i32) -> (i32, i32, i32) {
    %c0_i32 = arith.constant 0 : i32
    %c0_i32_0 = arith.constant 0 : i32
    return %arg0, %arg1, %c0_i32 : i32, i32, i32
  }
  func.func @transform_24(%arg0: i32, %arg1: i32) -> (i32, i32, i32) {
    %c0_i32 = arith.constant 0 : i32
    %c0_i32_0 = arith.constant 0 : i32
    %c0_i32_1 = arith.constant 0 : i32
    return %arg0, %c0_i32, %c0_i32_0 : i32, i32, i32
  }
}

module attributes {stable_mosaic.version = 11 : i64} {
  func.func @_x_tail_kernel(%arg0: i32, %arg1: memref<16x32xf32, #tpu.memory_space<vmem>>, %arg2: memref<16x32xf32, #tpu.memory_space<vmem>>, %arg3: memref<16x1xf32, #tpu.memory_space<vmem>>, %arg4: memref<32x32xbf16, #tpu.memory_space<vmem>>, %arg5: memref<1x32xf32, #tpu.memory_space<vmem>>, %arg6: memref<1x32xf32, #tpu.memory_space<vmem>>, %arg7: memref<1x32xf32, #tpu.memory_space<vmem>>, %arg8: memref<32x64xbf16, #tpu.memory_space<vmem>>, %arg9: memref<1x64xf32, #tpu.memory_space<vmem>>, %arg10: memref<64x32xbf16, #tpu.memory_space<vmem>>, %arg11: memref<1x32xf32, #tpu.memory_space<vmem>>, %arg12: memref<1x32xf32, #tpu.memory_space<vmem>>, %arg13: memref<1x32xf32, #tpu.memory_space<vmem>>, %arg14: memref<16x32xf32, #tpu.memory_space<vmem>>) attributes {dimension_semantics = [#tpu.dimension_semantics<parallel>], iteration_bounds = array<i64: 1>, scalar_prefetch = 0 : i64, scratch_operands = 0 : i64, tpu.core_type = #tpu.core_type<tc>, window_params = [{transform_indices = @transform_0, window_bounds = array<i64: 16, 32>}, {transform_indices = @transform_1, window_bounds = array<i64: 16, 32>}, {transform_indices = @transform_2, window_bounds = array<i64: 16, 1>}, {pipeline_mode = #tpu.pipeline_mode<synchronous>, transform_indices = @transform_3, window_bounds = array<i64: 32, 32>}, {pipeline_mode = #tpu.pipeline_mode<synchronous>, transform_indices = @transform_4, window_bounds = array<i64: 1, 32>}, {pipeline_mode = #tpu.pipeline_mode<synchronous>, transform_indices = @transform_5, window_bounds = array<i64: 1, 32>}, {pipeline_mode = #tpu.pipeline_mode<synchronous>, transform_indices = @transform_6, window_bounds = array<i64: 1, 32>}, {pipeline_mode = #tpu.pipeline_mode<synchronous>, transform_indices = @transform_7, window_bounds = array<i64: 32, 64>}, {pipeline_mode = #tpu.pipeline_mode<synchronous>, transform_indices = @transform_8, window_bounds = array<i64: 1, 64>}, {pipeline_mode = #tpu.pipeline_mode<synchronous>, transform_indices = @transform_9, window_bounds = array<i64: 64, 32>}, {pipeline_mode = #tpu.pipeline_mode<synchronous>, transform_indices = @transform_10, window_bounds = array<i64: 1, 32>}, {pipeline_mode = #tpu.pipeline_mode<synchronous>, transform_indices = @transform_11, window_bounds = array<i64: 1, 32>}, {pipeline_mode = #tpu.pipeline_mode<synchronous>, transform_indices = @transform_12, window_bounds = array<i64: 1, 32>}, {transform_indices = @transform_13, window_bounds = array<i64: 16, 32>}]} {
    %c0 = arith.constant 0 : index
    %c0_0 = arith.constant 0 : index
    %0 = vector.load %arg1[%c0, %c0_0] : memref<16x32xf32, #tpu.memory_space<vmem>>, vector<16x32xf32>
    %1 = arith.truncf %0 : vector<16x32xf32> to vector<16x32xbf16>
    %c0_1 = arith.constant 0 : index
    %c0_2 = arith.constant 0 : index
    %2 = vector.load %arg4[%c0_1, %c0_2] : memref<32x32xbf16, #tpu.memory_space<vmem>>, vector<32x32xbf16>
    %cst = arith.constant dense<0.000000e+00> : vector<16x32xf32>
    %3 = tpu.matmul %1, %2, %cst {dimension_numbers = #tpu.dot_dimension_numbers<[1], [0], [0], [1], [0, 0, 1, 1], [], []>} : vector<16x32xbf16>, vector<32x32xbf16>, vector<16x32xf32> -> vector<16x32xf32>
    %c0_3 = arith.constant 0 : index
    %c0_4 = arith.constant 0 : index
    %4 = vector.load %arg5[%c0_3, %c0_4] : memref<1x32xf32, #tpu.memory_space<vmem>>, vector<1x32xf32>
    %5 = vector.broadcast %4 : vector<1x32xf32> to vector<16x32xf32>
    %6 = arith.addf %3, %5 : vector<16x32xf32>
    %c0_5 = arith.constant 0 : index
    %c0_6 = arith.constant 0 : index
    %7 = vector.load %arg3[%c0_5, %c0_6] : memref<16x1xf32, #tpu.memory_space<vmem>>, vector<16x1xf32>
    %8 = vector.broadcast %7 : vector<16x1xf32> to vector<16x32xf32>
    %9 = arith.mulf %6, %8 : vector<16x32xf32>
    %c0_7 = arith.constant 0 : index
    %c0_8 = arith.constant 0 : index
    %10 = vector.load %arg2[%c0_7, %c0_8] : memref<16x32xf32, #tpu.memory_space<vmem>>, vector<16x32xf32>
    %11 = arith.addf %10, %9 : vector<16x32xf32>
    %cst_9 = arith.constant dense<0.000000e+00> : vector<16xf32>
    %12 = vector.multi_reduction <add>, %11, %cst_9 [1] : vector<16x32xf32> to vector<16xf32>
    %13 = vector.shape_cast %12 : vector<16xf32> to vector<16x1xf32>
    %cst_10 = arith.constant 3.200000e+01 : f32
    %14 = vector.broadcast %cst_10 : f32 to vector<16x1xf32>
    %15 = arith.divf %13, %14 : vector<16x1xf32>
    %16 = vector.broadcast %15 : vector<16x1xf32> to vector<16x32xf32>
    %17 = arith.subf %11, %16 : vector<16x32xf32>
    %18 = arith.mulf %17, %17 : vector<16x32xf32>
    %cst_11 = arith.constant dense<0.000000e+00> : vector<16xf32>
    %19 = vector.multi_reduction <add>, %18, %cst_11 [1] : vector<16x32xf32> to vector<16xf32>
    %20 = vector.shape_cast %19 : vector<16xf32> to vector<16x1xf32>
    %cst_12 = arith.constant 3.200000e+01 : f32
    %21 = vector.broadcast %cst_12 : f32 to vector<16x1xf32>
    %22 = arith.divf %20, %21 : vector<16x1xf32>
    %23 = vector.broadcast %15 : vector<16x1xf32> to vector<16x32xf32>
    %24 = arith.subf %11, %23 : vector<16x32xf32>
    %cst_13 = arith.constant 9.99999974E-6 : f32
    %25 = vector.broadcast %cst_13 : f32 to vector<16x1xf32>
    %26 = arith.addf %22, %25 : vector<16x1xf32>
    %27 = math.rsqrt %26 : vector<16x1xf32>
    %28 = vector.broadcast %27 : vector<16x1xf32> to vector<16x32xf32>
    %29 = arith.mulf %24, %28 : vector<16x32xf32>
    %c0_14 = arith.constant 0 : index
    %c0_15 = arith.constant 0 : index
    %30 = vector.load %arg6[%c0_14, %c0_15] : memref<1x32xf32, #tpu.memory_space<vmem>>, vector<1x32xf32>
    %31 = vector.broadcast %30 : vector<1x32xf32> to vector<16x32xf32>
    %32 = arith.mulf %29, %31 : vector<16x32xf32>
    %c0_16 = arith.constant 0 : index
    %c0_17 = arith.constant 0 : index
    %33 = vector.load %arg7[%c0_16, %c0_17] : memref<1x32xf32, #tpu.memory_space<vmem>>, vector<1x32xf32>
    %34 = vector.broadcast %33 : vector<1x32xf32> to vector<16x32xf32>
    %35 = arith.addf %32, %34 : vector<16x32xf32>
    %36 = arith.truncf %35 : vector<16x32xf32> to vector<16x32xbf16>
    %c0_18 = arith.constant 0 : index
    %c0_19 = arith.constant 0 : index
    %37 = vector.load %arg8[%c0_18, %c0_19] : memref<32x64xbf16, #tpu.memory_space<vmem>>, vector<32x64xbf16>
    %cst_20 = arith.constant dense<0.000000e+00> : vector<16x64xf32>
    %38 = tpu.matmul %36, %37, %cst_20 {dimension_numbers = #tpu.dot_dimension_numbers<[1], [0], [0], [1], [0, 0, 1, 1], [], []>} : vector<16x32xbf16>, vector<32x64xbf16>, vector<16x64xf32> -> vector<16x64xf32>
    %c0_21 = arith.constant 0 : index
    %c0_22 = arith.constant 0 : index
    %39 = vector.load %arg9[%c0_21, %c0_22] : memref<1x64xf32, #tpu.memory_space<vmem>>, vector<1x64xf32>
    %40 = vector.broadcast %39 : vector<1x64xf32> to vector<16x64xf32>
    %41 = arith.addf %38, %40 : vector<16x64xf32>
    %cst_23 = arith.constant 0.000000e+00 : f32
    %42 = vector.broadcast %cst_23 : f32 to vector<16x64xf32>
    %43 = arith.maximumf %41, %42 : vector<16x64xf32>
    %44 = arith.truncf %43 : vector<16x64xf32> to vector<16x64xbf16>
    %c0_24 = arith.constant 0 : index
    %c0_25 = arith.constant 0 : index
    %45 = vector.load %arg10[%c0_24, %c0_25] : memref<64x32xbf16, #tpu.memory_space<vmem>>, vector<64x32xbf16>
    %cst_26 = arith.constant dense<0.000000e+00> : vector<16x32xf32>
    %46 = tpu.matmul %44, %45, %cst_26 {dimension_numbers = #tpu.dot_dimension_numbers<[1], [0], [0], [1], [0, 0, 1, 1], [], []>} : vector<16x64xbf16>, vector<64x32xbf16>, vector<16x32xf32> -> vector<16x32xf32>
    %c0_27 = arith.constant 0 : index
    %c0_28 = arith.constant 0 : index
    %47 = vector.load %arg11[%c0_27, %c0_28] : memref<1x32xf32, #tpu.memory_space<vmem>>, vector<1x32xf32>
    %48 = vector.broadcast %47 : vector<1x32xf32> to vector<16x32xf32>
    %49 = arith.addf %46, %48 : vector<16x32xf32>
    %50 = arith.addf %35, %49 : vector<16x32xf32>
    %cst_29 = arith.constant dense<0.000000e+00> : vector<16xf32>
    %51 = vector.multi_reduction <add>, %50, %cst_29 [1] : vector<16x32xf32> to vector<16xf32>
    %52 = vector.shape_cast %51 : vector<16xf32> to vector<16x1xf32>
    %cst_30 = arith.constant 3.200000e+01 : f32
    %53 = vector.broadcast %cst_30 : f32 to vector<16x1xf32>
    %54 = arith.divf %52, %53 : vector<16x1xf32>
    %55 = vector.broadcast %54 : vector<16x1xf32> to vector<16x32xf32>
    %56 = arith.subf %50, %55 : vector<16x32xf32>
    %57 = arith.mulf %56, %56 : vector<16x32xf32>
    %cst_31 = arith.constant dense<0.000000e+00> : vector<16xf32>
    %58 = vector.multi_reduction <add>, %57, %cst_31 [1] : vector<16x32xf32> to vector<16xf32>
    %59 = vector.shape_cast %58 : vector<16xf32> to vector<16x1xf32>
    %cst_32 = arith.constant 3.200000e+01 : f32
    %60 = vector.broadcast %cst_32 : f32 to vector<16x1xf32>
    %61 = arith.divf %59, %60 : vector<16x1xf32>
    %62 = vector.broadcast %54 : vector<16x1xf32> to vector<16x32xf32>
    %63 = arith.subf %50, %62 : vector<16x32xf32>
    %cst_33 = arith.constant 9.99999974E-6 : f32
    %64 = vector.broadcast %cst_33 : f32 to vector<16x1xf32>
    %65 = arith.addf %61, %64 : vector<16x1xf32>
    %66 = math.rsqrt %65 : vector<16x1xf32>
    %67 = vector.broadcast %66 : vector<16x1xf32> to vector<16x32xf32>
    %68 = arith.mulf %63, %67 : vector<16x32xf32>
    %c0_34 = arith.constant 0 : index
    %c0_35 = arith.constant 0 : index
    %69 = vector.load %arg12[%c0_34, %c0_35] : memref<1x32xf32, #tpu.memory_space<vmem>>, vector<1x32xf32>
    %70 = vector.broadcast %69 : vector<1x32xf32> to vector<16x32xf32>
    %71 = arith.mulf %68, %70 : vector<16x32xf32>
    %c0_36 = arith.constant 0 : index
    %c0_37 = arith.constant 0 : index
    %72 = vector.load %arg13[%c0_36, %c0_37] : memref<1x32xf32, #tpu.memory_space<vmem>>, vector<1x32xf32>
    %73 = vector.broadcast %72 : vector<1x32xf32> to vector<16x32xf32>
    %74 = arith.addf %71, %73 : vector<16x32xf32>
    %c0_38 = arith.constant 0 : index
    %c0_39 = arith.constant 0 : index
    %75 = vector.load %arg14[%c0_38, %c0_39] : memref<16x32xf32, #tpu.memory_space<vmem>>, vector<16x32xf32>
    tpu.vector_store %arg14[%c0_38, %c0_39], %74 {strides = array<i32>} : memref<16x32xf32, #tpu.memory_space<vmem>>, vector<16x32xf32>,
    return
  }
  func.func @transform_0(%arg0: i32) -> (i32, i32) {
    %c0_i32 = arith.constant 0 : i32
    %c0_i32_0 = arith.constant 0 : i32
    return %arg0, %c0_i32 : i32, i32
  }
  func.func @transform_1(%arg0: i32) -> (i32, i32) {
    %c0_i32 = arith.constant 0 : i32
    %c0_i32_0 = arith.constant 0 : i32
    return %arg0, %c0_i32 : i32, i32
  }
  func.func @transform_2(%arg0: i32) -> (i32, i32) {
    %c0_i32 = arith.constant 0 : i32
    %c0_i32_0 = arith.constant 0 : i32
    return %arg0, %c0_i32 : i32, i32
  }
  func.func @transform_3(%arg0: i32) -> (i32, i32) {
    %c0_i32 = arith.constant 0 : i32
    %c0_i32_0 = arith.constant 0 : i32
    %c0_i32_1 = arith.constant 0 : i32
    return %c0_i32, %c0_i32_0 : i32, i32
  }
  func.func @transform_4(%arg0: i32) -> (i32, i32) {
    %c0_i32 = arith.constant 0 : i32
    %c0_i32_0 = arith.constant 0 : i32
    %c0_i32_1 = arith.constant 0 : i32
    return %c0_i32, %c0_i32_0 : i32, i32
  }
  func.func @transform_5(%arg0: i32) -> (i32, i32) {
    %c0_i32 = arith.constant 0 : i32
    %c0_i32_0 = arith.constant 0 : i32
    %c0_i32_1 = arith.constant 0 : i32
    return %c0_i32, %c0_i32_0 : i32, i32
  }
  func.func @transform_6(%arg0: i32) -> (i32, i32) {
    %c0_i32 = arith.constant 0 : i32
    %c0_i32_0 = arith.constant 0 : i32
    %c0_i32_1 = arith.constant 0 : i32
    return %c0_i32, %c0_i32_0 : i32, i32
  }
  func.func @transform_7(%arg0: i32) -> (i32, i32) {
    %c0_i32 = arith.constant 0 : i32
    %c0_i32_0 = arith.constant 0 : i32
    %c0_i32_1 = arith.constant 0 : i32
    return %c0_i32, %c0_i32_0 : i32, i32
  }
  func.func @transform_8(%arg0: i32) -> (i32, i32) {
    %c0_i32 = arith.constant 0 : i32
    %c0_i32_0 = arith.constant 0 : i32
    %c0_i32_1 = arith.constant 0 : i32
    return %c0_i32, %c0_i32_0 : i32, i32
  }
  func.func @transform_9(%arg0: i32) -> (i32, i32) {
    %c0_i32 = arith.constant 0 : i32
    %c0_i32_0 = arith.constant 0 : i32
    %c0_i32_1 = arith.constant 0 : i32
    return %c0_i32, %c0_i32_0 : i32, i32
  }
  func.func @transform_10(%arg0: i32) -> (i32, i32) {
    %c0_i32 = arith.constant 0 : i32
    %c0_i32_0 = arith.constant 0 : i32
    %c0_i32_1 = arith.constant 0 : i32
    return %c0_i32, %c0_i32_0 : i32, i32
  }
  func.func @transform_11(%arg0: i32) -> (i32, i32) {
    %c0_i32 = arith.constant 0 : i32
    %c0_i32_0 = arith.constant 0 : i32
    %c0_i32_1 = arith.constant 0 : i32
    return %c0_i32, %c0_i32_0 : i32, i32
  }
  func.func @transform_12(%arg0: i32) -> (i32, i32) {
    %c0_i32 = arith.constant 0 : i32
    %c0_i32_0 = arith.constant 0 : i32
    %c0_i32_1 = arith.constant 0 : i32
    return %c0_i32, %c0_i32_0 : i32, i32
  }
  func.func @transform_13(%arg0: i32) -> (i32, i32) {
    %c0_i32 = arith.constant 0 : i32
    %c0_i32_0 = arith.constant 0 : i32
    return %arg0, %c0_i32 : i32, i32
  }
}

</mosaic_0001>

<bundles_post_ra>
// kernel: xey_transformer_layer.3
= control target key start
LH: loop header
LB: loop body
LE: loop exit
PB: predicated region body
PF: predicated region fallthrough
CT: control target
= control target key end

     0   :  { %v124_v1 = vmov 0   ;;  %vm44_vm0 = vcmask 261120   ;;  %s125_s11 = smov 64   ;;  %s126_s12 = smov 96   ;;  %s208_s2 = inlined_call_operand.vmem [shape: bf16[32,96], index: 2, kind: input, shape index: {}]   ;;  %s209_s0 = inlined_call_operand.vmem [shape: f32[16,32], index: 0, kind: input, shape index: {}]   ;;  %s210_s1 = inlined_call_operand.vmem [shape: f32[16,1], index: 1, kind: input, shape index: {}]   ;;  %s211_s3 = inlined_call_operand.vmem [shape: f32[1,96], index: 3, kind: input, shape index: {}]   ;;  %s212_s4 = inlined_call_operand.vmem [shape: f32[16,32], index: 4, kind: output, shape index: {0}]   ;;  %s213_s6 = inlined_call_operand.vmem [shape: f32[16,32], index: 6, kind: output, shape index: {2}]   ;;  %s214_s5 = inlined_call_operand.vmem [shape: f32[16,32], index: 5, kind: output, shape index: {1}]  }
   0x1   :  { %v118_v0 = vld [vmem:[%s208_s2 + $0x8] sm:$0xff]  ;;  %122 = vset.pattern.permute.xlu0 %v124_v1  ;;  %v117_v2 = vld [vmem:[%s208_s2] sm:$0xff] }
   0x2   :  { %v62_v3 = vld [vmem:[%s210_s1] sm:$0xff]  ;;  %54 = vmatpush.bf16.msra.mxu0 %v118_v0  ;;  %v22_v5 = vld [vmem:[%s209_s0 + $0x8] sm:$0xff] }
   0x3   :  { %v21_v4 = vld [vmem:[%s209_s0] sm:$0xff]  ;;  %66 = vperm.xlu0 %122, %v62_v3   ;;  %v63_v7 = vld [vmem:[%s210_s1 + $0x8] sm:$0xff] }
   0x4   :  { %v23_v6 = vpack.c.bf16 %v22_v5, %v21_v4  ;;  %v123_v8 = vld [vmem:[%s211_s3] ss:$0 sm:$0xff] }
   0x6   :  { %55 = vmatpush.bf16.msra.mxu0 %v117_v2 }
   0x9   :  { %116 = vmatmul.msk.bf16.vlgmr.msra.gmra.mxu0 %vm44_vm0, %v23_v6 }
   0xb   :  { %71 = vperm.xlu0 %122, %v63_v7  }
  0x75   :  { %v67_v9 = vpop.permute.xlu0 %66 }
  0x7d   :  { %v72_v15 = vpop.permute.xlu0 %71 }
  0x86   :  { %v57_v10 = vpop.f32.mrf.mxu0 }
  0x87   :  { %v58_v11 = vadd.f32 %v123_v8, %v57_v10 }
  0x89   :  { %v74_v12 = vmul.f32 %v67_v9, %v58_v11 }
  0x8b   :  { %76 = vst.msk [vmem:[%s212_s4] sm:$0xff] %vm44_vm0, %v74_v12  ;;  %88 = vrot.lane.b32.xlu2 %v74_v12, %s125_s11  ;;  %80 = vrot.lane.b32.xlu1 %v74_v12, %s126_s12 }
  0x8e   :  { %v59_v13 = vpop.f32.mrf.mxu0 }
  0x8f   :  { %v60_v14 = vadd.f32 %v123_v8, %v59_v13 }
  0x91   :  { %v75_v16 = vmul.f32 %v72_v15, %v60_v14 }
  0x93   :  { %77 = vst.msk [vmem:[%s212_s4 + $0x8] sm:$0xff] %vm44_vm0, %v75_v16  ;;  %90 = vrot.lane.b32.xlu2 %v75_v16, %s125_s11  ;;  %82 = vrot.lane.b32.xlu1 %v75_v16, %s126_s12 }
  0xe5   :  { %v89_v17 = vpop.permute.xlu2 %88 }
  0xe6   :  { %94 = vst.msk [vmem:[%s213_s6] sm:$0xff] %vm44_vm0, %v89_v17 }
  0xed   :  { %v91_v18 = vpop.permute.xlu2 %90 }
  0xee   :  { %95 = vst.msk [vmem:[%s213_s6 + $0x8] sm:$0xff] %vm44_vm0, %v91_v18 }
  0xfd   :  { %v81_v19 = vpop.permute.xlu1 %80 }
  0xfe   :  { %86 = vst.msk [vmem:[%s214_s5] sm:$0xff] %vm44_vm0, %v81_v19 }
 0x105   :  { %v83_v20 = vpop.permute.xlu1 %82 }
 0x106   :  { %87 = vst.msk [vmem:[%s214_s5 + $0x8] sm:$0xff] %vm44_vm0, %v83_v20 }

// kernel: xey_transformer_layer.5
= control target key start
LH: loop header
LB: loop body
LE: loop exit
PB: predicated region body
PF: predicated region fallthrough
CT: control target
= control target key end

     0   :  { %v433_v4 = vmov 0   ;;  %s596_s0 = inlined_call_operand.vmem [shape: f32[16,32], index: 0, kind: input, shape index: {}]   ;;  %s597_s1 = inlined_call_operand.vmem [shape: f32[16,32], index: 1, kind: input, shape index: {}]   ;;  %s598_s2 = inlined_call_operand.vmem [shape: f32[16,1], index: 2, kind: input, shape index: {}]   ;;  %s599_s3 = inlined_call_operand.vmem [shape: bf16[32,32], index: 3, kind: input, shape index: {}]   ;;  %s600_s4 = inlined_call_operand.vmem [shape: f32[1,32], index: 4, kind: input, shape index: {}]   ;;  %s601_s5 = inlined_call_operand.vmem [shape: f32[1,32], index: 5, kind: input, shape index: {}]   ;;  %s602_s6 = inlined_call_operand.vmem [shape: f32[1,32], index: 6, kind: input, shape index: {}]   ;;  %s603_s7 = inlined_call_operand.vmem [shape: bf16[32,64], index: 7, kind: input, shape index: {}]   ;;  %s604_s8 = inlined_call_operand.vmem [shape: f32[1,64], index: 8, kind: input, shape index: {}]   ;;  %s605_s9 = inlined_call_operand.vmem [shape: bf16[64,32], index: 9, kind: input, shape index: {}]   ;;  %s606_s10 = inlined_call_operand.vmem [shape: f32[1,32], index: 10, kind: input, shape index: {}]   ;;  %s607_s11 = inlined_call_operand.vmem [shape: f32[1,32], index: 11, kind: input, shape index: {}]   ;;  %s608_s12 = inlined_call_operand.vmem [shape: f32[1,32], index: 12, kind: input, shape index: {}]   ;;  %s609_s13 = inlined_call_operand.hbm [shape: f32[16,32], index: 13, kind: output, shape index: {}]  }
   0x1   :  { %v377_v0 = vld [vmem:[%s599_s3 + $0x8] sm:$0xff]  ;;  %v376_v1 = vld [vmem:[%s599_s3] sm:$0xff]  ;;  %389 = vset.pattern.permute.xlu0 %v433_v4 }
   0x2   :  { %v46_v2 = vld [vmem:[%s596_s0] sm:$0xff]  ;;  %v47_v3 = vld [vmem:[%s596_s0 + $0x8] sm:$0xff]  ;;  %79 = vmatpush.bf16.msra.mxu0 %v377_v0 }
   0x3   :  { %v87_v5 = vld [vmem:[%s598_s2] sm:$0xff] }
   0x4   :  { %91 = vperm.xlu0 %389, %v87_v5  }
   0x5   :  { %18 = vsyncpa [#allocation3], 0  ;;  %v48_v6 = vpack.c.bf16 %v47_v3, %v46_v2  ;;  %vm69_vm0 = vcmask 261120   ;;  %v88_v7 = vld [vmem:[%s598_s2 + $0x8] sm:$0xff]  ;;  %v390_v8 = vld [vmem:[%s600_s4] ss:$0 sm:$0xff] }
   0x6   :  { %80 = vmatpush.bf16.msra.mxu0 %v376_v1  ;;  %v101_v12 = vld [vmem:[%s597_s1] sm:$0xff]  ;;  %v102_v19 = vld [vmem:[%s597_s1 + $0x8] sm:$0xff]  ;;  %v434_v23 = vmov 32.0   ;;  %vm245_vm8 = vcmask 523264   ;;  %s329_s22 = sshll.u32 %s609_s13, 4  ;;  %s437_s1 = smov 8   ;;  %s330_s22 = int_to_ptr.hbm [resolvable:$true] %s329_s22 }
   0x7   :  { %397 = vrcp.f32 %v434_v23  ;;  %v379_v40 = vld [vmem:[%s603_s7 + $0x8] sm:$0xff]  ;;  %v378_v42 = vld [vmem:[%s603_s7] sm:$0xff] }
   0x8   :  { %198 = vmatpush.bf16.msra.mxu1 %v379_v40  ;;  %v391_v61 = vld [vmem:[%s601_s5] ss:$0 sm:$0xff] }
   0x9   :  { %349 = vmatmul.msk.bf16.vlgmr.msra.gmra.mxu0 %vm69_vm0, %v48_v6  ;;  %v392_v2 = vld [vmem:[%s602_s6] ss:$0 sm:$0xff] }
   0xc   :  { %96 = vperm.xlu0 %389, %v88_v7   ;;  %199 = vmatpush.bf16.msra.mxu1 %v378_v42  ;;  %v383_v7 = vld [vmem:[%s605_s9 + $0x18] sm:$0xff] }
   0xd   :  { %v398_v24 = vpop.eup %397  ;;  %253 = vmatpush.bf16.msra.mxu2 %v383_v7 }
   0xe   :  { %v112_v25 = vmul.f32 32.0, %v398_v24  ;;  %vm116_vm1 = vweird.f32 %v398_v24 }
  0x10   :  { %v113_v26 = vsub.f32 1.0, %v112_v25 }
  0x12   :  { %v114_v27 = vmul.f32 %v398_v24, %v113_v26 }
  0x14   :  { %v115_v28 = vadd.f32 %v398_v24, %v114_v27 }
  0x16   :  { %v538_v29 = vsel %vm116_vm1, %v398_v24, %v115_v28 }
  0x76   :  { %v92_v9 = vpop.permute.xlu0 %91 }
  0x7e   :  { %v97_v18 = vpop.permute.xlu0 %96 }
  0x86   :  { %v82_v10 = vpop.f32.mrf.mxu0 }
  0x87   :  { %v83_v11 = vadd.f32 %v390_v8, %v82_v10  ;;  %v380_v10 = vld [vmem:[%s605_s9] sm:$0xff] }
  0x89   :  { %v99_v13 = vmul.f32 %v92_v9, %v83_v11  ;;  %v381_v9 = vld [vmem:[%s605_s9 + $0x8] sm:$0xff] }
  0x8b   :  { %v103_v14 = vadd.f32 %v101_v12, %v99_v13  ;;  %v393_v12 = vld [vmem:[%s604_s8] ss:$0 sm:$0xff] }
  0x8d   :  { %v105_v15 = vsel %vm69_vm0, %v103_v14, 0.0 }
  0x8e   :  { %v84_v16 = vpop.f32.mrf.mxu0  ;;  %106 = vadd.xlane.f32.xlu1 %v105_v15 }
  0x8f   :  { %v85_v17 = vadd.f32 %v390_v8, %v84_v16  ;;  %v382_v8 = vld [vmem:[%s605_s9 + $0x10] sm:$0xff] }
  0x90   :  { %254 = vmatpush.bf16.msra.mxu2 %v382_v8 }
  0x91   :  { %v100_v20 = vmul.f32 %v97_v18, %v85_v17 }
  0x93   :  { %v104_v21 = vadd.f32 %v102_v19, %v100_v20  ;;  %v394_v19 = vld [vmem:[%s606_s10] ss:$0 sm:$0xff] }
  0x94   :  { %255 = vmatpush.bf16.msra.mxu2 %v381_v9 }
  0x95   :  { %v108_v22 = vsel %vm69_vm0, %v104_v21, 0.0 }
  0x96   :  { %109 = vadd.xlane.f32.xlu1 %v108_v22 }
  0x98   :  { %256 = vmatpush.bf16.msra.mxu2 %v380_v10 }
 0x101   :  { %v107_v30 = vpop.xlane.xlu1 %106 }
 0x102   :  { %v118_v31 = vmul.f32 %v538_v29, %v107_v30 }
 0x104   :  { %v120_v32 = vsub.f32 %v103_v14, %v118_v31 }
 0x106   :  { %v122_v33 = vmul.f32 %v120_v32, %v120_v32 }
 0x108   :  { %v124_v34 = vsel %vm69_vm0, %v122_v33, 0.0 }
 0x109   :  { %125 = vadd.xlane.f32.xlu2 %v124_v34  ;;  %v110_v35 = vpop.xlane.xlu1 %109 }
 0x10a   :  { %v119_v36 = vmul.f32 %v538_v29, %v110_v35 }
 0x10c   :  { %v121_v37 = vsub.f32 %v104_v21, %v119_v36 }
 0x10e   :  { %v123_v38 = vmul.f32 %v121_v37, %v121_v37 }
 0x110   :  { %v127_v39 = vsel %vm69_vm0, %v123_v38, 0.0 }
 0x111   :  { %128 = vadd.xlane.f32.xlu2 %v127_v39 }
 0x17c   :  { %v126_v41 = vpop.xlane.xlu2 %125 }
 0x17d   :  { %v130_v43 = vmul.f32 %v126_v41, %v538_v29 }
 0x17f   :  { %v132_v44 = vadd.f32 1e-05, %v130_v43 }
 0x181   :  { %399 = vrsqrt.f32 %v132_v44  ;;  %vm140_vm3 = vweird.f32 %v132_v44 }
 0x184   :  { %v129_v45 = vpop.xlane.xlu2 %128 }
 0x185   :  { %v131_v46 = vmul.f32 %v129_v45, %v538_v29 }
 0x187   :  { %v400_v47 = vpop.eup %399  ;;  %v133_v48 = vadd.f32 1e-05, %v131_v46 }
 0x188   :  { %v135_v49 = vmul.f32 %v400_v47, %v132_v44  ;;  %vm141_vm2 = vweird.f32 %v400_v47 }
 0x189   :  { %401 = vrsqrt.f32 %v133_v48  ;;  %vm142_vm4 = vmor %vm140_vm3, %vm141_vm2  ;;  %vm150_vm6 = vweird.f32 %v133_v48 }
 0x18a   :  { %v136_v50 = vmul.f32 %v400_v47, %v135_v49 }
 0x18c   :  { %v137_v51 = vmul.f32 0.5, %v136_v50 }
 0x18e   :  { %v138_v52 = vsub.f32 1.5, %v137_v51 }
 0x18f   :  { %v402_v53 = vpop.eup %401 }
 0x190   :  { %v139_v54 = vmul.f32 %v400_v47, %v138_v52  ;;  %v145_v55 = vmul.f32 %v402_v53, %v133_v48  ;;  %vm151_vm5 = vweird.f32 %v402_v53 }
 0x191   :  { %vm152_vm7 = vmor %vm150_vm6, %vm151_vm5 }
 0x192   :  { %v146_v56 = vmul.f32 %v402_v53, %v145_v55  ;;  %v143_v57 = vsel %vm142_vm4, %v400_v47, %v139_v54 }
 0x193   :  { %v154_v60 = vmul.f32 %v143_v57, %v120_v32 }
 0x194   :  { %v147_v58 = vmul.f32 0.5, %v146_v56  ;;  %v396_v56 = vld [vmem:[%s608_s12] ss:$0 sm:$0xff]  ;;  %s436_s12 = smov 128  }
 0x195   :  { %v160_v1 = vmul.f32 %v391_v61, %v154_v60 }
 0x196   :  { %v148_v59 = vsub.f32 1.5, %v147_v58 }
 0x197   :  { %v166_v4 = vadd.f32 %v392_v2, %v160_v1 }
 0x198   :  { %v149_v62 = vmul.f32 %v402_v53, %v148_v59 }
 0x19a   :  { %v153_v63 = vsel %vm152_vm7, %v402_v53, %v149_v62  ;;  %v395_v53 = vld [vmem:[%s607_s11] ss:$0 sm:$0xff]  ;;  %s435_s11 = smov [#allocation2]  }
 0x19b   :  { %v155_v0 = vmul.f32 %v153_v63, %v121_v37  ;;  %s327_s20 = sshll.u32 %s435_s11, 4  ;;  %s328_s20 = int_to_ptr.vmem [resolvable:$true] %s327_s20 }
 0x19d   :  { %v161_v3 = vmul.f32 %v391_v61, %v155_v0 }
 0x19f   :  { %v167_v5 = vadd.f32 %v392_v2, %v161_v3 }
 0x1a1   :  { %v168_v6 = vpack.c.bf16 %v167_v5, %v166_v4 }
 0x1a3   :  { %358 = vmatmul.msk.bf16.vlgmr.msra.gmra.mxu1 %vm69_vm0, %v168_v6 }
 0x220   :  { %v201_v11 = vpop.f32.mrf.mxu1 }
 0x221   :  { %v202_v13 = vadd.f32 %v393_v12, %v201_v11 }
 0x223   :  { %v206_v16 = vmax.f32 %v202_v13, 0.0 }
 0x228   :  { %v203_v14 = vpop.f32.mrf.mxu1 }
 0x229   :  { %v204_v15 = vadd.f32 %v393_v12, %v203_v14 }
 0x22b   :  { %v207_v17 = vmax.f32 %v204_v15, 0.0 }
 0x22d   :  { %v208_v18 = vpack.c.bf16 %v207_v17, %v206_v16 }
 0x22f   :  { %375 = vmatmul.msk.bf16.vlgmr.msra.gmra.mxu2 %vm245_vm8, %v208_v18 }
 0x2b2   :  { %v258_v20 = vpop.f32.mrf.mxu2 }
 0x2b3   :  { %v259_v21 = vadd.f32 %v394_v19, %v258_v20 }
 0x2b5   :  { %v263_v22 = vadd.f32 %v259_v21, %v166_v4 }
 0x2b7   :  { %v265_v23 = vsel %vm69_vm0, %v263_v22, 0.0 }
 0x2b8   :  { %266 = vadd.xlane.f32.xlu0 %v265_v23 }
 0x2ba   :  { %v260_v24 = vpop.f32.mrf.mxu2 }
 0x2bb   :  { %v261_v25 = vadd.f32 %v394_v19, %v260_v24 }
 0x2bd   :  { %v264_v26 = vadd.f32 %v261_v25, %v167_v5 }
 0x2bf   :  { %v268_v27 = vsel %vm69_vm0, %v264_v26, 0.0 }
 0x2c0   :  { %269 = vadd.xlane.f32.xlu1 %v268_v27 }
 0x32b   :  { %v267_v28 = vpop.xlane.xlu0 %266 }
 0x32c   :  { %v271_v30 = vmul.f32 %v267_v28, %v538_v29 }
 0x32e   :  { %v273_v31 = vsub.f32 %v263_v22, %v271_v30 }
 0x330   :  { %v275_v32 = vmul.f32 %v273_v31, %v273_v31 }
 0x332   :  { %v277_v33 = vsel %vm69_vm0, %v275_v32, 0.0 }
 0x333   :  { %v270_v34 = vpop.xlane.xlu1 %269  ;;  %278 = vadd.xlane.f32.xlu2 %v277_v33 }
 0x334   :  { %v272_v35 = vmul.f32 %v270_v34, %v538_v29 }
 0x336   :  { %v274_v36 = vsub.f32 %v264_v26, %v272_v35 }
 0x338   :  { %v276_v37 = vmul.f32 %v274_v36, %v274_v36 }
 0x33a   :  { %v280_v38 = vsel %vm69_vm0, %v276_v37, 0.0 }
 0x33b   :  { %281 = vadd.xlane.f32.xlu1 %v280_v38 }
 0x3a6   :  { %v279_v39 = vpop.xlane.xlu2 %278 }
 0x3a7   :  { %v283_v40 = vmul.f32 %v279_v39, %v538_v29 }
 0x3a9   :  { %v285_v41 = vadd.f32 1e-05, %v283_v40 }
 0x3ab   :  { %403 = vrsqrt.f32 %v285_v41  ;;  %vm293_vm10 = vweird.f32 %v285_v41 }
 0x3ae   :  { %v282_v42 = vpop.xlane.xlu1 %281 }
 0x3af   :  { %v284_v43 = vmul.f32 %v282_v42, %v538_v29 }
 0x3b1   :  { %v404_v44 = vpop.eup %403  ;;  %v286_v45 = vadd.f32 1e-05, %v284_v43 }
 0x3b2   :  { %v288_v46 = vmul.f32 %v404_v44, %v285_v41  ;;  %vm294_vm9 = vweird.f32 %v404_v44 }
 0x3b3   :  { %405 = vrsqrt.f32 %v286_v45  ;;  %vm295_vm11 = vmor %vm293_vm10, %vm294_vm9  ;;  %vm303_vm13 = vweird.f32 %v286_v45 }
 0x3b4   :  { %v289_v47 = vmul.f32 %v404_v44, %v288_v46 }
 0x3b6   :  { %v290_v48 = vmul.f32 0.5, %v289_v47 }
 0x3b8   :  { %v291_v49 = vsub.f32 1.5, %v290_v48 }
 0x3b9   :  { %v406_v50 = vpop.eup %405 }
 0x3ba   :  { %v292_v51 = vmul.f32 %v404_v44, %v291_v49  ;;  %v298_v52 = vmul.f32 %v406_v50, %v286_v45  ;;  %vm304_vm12 = vweird.f32 %v406_v50 }
 0x3bb   :  { %vm305_vm14 = vmor %vm303_vm13, %vm304_vm12 }
 0x3bc   :  { %v296_v54 = vsel %vm295_vm11, %v404_v44, %v292_v51  ;;  %v299_v55 = vmul.f32 %v406_v50, %v298_v52 }
 0x3bd   :  { %v307_v29 = vmul.f32 %v296_v54, %v273_v31 }
 0x3be   :  { %v300_v57 = vmul.f32 0.5, %v299_v55 }
 0x3bf   :  { %v313_v58 = vmul.f32 %v395_v53, %v307_v29 }
 0x3c0   :  { %v301_v59 = vsub.f32 1.5, %v300_v57 }
 0x3c1   :  { %v319_v60 = vadd.f32 %v396_v56, %v313_v58 }
 0x3c2   :  { %v302_v61 = vmul.f32 %v406_v50, %v301_v59 }
 0x3c3   :  { %321 = vst.msk [vmem:[#allocation2] sm:$0xff] %vm69_vm0, %v319_v60 }
 0x3c4   :  { %v306_v62 = vsel %vm305_vm14, %v406_v50, %v302_v61 }
 0x3c5   :  { %v308_v63 = vmul.f32 %v306_v62, %v274_v36 }
 0x3c7   :  { %v314_v0 = vmul.f32 %v395_v53, %v308_v63 }
 0x3c9   :  { %v320_v1 = vadd.f32 %v396_v56, %v314_v0 }
 0x3cb   :  { %322 = vst.msk [vmem:[#allocation2 + $0x8] sm:$0xff] %vm69_vm0, %v320_v1 }
 0x3cc   :  { %335 = dma.vmem_to_hbm [thread:$0]  %s328_s20, 256, %s330_s22, [#allocation3], %s436_s12, %s436_s12, %s437_s1  }
 0x3cd   :  { %431 = dma.done.wait [#allocation3], 256  }
 0x3ce   :  { %432 = vsyncadd [#allocation3], 4294967040 }
 0x3cf   :  { %340 = vsyncpa [#allocation3], 1 }

// kernel: xey_transformer_layer.4
= control target key start
LH: loop header
LB: loop body
LE: loop exit
PB: predicated region body
PF: predicated region fallthrough
CT: control target
= control target key end

     0   :  { %s3867_s0 = inlined_call_operand.vmem [shape: f32[2,8,32], index: 0, kind: input, shape index: {}]   ;;  %s3868_s1 = inlined_call_operand.vmem [shape: f32[2,8,32], index: 1, kind: input, shape index: {}]   ;;  %s3869_s2 = inlined_call_operand.vmem [shape: f32[2,8,32], index: 2, kind: input, shape index: {}]   ;;  %s3870_s3 = inlined_call_operand.vmem [shape: f32[2,8,8,16], index: 3, kind: input, shape index: {}]   ;;  %s3871_s4 = inlined_call_operand.vmem [shape: f32[2,8,1], index: 4, kind: input, shape index: {}]   ;;  %s3872_s5 = inlined_call_operand.vmem [shape: f32[2,1,8], index: 5, kind: input, shape index: {}]   ;;  %s3873_s6 = inlined_call_operand.vmem [shape: f32[2,1,32], index: 6, kind: input, shape index: {}]   ;;  %s3874_s7 = inlined_call_operand.vmem [shape: f32[2,1,32], index: 7, kind: input, shape index: {}]   ;;  %s3875_s8 = inlined_call_operand.vmem [shape: f32[2,1,32], index: 8, kind: input, shape index: {}]   ;;  %s3876_s9 = inlined_call_operand.vmem [shape: f32[2,1,32], index: 9, kind: input, shape index: {}]   ;;  %s3877_s10 = inlined_call_operand.vmem [shape: bf16[16,64], index: 10, kind: input, shape index: {}]   ;;  %s3878_s11 = inlined_call_operand.vmem [shape: f32[1,64], index: 11, kind: input, shape index: {}]   ;;  %s3879_s12 = inlined_call_operand.vmem [shape: bf16[32,16], index: 12, kind: input, shape index: {}]   ;;  %s3880_s13 = inlined_call_operand.vmem [shape: f32[1,16], index: 13, kind: input, shape index: {}]   ;;  %s3881_s14 = inlined_call_operand.vmem [shape: f32[1,16], index: 14, kind: input, shape index: {}]   ;;  %s3882_s15 = inlined_call_operand.vmem [shape: f32[1,16], index: 15, kind: input, shape index: {}]   ;;  %s3883_s16 = inlined_call_operand.vmem [shape: bf16[16,32], index: 16, kind: input, shape index: {}]   ;;  %s3884_s17 = inlined_call_operand.vmem [shape: f32[1,32], index: 17, kind: input, shape index: {}]   ;;  %s3885_s18 = inlined_call_operand.vmem [shape: bf16[32,16], index: 18, kind: input, shape index: {}]   ;;  %s3886_s19 = inlined_call_operand.vmem [shape: f32[1,16], index: 19, kind: input, shape index: {}]   ;;  %s3887_s20 = inlined_call_operand.vmem [shape: f32[1,16], index: 20, kind: input, shape index: {}]   ;;  %s3888_s21 = inlined_call_operand.vmem [shape: f32[1,16], index: 21, kind: input, shape index: {}]   ;;  %s3889_s22 = inlined_call_operand.hbm [shape: f32[2,8,8,16], index: 22, kind: output, shape index: {0}]   ;;  %s3890_s23 = inlined_call_operand.vmem [shape: f32[2,8,32], index: 23, kind: output, shape index: {1}]   ;;  %s3891_s24 = inlined_call_operand.vmem [shape: f32[2,1,64], index: 24, kind: output, shape index: {2}]  }
   0x1   :  { %3902 = sst [smem:[#allocation16_spill]] %s3867_s0 }
   0x2   :  { %3903 = sst [smem:[#allocation17_spill]] %s3868_s1 }
   0x3   :  { %3904 = sst [smem:[#allocation18_spill]] %s3869_s2 }
   0x4   :  { %3905 = sst [smem:[#allocation19_spill]] %s3870_s3 }
   0x5   :  { %3906 = sst [smem:[#allocation20_spill]] %s3871_s4 }
   0x6   :  { %3907 = sst [smem:[#allocation21_spill]] %s3872_s5 }
   0x7   :  { %3908 = sst [smem:[#allocation22_spill]] %s3873_s6 }
   0x8   :  { %3909 = sst [smem:[#allocation23_spill]] %s3874_s7 }
   0x9   :  { %3910 = sst [smem:[#allocation24_spill]] %s3875_s8 }
   0xa   :  { %3911 = sst [smem:[#allocation25_spill]] %s3877_s10 }
   0xb   :  { %3912 = sst [smem:[#allocation26_spill]] %s3878_s11 }
   0xc   :  { %3913 = sst [smem:[#allocation27_spill]] %s3879_s12 }
   0xd   :  { %30 = vsyncpa [#allocation7], 0 }
   0xe   :  { %32 = vsyncpa [#allocation7 + $0x1], 0  ;;  %s3034_s5 = smov 0   ;;  %s3036_s26 = smov 0  }
   0xf   :  { %s3038_s27 = smov 0   ;;  %s3040_s28 = smov 0  }
  0x10   :  { %s3042_s6 = smov 0   ;;  %s3044_s2 = smov 0  }
  0x11 LB: > { %3914 = sst [smem:[#allocation9_spill]] %s2873_s5  ;;  %s2590_s29 = sadd.s32 4294967295, %s2893_s2   ;;  %s2893_s2 = sphi %s3044_s2, %s38_s2   ;;  %s2889_s6 = sphi %s3042_s6, %s3942_s6   ;;  %s2885_s28 = sphi %s3040_s28, %s3941_s28   ;;  %s2881_s27 = sphi %s3038_s27, %s3940_s27   ;;  %s2877_s26 = sphi %s3036_s26, %s3944_s26   ;;  %s2873_s5 = sphi %s3034_s5, %s3943_s5  }
  0x12   : > { %3915 = sst [smem:[#allocation10_spill]] %s2881_s27  ;;  %s2591_s0 = sadd.s32 4294967294, %s2893_s2  }
  0x13   : > { %3916 = sst [smem:[#allocation11_spill]] %s2889_s6  ;;  %s50_s7 = sadd.s32 1, %s2889_s6 }
  0x14   : > { %3917 = sst [smem:[#allocation12_spill]] %s2893_s2  ;;  %s577_s30 = sadd.s32 1, %s2881_s27 }
  0x15   : > { %p52_p0 = scmp.ge.s32.totalorder %s50_s7, 2  ;;  %p587_p1 = scmp.ne.s32.totalorder %s2881_s27, %s2877_s26 }
  0x16   : > { %p588_p2 = scmp.eq.s32.totalorder %s2590_s29, 1  ;;  %p593_p3 = scmp.ne.s32.totalorder %s2877_s26, %s2873_s5 }
  0x17   : > { %s3946_s7 = smov (%p52_p0, %s50_s7), 0  ;;  %p594_p5 = scmp.eq.s32.totalorder %s2591_s0, 1 }
  0x18   : > { %3918 = sst [smem:[#allocation13_spill]] %s3946_s7  ;;  %p3074_p4 = por %p588_p2, %p587_p1 }
  0x19   : > { %s572_s25 = ssub.s32 %s2889_s6, %s3946_s7  ;;  %p2594_p6 = scmp.ge.s32.totalorder %s2893_s2, 1 }
  0x1a   : > { %p575_p7 = scmp.eq.s32.totalorder %s572_s25, 0  ;;  %p3081_p8 = por %p594_p5, %p593_p3 }
  0x1b   : > { %p779_p9 = scmp.lt.s32.totalorder %s2893_s2, 3 }
  0x1c   : > { %s3920_s8 = scalar_select %p3081_p8, 1, 0 }
  0x1d   : > { %s3087_s4 = scalar_select %p575_p7, %s2881_s27, %s577_s30  }
  0x1e   : > { %3921 = sst [smem:[#allocation14_spill]] %s3920_s8  ;;  %p780_p10 = pnand %p2594_p6, %p779_p9 }
  0x1f   : > { %3922 = sst [smem:[#allocation15_spill]] %s3087_s4  ;;  %p896_p11 = scmp.lt.s32.totalorder (!%p780_p10), %s2885_s28, 1 }
  0x20   : > { %783 = sbr.rel (%p780_p10) target bundleno = 1407 (0x57f), region = 108  ;;  %s3923_s10 = sld [smem:[#allocation25_spill]] (!%p780_p10) }
  0x21   : > { %s3924_s8 = sld [smem:[#allocation19_spill]] (!%p780_p10)  ;;  %s2898_s29 = smov (!%p780_p10), 96  }
  0x22   : > { %s3925_s7 = sld [smem:[#allocation22_spill]] (!%p780_p10)  ;;  %s2906_s2 = smov (!%p780_p10), 16  }
  0x23   : > { %s3926_s11 = sld [smem:[#allocation26_spill]] (!%p780_p10) }
  0x24   : > { %s3927_s6 = sld [smem:[#allocation21_spill]] (!%p780_p10) }
  0x25   : > { %s3094_s0 = scalar_select %p896_p11, %s2885_s28, 1  ;;  %vm978_vm0 = vcmask 130048   ;;  %vm972_vm1 = vcmask 122880   ;;  %v2895_v56 = vmov 0.0   ;;  %vm1138_vm2 = vcmask 261120  }
  0x26   : > { %v2649_v0 = vld [vmem:[%s3923_s10] sm:$0xff]  ;;  %973 = vst.msk [vmem:[#allocation2] sm:$0x1] %vm972_vm1, %v2895_v56  ;;  %s3928_s12 = sld [smem:[#allocation27_spill]] }
  0x27   : > { %1179 = vmatpush.bf16.msra.mxu0 %v2649_v0  ;;  %s2648_s25 = sshll.u32 %s3094_s0, 6  ;;  %974 = vst.msk [vmem:[#allocation3] sm:$0x1] %vm972_vm1, %v2895_v56  ;;  %v2896_v0 = vmov inf   ;;  %s3929_s4 = sld [smem:[#allocation16_spill]] }
  0x28   : > { %s3100_s5 = scalar_lea.vmem %s3924_s8, %s2648_s25  ;;  %975 = vst.msk [vmem:[#allocation4] sm:$0x1] %vm972_vm1, %v2896_v0  ;;  %s3930_s30 = sld [smem:[#allocation17_spill]] }
  0x29   : > { %v3103_v1 = vld [vmem:[%s3100_s5] sm:$0xff]  ;;  %v3106_v2 = vld [vmem:[%s3100_s5 + $0x8] sm:$0xff]  ;;  %v3125_v13 = vld [vmem:[%s3100_s5 + $0x10] sm:$0xff] }
  0x2a   : > { %v979_v3 = vsel %vm978_vm0, %v3103_v1, 0.0  ;;  %v980_v4 = vsel %vm978_vm0, %v3106_v2, 0.0  ;;  %v1004_v5 = vmul.f32 %v3103_v1, %v3103_v1  ;;  %v1005_v6 = vmul.f32 %v3106_v2, %v3106_v2  ;;  %v3128_v14 = vld [vmem:[%s3100_s5 + $0x18] sm:$0xff]  ;;  %v3157_v27 = vld [vmem:[%s3100_s5 + $0x20] sm:$0xff]  ;;  %v3161_v31 = vld [vmem:[%s3100_s5 + $0x28] sm:$0xff]  ;;  %s3253_s8 = scalar_lea.vmem %s3927_s6, %s3094_s0  ;;  %s3269_s6 = sshll.u32 %s3094_s0, 3 }
  0x2b   : > { %v981_v7 = vadd.f32 %v980_v4, %v979_v3  ;;  %v1036_v8 = vsel %vm978_vm0, %v3103_v1, inf  ;;  %v1037_v11 = vsel %vm978_vm0, %v3106_v2, inf  ;;  %v1144_v12 = vpack.c.bf16 %v3106_v2, %v3103_v1  ;;  %v3188_v54 = vld [vmem:[%s3100_s5 + $0x30] sm:$0xff]  ;;  %v3191_v55 = vld [vmem:[%s3100_s5 + $0x38] sm:$0xff]  ;;  %s3935_s5 = sld [smem:[#allocation18_spill]]  ;;  %s950_s25 = scalar_lea.vmem %s3890_s23, %s3269_s6 }
  0x2c   : > { %v1012_v9 = vsel %vm978_vm0, %v1004_v5, 0.0  ;;  %v1013_v10 = vsel %vm978_vm0, %v1005_v6, 0.0  ;;  %v982_v16 = vsel %vm978_vm0, %v3125_v13, 0.0  ;;  %v984_v17 = vsel %vm978_vm0, %v3128_v14, 0.0 }
  0x2d   : > { %v1014_v15 = vadd.f32 %v1013_v10, %v1012_v9  ;;  %v1006_v18 = vmul.f32 %v3125_v13, %v3125_v13  ;;  %v3138_v19 = vsel %vm978_vm0, %v3103_v1, -inf  ;;  %v3142_v20 = vsel %vm978_vm0, %v3106_v2, -inf  ;;  %2607 = vmatmul.msk.bf16.vlgmr.msra.gmra.mxu0 %vm978_vm0, %v1144_v12  ;;  %s902_s27 = scalar_lea.vmem %s3929_s4, %s3269_s6 }
  0x2e   : > { %v983_v21 = vadd.f32 %v982_v16, %v981_v7  ;;  %v1007_v22 = vmul.f32 %v3128_v14, %v3128_v14  ;;  %v1038_v24 = vsel %vm978_vm0, %v3125_v13, inf  ;;  %v1039_v25 = vsel %vm978_vm0, %v3128_v14, inf  ;;  %s906_s1 = scalar_lea.vmem %s3930_s30, %s3269_s6 }
  0x2f   : > { %v1015_v23 = vsel %vm978_vm0, %v1006_v18, 0.0  ;;  %v3154_v26 = vsel %vm978_vm0, %v3125_v13, -inf  ;;  %v986_v32 = vsel %vm978_vm0, %v3157_v27, 0.0  ;;  %v988_v33 = vsel %vm978_vm0, %v3161_v31, 0.0 }
  0x30   : > { %v985_v28 = vadd.f32 %v984_v17, %v983_v21  ;;  %v1016_v29 = vadd.f32 %v1015_v23, %v1014_v15  ;;  %v1017_v30 = vsel %vm978_vm0, %v1007_v22, 0.0  ;;  %v1008_v34 = vmul.f32 %v3157_v27, %v3157_v27 }
  0x31   : > { %v1009_v35 = vmul.f32 %v3161_v31, %v3161_v31  ;;  %v1040_v36 = vsel %vm978_vm0, %v3157_v27, inf  ;;  %v1042_v40 = vsel %vm978_vm0, %v3161_v31, inf  ;;  %v1064_v44 = vsel %vm978_vm0, %v3157_v27, -inf }
  0x32   : > { %v1018_v37 = vadd.f32 %v1017_v30, %v1016_v29  ;;  %v987_v38 = vadd.f32 %v986_v32, %v985_v28  ;;  %v1041_v39 = vmin.f32 %v1036_v8, %v1040_v36  ;;  %v1019_v41 = vsel %vm978_vm0, %v1008_v34, 0.0 }
  0x33   : > { %v1021_v42 = vsel %vm978_vm0, %v1009_v35, 0.0  ;;  %v1043_v43 = vmin.f32 %v1037_v11, %v1042_v40  ;;  %v1063_v45 = vsel %vm978_vm0, %v3128_v14, -inf  ;;  %v1066_v48 = vsel %vm978_vm0, %v3161_v31, -inf }
  0x34   : > { %v989_v46 = vadd.f32 %v988_v33, %v987_v38  ;;  %v1020_v47 = vadd.f32 %v1019_v41, %v1018_v37  ;;  %v1145_v49 = vpack.c.bf16 %v3128_v14, %v3125_v13  ;;  %v1065_v51 = vmax.f32 %v3138_v19, %v1064_v44  ;;  %v977_v38 = vld [vmem:[#allocation2] sm:$0x1] }
  0x35   : > { %v1048_v50 = vmin.f32 %v1041_v39, %v1043_v43  ;;  %v1067_v53 = vmax.f32 %v3142_v20, %v1066_v48  ;;  %v990_v57 = vsel %vm978_vm0, %v3188_v54, 0.0  ;;  %v992_v58 = vsel %vm978_vm0, %v3191_v55, 0.0  ;;  %v1003_v43 = vld [vmem:[#allocation3] sm:$0x1] }
  0x36   : > { %v1022_v52 = vadd.f32 %v1021_v42, %v1020_v47  ;;  %v1010_v59 = vmul.f32 %v3188_v54, %v3188_v54  ;;  %v991_v60 = vadd.f32 %v990_v57, %v989_v46  ;;  %v1011_v61 = vmul.f32 %v3191_v55, %v3191_v55  ;;  %v1035_v47 = vld [vmem:[#allocation4] sm:$0x1] }
  0x37   : > { %v1044_v62 = vsel %vm978_vm0, %v3188_v54, inf  ;;  %v1046_v63 = vsel %vm978_vm0, %v3191_v55, inf  ;;  %v1068_v6 = vsel %vm978_vm0, %v3188_v54, -inf  ;;  %v2897_v7 = vmov -inf  }
  0x38   : > { %v1023_v3 = vsel %vm978_vm0, %v1010_v59, 0.0  ;;  %v1045_v4 = vmin.f32 %v1038_v24, %v1044_v62  ;;  %v1047_v5 = vmin.f32 %v1039_v25, %v1046_v63  ;;  %976 = vst.msk [vmem:[#allocation5] sm:$0x1] %vm972_vm1, %v2897_v7  ;;  %v993_v8 = vadd.f32 %v992_v58, %v991_v60  ;;  %v2730_v60 = vld [vmem:[%s3926_s11] ss:$0 sm:$0xff]  ;;  %s3934_s11 = sld [smem:[#allocation24_spill]] }
  0x39   : > { %v1024_v9 = vadd.f32 %v1023_v3, %v1022_v52  ;;  %v1025_v10 = vsel %vm978_vm0, %v1011_v61, 0.0  ;;  %v1069_v11 = vmax.f32 %v3154_v26, %v1068_v6  ;;  %v1070_v15 = vsel %vm978_vm0, %v3191_v55, -inf }
  0x3a   : > { %v1049_v12 = vmin.f32 %v1045_v4, %v1047_v5  ;;  %v1072_v16 = vmax.f32 %v1065_v51, %v1067_v53  ;;  %v994_v17 = vrot.slane %v993_v8, 4  ;;  %v1071_v19 = vmax.f32 %v1063_v45, %v1070_v15  ;;  %v2731_v15 = vld [vmem:[%s3253_s8] ss:$0 sm:$0xff] }
  0x3b   : > { %v1026_v18 = vadd.f32 %v1025_v10, %v1024_v9  ;;  %v1147_v59 = vpack.c.bf16 %v3191_v55, %v3188_v54  ;;  %v1306_v63 = vlaneseq }
  0x3c   : > { %v1050_v20 = vmin.f32 %v1048_v50, %v1049_v12  ;;  %v995_v21 = vadd.f32 %v994_v17, %v993_v8  ;;  %v1073_v23 = vmax.f32 %v1069_v11, %v1071_v19  ;;  %v1146_v50 = vpack.c.bf16 %v3161_v31, %v3157_v27 }
  0x3d   : > { %2608 = vmatmul.msk.bf16.gmra.mxu0 %vm978_vm0, %v1145_v49  ;;  %v1027_v22 = vrot.slane %v1026_v18, 4  ;;  %v3234_v4 = vshrl.u32 %v1306_v63, 7 }
  0x3e   : > { %v1051_v24 = vrot.slane %v1050_v20, 4  ;;  %v996_v25 = vrot.slane %v995_v21, 2  ;;  %v1074_v29 = vmax.f32 %v1072_v16, %v1073_v23 }
  0x3f   : > { %v1028_v28 = vadd.f32 %v1027_v22, %v1026_v18  ;;  %v1059_v56 = vld [vmem:[#allocation5] sm:$0x1]  ;;  %2725 = vset.pattern.permute.xlu2 %v3234_v4 }
  0x40   : > { %v1052_v30 = vmin.f32 %v1050_v20, %v1051_v24  ;;  %v997_v26 = vadd.f32 %v996_v25, %v995_v21  ;;  %v1075_v33 = vrot.slane %v1074_v29, 4  ;;  %v2651_v20 = vld [vmem:[%s3928_s12 + $0x8] sm:$0xff]  ;;  %v2650_v21 = vld [vmem:[%s3928_s12] sm:$0xff]  ;;  %s3931_s12 = sld [smem:[#allocation23_spill]] }
  0x41   : > { %v1029_v32 = vrot.slane %v1028_v28, 2  ;;  %1404 = vmatpush.bf16.msra.mxu1 %v2651_v20  ;;  %v3275_v22 = vld [vmem:[%s902_s27] sm:$0xff]  ;;  %s3932_s27 = scalar_lea.vmem %s3925_s7, %s3094_s0 }
  0x42   : > { %v1053_v34 = vrot.slane %v1052_v30, 2  ;;  %v998_v35 = vrot.slane %v997_v26, 1  ;;  %v1076_v37 = vmax.f32 %v1074_v29, %v1075_v33  ;;  %v1209_v23 = vperm.slane %v3275_v22, 0  ;;  %v3283_v25 = vld [vmem:[%s906_s1] sm:$0xff] }
  0x43   : > { %v1030_v36 = vadd.f32 %v1029_v32, %v1028_v28  ;;  %v1202_v24 = vrot.slane %v3275_v22, 1  ;;  %v2899_v28 = vmov 0  }
  0x44   : > { %v1054_v39 = vmin.f32 %v1052_v30, %v1053_v34  ;;  %v999_v40 = vadd.f32 %v998_v35, %v997_v26  ;;  %v1077_v42 = vrot.slane %v1076_v37, 2  ;;  %2726 = vset.pattern.permute.xlu0 %v2899_v28  ;;  %2727 = vset.pattern.permute.xlu1 %v2899_v28  ;;  %v1225_v29 = vmul.f32 %v1209_v23, %v3283_v25 }
  0x45   : > { %v1031_v41 = vrot.slane %v1030_v36, 1  ;;  %1405 = vmatpush.bf16.msra.mxu1 %v2650_v21  ;;  %v1210_v30 = vperm.slane %v1202_v24, 0 }
  0x46   : > { %v1055_v44 = vrot.slane %v1054_v39, 1  ;;  %v1000_v45 = vadd.f32 %v999_v40, %v977_v38  ;;  %v1078_v48 = vmax.f32 %v1076_v37, %v1077_v42  ;;  %s936_s10 = scalar_lea.vmem %s3931_s12, %s3094_s0  ;;  %v1233_v33 = vmul.f32 0.35355338, %v1225_v29  ;;  %s939_s12 = scalar_lea.vmem %s3934_s11, %s3094_s0 }
  0x47   : > { %v1032_v46 = vadd.f32 %v1031_v41, %v1030_v36  ;;  %v1337_v26 = vld [vmem:[%s936_s10] sm:$0x1]  ;;  %v1226_v34 = vmul.f32 %v1210_v30, %v3283_v25  ;;  %v1203_v37 = vrot.slane %v3275_v22, 2  ;;  %s910_s10 = scalar_lea.vmem %s3935_s5, %s3269_s6 }
  0x48   : > { %v1056_v49 = vmin.f32 %v1054_v39, %v1055_v44  ;;  %1002 = vst.msk [vmem:[#allocation2] sm:$0x1] %vm972_vm1, %v1000_v45  ;;  %v1079_v52 = vrot.slane %v1078_v48, 1  ;;  %v1338_v36 = vadd.f32 1.0, %v1337_v26  ;;  %v1204_v45 = vrot.slane %v3275_v22, 3 }
  0x49   : > { %v1033_v51 = vadd.f32 %v1032_v46, %v1003_v43  ;;  %v1234_v40 = vmul.f32 0.35355338, %v1226_v34  ;;  %v1211_v43 = vperm.slane %v1203_v37, 0 }
  0x4a   : > { %v1057_v53 = vmin.f32 %v1035_v47, %v1056_v49  ;;  %v1080_v57 = vmax.f32 %v1078_v48, %v1079_v52  ;;  %v3292_v41 = vperm.slane %v1338_v36, 0  ;;  %v3304_v48 = vld [vmem:[%s3932_s27] ss:$0 sm:$0xff]  ;;  %s2905_s27 = smov 32  }
  0x4b   : > { %1034 = vst.msk [vmem:[#allocation3] sm:$0x1] %vm972_vm1, %v1033_v51  ;;  %v1227_v51 = vmul.f32 %v1211_v43, %v3283_v25 }
  0x4c   : > { %1058 = vst.msk [vmem:[#allocation4] sm:$0x1] %vm972_vm1, %v1057_v53  ;;  %v1081_v58 = vmax.f32 %v1059_v56, %v1080_v57  ;;  %v1212_v53 = vperm.slane %v1204_v45, 0 }
  0x4d   : > { %2609 = vmatmul.msk.bf16.gmra.mxu0 %vm978_vm0, %v1146_v50 }
  0x4e   : > { %1082 = vst.msk [vmem:[#allocation5] sm:$0x1] %vm972_vm1, %v1081_v58 }
  0x5d   : > { %2610 = vmatmul.msk.bf16.gmra.mxu0 %vm978_vm0, %v1147_v59  ;;  %v1235_v59 = vmul.f32 0.35355338, %v1227_v51 }
  0xaa   : > { %v1181_v61 = vpop.f32.mrf.mxu0 }
  0xab   : > { %v1182_v62 = vadd.f32 %v2730_v60, %v1181_v61 }
  0xad   : > { %1265 = vrot.lane.b32.xlu0 %v1182_v62, %s2898_s29  ;;  %v1241_v32 = vadd.f32 1.0, %v1182_v62  ;;  %v1228_v62 = vmul.f32 %v1212_v53, %v3283_v25 }
  0xaf   : > { %v1249_v39 = vmul.f32 %v1241_v32, %v1233_v33 }
  0xb2   : > { %v1183_v0 = vpop.f32.mrf.mxu0 }
  0xb3   : > { %v1184_v3 = vadd.f32 %v2730_v60, %v1183_v0  ;;  %v1206_v0 = vrot.slane %v3275_v22, 5 }
  0xb5   : > { %1267 = vrot.lane.b32.xlu0 %v1184_v3, %s2898_s29  ;;  %v1242_v38 = vadd.f32 1.0, %v1184_v3 }
  0xb7   : > { %v1250_v44 = vmul.f32 %v1242_v38, %v1234_v40 }
  0xba   : > { %v1186_v5 = vpop.f32.mrf.mxu0 }
  0xbb   : > { %v3237_v6 = vadd.f32 %v2730_v60, %v1186_v5 }
  0xbd   : > { %1269 = vrot.lane.b32.xlu1 %v3237_v6, %s2898_s29  ;;  %v1243_v58 = vadd.f32 1.0, %v3237_v6 }
  0xbf   : > { %v1251_v6 = vmul.f32 %v1243_v58, %v1235_v59 }
  0xc2   : > { %v1188_v7 = vpop.f32.mrf.mxu0 }
  0xc3   : > { %v3240_v8 = vadd.f32 %v2730_v60, %v1188_v7 }
  0xc5   : > { %1271 = vrot.lane.b32.xlu1 %v3240_v8, %s2898_s29 }
  0xca   : > { %v1191_v9 = vpop.f32.mrf.mxu0 }
  0xcb   : > { %v3243_v10 = vadd.f32 %v2730_v60, %v1191_v9  ;;  %v1205_v9 = vrot.slane %v3275_v22, 4 }
  0xcd   : > { %1273 = vrot.lane.b32.xlu2 %v3243_v10, %s2898_s29  ;;  %v1213_v24 = vperm.slane %v1205_v9, 0 }
  0xd2   : > { %v1193_v11 = vpop.f32.mrf.mxu0 }
  0xd3   : > { %v3246_v12 = vadd.f32 %v2730_v60, %v1193_v11  ;;  %v1244_v11 = vadd.f32 1.0, %v3240_v8 }
  0xd5   : > { %1275 = vrot.lane.b32.xlu2 %v3246_v12, %s2898_s29 }
  0xda   : > { %v1196_v16 = vpop.f32.mrf.mxu0 }
  0xdb   : > { %v3256_v17 = vadd.f32 %v2730_v60, %v1196_v16  ;;  %v1214_v16 = vperm.slane %v1206_v0, 0 }
  0xdd   : > { %1310 = vperm.xlu2 %2725, %v2731_v15   ;;  %1277 = vrot.lane.b32.xlu0 %v3256_v17, %s2898_s29  ;;  %v1236_v15 = vmul.f32 0.35355338, %v1228_v62  ;;  %v1230_v26 = vmul.f32 %v1214_v16, %v3283_v25 }
  0xe2   : > { %v1198_v18 = vpop.f32.mrf.mxu0 }
  0xe3   : > { %v3259_v19 = vadd.f32 %v2730_v60, %v1198_v18 }
  0xe5   : > { %1279 = vrot.lane.b32.xlu1 %v3259_v19, %s2898_s29  ;;  %2728 = vset.pattern.permute.xlu2 %v2899_v28  ;;  %s3933_s29 = sld [smem:[#allocation20_spill]]  ;;  %v1252_v28 = vmul.f32 %v1244_v11, %v1236_v15  ;;  %v1208_v11 = vrot.slane %v3275_v22, 7 }
  0xeb   : > { %s927_s30 = scalar_lea.vmem %s3933_s29, %s3269_s6  ;;  %s879_s29 = sand.u32 1, %s2877_s26  }
  0xec   : > { %v3320_v60 = vld [vmem:[%s927_s30] sm:$0xff]  ;;  %s2904_s30 = smov 48   ;;  %s2595_s6 = sshll.u32 %s879_s29, 6 }
  0xed   : > { %v1299_v5 = vrot.slane %v3320_v60, 2  ;;  %v1298_v7 = vrot.slane %v3320_v60, 1  ;;  %v1312_v20 = vperm.slane %v3320_v60, 0  ;;  %v1302_v29 = vrot.slane %v3320_v60, 5 }
  0xee   : > { %v1301_v30 = vrot.slane %v3320_v60, 4  ;;  %v1300_v34 = vrot.slane %v3320_v60, 3  ;;  %v1303_v0 = vrot.slane %v3320_v60, 6  ;;  %v1304_v16 = vrot.slane %v3320_v60, 7 }
  0xef   : > { %v1314_v21 = vperm.slane %v1299_v5, 0  ;;  %v1313_v23 = vperm.slane %v1298_v7, 0  ;;  %v1317_v43 = vperm.slane %v1302_v29, 0  ;;  %v1248_v60 = vadd.f32 1.0, %v3259_v19 }
  0xf0   : > { %v1315_v45 = vperm.slane %v1300_v34, 0 }
 0x11f   : > { %v1266_v35 = vpop.permute.xlu0 %1265 }
 0x120   : > { %v3294_v42 = vadd.f32 %v1266_v35, %v1249_v39  ;;  %v1229_v39 = vmul.f32 %v1213_v24, %v3283_v25  ;;  %v1319_v24 = vperm.slane %v1304_v16, 0 }
 0x122   : > { %v1342_v49 = vmul.f32 %v3292_v41, %v3294_v42  ;;  %v1237_v53 = vmul.f32 0.35355338, %v1229_v39 }
 0x124   : > { %v1353_v56 = vadd.f32 %v3304_v48, %v1342_v49  ;;  %v1238_v49 = vmul.f32 0.35355338, %v1230_v26 }
 0x127   : > { %v3297_v46 = vpop.permute.xlu2 %1273  ;;  %v1268_v47 = vpop.permute.xlu0 %1267 }
 0x128   : > { %v3308_v50 = vadd.f32 %v1268_v47, %v1250_v44  ;;  %v1316_v44 = vperm.slane %v1301_v30, 0  ;;  %v1246_v47 = vadd.f32 1.0, %v3246_v12  ;;  %v1207_v12 = vrot.slane %v3275_v22, 6 }
 0x12a   : > { %v1343_v52 = vmul.f32 %v3292_v41, %v3308_v50  ;;  %v1254_v62 = vmul.f32 %v1246_v47, %v1238_v49 }
 0x12c   : > { %v1354_v57 = vadd.f32 %v3304_v48, %v1343_v52 }
 0x12e   : > { %v1361_v61 = vpack.c.bf16 %v1354_v57, %v1353_v56  ;;  %v1245_v56 = vadd.f32 1.0, %v3243_v10  ;;  %v1318_v10 = vperm.slane %v1303_v0, 0 }
 0x12f   : > { %v1276_v63 = vpop.permute.xlu2 %1275  ;;  %v1270_v3 = vpop.permute.xlu1 %1269 }
 0x130   : > { %2619 = vmatmul.msk.bf16.vlgmr.msra.gmra.mxu1 %vm1138_vm2, %v1361_v61  ;;  %v3329_v18 = vadd.f32 %v1270_v3, %v1251_v6  ;;  %v1253_v3 = vmul.f32 %v1245_v56, %v1237_v53  ;;  %v3349_v5 = vadd.f32 %v1276_v63, %v1254_v62  ;;  %v1215_v6 = vperm.slane %v1207_v12, 0 }
 0x132   : > { %v1344_v32 = vmul.f32 %v3292_v41, %v3329_v18  ;;  %v3353_v7 = vadd.f32 %v3297_v46, %v1253_v3  ;;  %v1347_v9 = vmul.f32 %v3292_v41, %v3349_v5  ;;  %v1216_v46 = vperm.slane %v1208_v11, 0 }
 0x134   : > { %v1355_v51 = vadd.f32 %v3304_v48, %v1344_v32  ;;  %v1346_v15 = vmul.f32 %v3292_v41, %v3353_v7  ;;  %v1232_v22 = vmul.f32 %v1216_v46, %v3283_v25 }
 0x136   : > { %v1240_v34 = vmul.f32 0.35355338, %v1232_v22 }
 0x137   : > { %v1311_v8 = vpop.permute.xlu2 %1310  ;;  %v1272_v33 = vpop.permute.xlu1 %1271 }
 0x138   : > { %v3338_v35 = vadd.f32 %v1272_v33, %v1252_v28  ;;  %v1328_v36 = vmul.f32 %v1312_v20, %v1311_v8  ;;  %v1330_v37 = vmul.f32 %v1314_v21, %v1311_v8  ;;  %v1329_v38 = vmul.f32 %v1313_v23, %v1311_v8 }
 0x139   : > { %v1333_v58 = vmul.f32 %v1317_v43, %v1311_v8  ;;  %v1332_v59 = vmul.f32 %v1316_v44, %v1311_v8  ;;  %v1331_v61 = vmul.f32 %v1315_v45, %v1311_v8  ;;  %v1334_v63 = vmul.f32 %v1318_v10, %v1311_v8  ;;  %v3383_v43 = vld [vmem:[%s3880_s13] ss:$0 sm:$0xff] }
 0x13a   : > { %v1345_v40 = vmul.f32 %v3292_v41, %v3338_v35  ;;  %1429 = vperm.xlu0 %2726, %v1328_v36   ;;  %1439 = vperm.xlu2 %2728, %v1330_v37   ;;  %v1358_v20 = vadd.f32 %v3304_v48, %v1347_v9  ;;  %v1231_v21 = vmul.f32 %v1215_v6, %v3283_v25  ;;  %v1247_v28 = vadd.f32 1.0, %v3256_v17 }
 0x13b   : > { %1434 = vperm.xlu1 %2727, %v1329_v38   ;;  %v1357_v23 = vadd.f32 %v3304_v48, %v1346_v15  ;;  %v1335_v26 = vmul.f32 %v1319_v24, %v1311_v8  ;;  %v1256_v37 = vmul.f32 %v1248_v60, %v1240_v34 }
 0x13c   : > { %v1356_v52 = vadd.f32 %v3304_v48, %v1345_v40  ;;  %v1239_v29 = vmul.f32 0.35355338, %v1231_v21 }
 0x13d   : > { %v1363_v30 = vpack.c.bf16 %v1358_v20, %v1357_v23 }
 0x13e   : > { %v1362_v57 = vpack.c.bf16 %v1356_v52, %v1355_v51  ;;  %v1255_v33 = vmul.f32 %v1247_v28, %v1239_v29  ;;  %v2900_v29 = vmov 16.0  }
 0x13f   : > { %2743 = vrcp.f32 %v2900_v29 }
 0x140   : > { %2620 = vmatmul.msk.bf16.gmra.mxu1 %vm1138_vm2, %v1362_v57 }
 0x142   : > { %1454 = vperm.xlu0 %2726, %v1333_v58   ;;  %1449 = vperm.xlu2 %2728, %v1332_v59  }
 0x143   : > { %1444 = vperm.xlu1 %2727, %v1331_v61  }
 0x14a   : > { %1459 = vperm.xlu0 %2726, %v1334_v63  }
 0x14f   : > { %v1278_v32 = vpop.permute.xlu0 %1277 }
 0x150   : > { %2621 = vmatmul.msk.bf16.gmra.mxu1 %vm1138_vm2, %v1363_v30  ;;  %v3368_v36 = vadd.f32 %v1278_v32, %v1255_v33  ;;  %v2744_v30 = vpop.eup %2743 }
 0x151   : > { %v1508_v22 = vmul.f32 16.0, %v2744_v30  ;;  %vm1512_vm3 = vweird.f32 %v2744_v30 }
 0x152   : > { %1464 = vperm.xlu0 %2726, %v1335_v26   ;;  %v1348_v17 = vmul.f32 %v3292_v41, %v3368_v36 }
 0x153   : > { %v1509_v26 = vsub.f32 1.0, %v1508_v22 }
 0x154   : > { %v1359_v8 = vadd.f32 %v3304_v48, %v1348_v17 }
 0x155   : > { %v1510_v32 = vmul.f32 %v2744_v30, %v1509_v26 }
 0x157   : > { %v1280_v38 = vpop.permute.xlu1 %1279 }
 0x158   : > { %v3372_v39 = vadd.f32 %v1280_v38, %v1256_v37 }
 0x15a   : > { %v1349_v25 = vmul.f32 %v3292_v41, %v3372_v39  ;;  %2729 = vset.pattern.permute.xlu0 %v3234_v4 }
 0x15c   : > { %v1360_v19 = vadd.f32 %v3304_v48, %v1349_v25 }
 0x15e   : > { %v1364_v40 = vpack.c.bf16 %v1360_v19, %v1359_v8 }
 0x160   : > { %2622 = vmatmul.msk.bf16.gmra.mxu1 %vm1138_vm2, %v1364_v40 }
 0x194   : > { %v1440_v61 = vpop.permute.xlu2 %1439 }
 0x19c   : > { %v1450_v63 = vpop.permute.xlu2 %1449 }
 0x1ac   : > { %v1430_v47 = vpop.permute.xlu0 %1429 }
 0x1ad   : > { %v1407_v44 = vpop.f32.mrf.mxu1  ;;  %v1435_v52 = vpop.permute.xlu1 %1434 }
 0x1ae   : > { %v1408_v45 = vadd.f32 %v3383_v43, %v1407_v44 }
 0x1b0   : > { %v1467_v49 = vmul.f32 %v1430_v47, %v1408_v45 }
 0x1b2   : > { %v1475_v41 = vadd.f32 %v1467_v49, %v3103_v1 }
 0x1b4   : > { %v1483_v4 = vsel %vm978_vm0, %v1475_v41, 0.0  ;;  %v1455_v23 = vpop.permute.xlu0 %1454 }
 0x1b5   : > { %v1409_v51 = vpop.f32.mrf.mxu1  ;;  %1484 = vadd.xlane.f32.xlu1 %v1483_v4  ;;  %v1445_v10 = vpop.permute.xlu1 %1444 }
 0x1b6   : > { %v1410_v48 = vadd.f32 %v3383_v43, %v1409_v51 }
 0x1b8   : > { %v1468_v53 = vmul.f32 %v1435_v52, %v1410_v48 }
 0x1ba   : > { %v1476_v56 = vadd.f32 %v1468_v53, %v3106_v2 }
 0x1bc   : > { %v1486_v57 = vsel %vm978_vm0, %v1476_v56, 0.0  ;;  %v1460_v60 = vpop.permute.xlu0 %1459 }
 0x1bd   : > { %v1412_v58 = vpop.f32.mrf.mxu1  ;;  %1487 = vadd.xlane.f32.xlu2 %v1486_v57 }
 0x1be   : > { %v1413_v59 = vadd.f32 %v3383_v43, %v1412_v58 }
 0x1c0   : > { %v1469_v62 = vmul.f32 %v1440_v61, %v1413_v59 }
 0x1c2   : > { %v1477_v1 = vadd.f32 %v1469_v62, %v3125_v13 }
 0x1c4   : > { %v1489_v0 = vsel %vm978_vm0, %v1477_v1, 0.0  ;;  %v1465_v8 = vpop.permute.xlu0 %1464 }
 0x1c5   : > { %v1414_v3 = vpop.f32.mrf.mxu1  ;;  %1490 = vadd.xlane.f32.xlu0 %v1489_v0 }
 0x1c6   : > { %v1415_v12 = vadd.f32 %v3383_v43, %v1414_v3 }
 0x1c8   : > { %v1470_v9 = vmul.f32 %v1445_v10, %v1415_v12 }
 0x1ca   : > { %v1478_v2 = vadd.f32 %v1470_v9, %v3128_v14 }
 0x1cc   : > { %v1492_v6 = vsel %vm978_vm0, %v1478_v2, 0.0 }
 0x1cd   : > { %v1417_v11 = vpop.f32.mrf.mxu1  ;;  %1493 = vadd.xlane.f32.xlu2 %v1492_v6 }
 0x1ce   : > { %v1418_v15 = vadd.f32 %v3383_v43, %v1417_v11 }
 0x1d0   : > { %v1471_v16 = vmul.f32 %v1450_v63, %v1418_v15 }
 0x1d2   : > { %v1479_v13 = vadd.f32 %v1471_v16, %v3157_v27  ;;  %v1511_v27 = vadd.f32 %v2744_v30, %v1510_v32 }
 0x1d4   : > { %v1495_v20 = vsel %vm978_vm0, %v1479_v13, 0.0  ;;  %v3403_v34 = vsel %vm1512_vm3, %v2744_v30, %v1511_v27 }
 0x1d5   : > { %v1419_v21 = vpop.f32.mrf.mxu1  ;;  %1496 = vadd.xlane.f32.xlu1 %v1495_v20 }
 0x1d6   : > { %v1420_v46 = vadd.f32 %v3383_v43, %v1419_v21  ;;  %v967_v21 = vld [vmem:[%s3253_s8] sm:$0x1]  ;;  %s942_s8 = scalar_lea.vmem %s3876_s9, %s3094_s0 }
 0x1d7   : > { %vm2036_vm4 = vcmp.gt.f32.partialorder %v967_v21, 0.0 }
 0x1d8   : > { %v1472_v24 = vmul.f32 %v1455_v23, %v1420_v46 }
 0x1da   : > { %v1480_v14 = vadd.f32 %v1472_v24, %v3161_v31 }
 0x1dc   : > { %v1498_v28 = vsel %vm978_vm0, %v1480_v14, 0.0 }
 0x1dd   : > { %1499 = vadd.xlane.f32.xlu2 %v1498_v28  ;;  %v1422_v33 = vpop.f32.mrf.mxu1  ;;  %v2652_v28 = vld [vmem:[%s3883_s16] sm:$0xff] }
 0x1de   : > { %v1423_v31 = vadd.f32 %v3383_v43, %v1422_v33  ;;  %1725 = vmatpush.bf16.msra.mxu2 %v2652_v28 }
 0x1e0   : > { %v1473_v19 = vmul.f32 %v1460_v60, %v1423_v31 }
 0x1e2   : > { %v1481_v51 = vadd.f32 %v1473_v19, %v3188_v54 }
 0x1e4   : > { %v1501_v53 = vsel %vm978_vm0, %v1481_v51, 0.0 }
 0x1e5   : > { %v1424_v44 = vpop.f32.mrf.mxu1 }
 0x1e6   : > { %v1425_v49 = vadd.f32 %v3383_v43, %v1424_v44 }
 0x1e8   : > { %v1474_v48 = vmul.f32 %v1465_v8, %v1425_v49 }
 0x1ea   : > { %v1482_v43 = vadd.f32 %v1474_v48, %v3191_v55 }
 0x1ec   : > { %v1504_v61 = vsel %vm978_vm0, %v1482_v43, 0.0 }
 0x228   : > { %v1485_v37 = vpop.xlane.xlu1 %1484 }
 0x229   : > { %v1514_v38 = vmul.f32 %v3403_v34, %v1485_v37 }
 0x22b   : > { %v3407_v17 = vsub.f32 %v1475_v41, %v1514_v38 }
 0x22d   : > { %v1530_v25 = vmul.f32 %v3407_v17, %v3407_v17 }
 0x22f   : > { %v1538_v40 = vsel %vm978_vm0, %v1530_v25, 0.0 }
 0x230   : > { %v1488_v45 = vpop.xlane.xlu2 %1487  ;;  %1539 = vadd.xlane.f32.xlu1 %v1538_v40 }
 0x231   : > { %v1515_v47 = vmul.f32 %v3403_v34, %v1488_v45 }
 0x233   : > { %v3414_v4 = vsub.f32 %v1476_v56, %v1515_v47 }
 0x235   : > { %v1531_v41 = vmul.f32 %v3414_v4, %v3414_v4 }
 0x237   : > { %v1541_v52 = vsel %vm978_vm0, %v1531_v41, 0.0 }
 0x238   : > { %v1491_v57 = vpop.xlane.xlu0 %1490  ;;  %1542 = vadd.xlane.f32.xlu2 %v1541_v52  ;;  %1502 = vadd.xlane.f32.xlu1 %v1501_v53 }
 0x239   : > { %v1516_v58 = vmul.f32 %v3403_v34, %v1491_v57 }
 0x23b   : > { %v3422_v59 = vsub.f32 %v1477_v1, %v1516_v58 }
 0x23d   : > { %v1532_v54 = vmul.f32 %v3422_v59, %v3422_v59 }
 0x23f   : > { %v1544_v56 = vsel %vm978_vm0, %v1532_v54, 0.0 }
 0x240   : > { %1545 = vadd.xlane.f32.xlu0 %v1544_v56  ;;  %1505 = vadd.xlane.f32.xlu2 %v1504_v61  ;;  %v1494_v62 = vpop.xlane.xlu2 %1493 }
 0x241   : > { %v1517_v0 = vmul.f32 %v3403_v34, %v1494_v62 }
 0x243   : > { %v3430_v3 = vsub.f32 %v1478_v2, %v1517_v0 }
 0x245   : > { %v1533_v1 = vmul.f32 %v3430_v3, %v3430_v3 }
 0x247   : > { %v1547_v55 = vsel %vm978_vm0, %v1533_v1, 0.0 }
 0x248   : > { %1548 = vadd.xlane.f32.xlu1 %v1547_v55  ;;  %v1497_v12 = vpop.xlane.xlu1 %1496 }
 0x249   : > { %v1518_v10 = vmul.f32 %v3403_v34, %v1497_v12  ;;  %v3475_v12 = vld [vmem:[%s3881_s14] ss:$0 sm:$0xff] }
 0x24b   : > { %v3436_v9 = vsub.f32 %v1479_v13, %v1518_v10  ;;  %v2901_v13 = vmov -1e+30  }
 0x24c   : > { %v2037_v46 = vsel %vm2036_vm4, 0.0, %v2901_v13 }
 0x24d   : > { %v1534_v6 = vmul.f32 %v3436_v9, %v3436_v9  ;;  %v2038_v23 = vperm.slane %v2037_v46, 0 }
 0x24f   : > { %v1550_v11 = vsel %vm978_vm0, %v1534_v6, 0.0 }
 0x250   : > { %v1500_v2 = vpop.xlane.xlu2 %1499  ;;  %1551 = vadd.xlane.f32.xlu2 %v1550_v11 }
 0x251   : > { %v1519_v15 = vmul.f32 %v3403_v34, %v1500_v2 }
 0x253   : > { %v3442_v63 = vsub.f32 %v1480_v14, %v1519_v15 }
 0x255   : > { %v1535_v16 = vmul.f32 %v3442_v63, %v3442_v63 }
 0x257   : > { %v1553_v20 = vsel %vm978_vm0, %v1535_v16, 0.0 }
 0x258   : > { %1554 = vadd.xlane.f32.xlu0 %v1553_v20 }
 0x26c   : > { %2043 = vperm.xlu0 %2729, %v2038_v23  }
 0x2a3   : > { %v1540_v24 = vpop.xlane.xlu1 %1539 }
 0x2a4   : > { %v1562_v14 = vmul.f32 %v1540_v24, %v3403_v34 }
 0x2a6   : > { %v1570_v29 = vadd.f32 1e-05, %v1562_v14 }
 0x2a8   : > { %2745 = vrsqrt.f32 %v1570_v29  ;;  %vm1584_vm6 = vweird.f32 %v1570_v29 }
 0x2ab   : > { %v1543_v30 = vpop.xlane.xlu2 %1542  ;;  %v1503_v22 = vpop.xlane.xlu1 %1502 }
 0x2ac   : > { %v1563_v26 = vmul.f32 %v1543_v30, %v3403_v34  ;;  %v1520_v32 = vmul.f32 %v3403_v34, %v1503_v22 }
 0x2ae   : > { %v2746_v27 = vpop.eup %2745  ;;  %v1571_v60 = vadd.f32 1e-05, %v1563_v26  ;;  %v3458_v33 = vsub.f32 %v1481_v51, %v1520_v32 }
 0x2af   : > { %v1579_v37 = vmul.f32 %v2746_v27, %v1570_v29  ;;  %vm1585_vm5 = vweird.f32 %v2746_v27 }
 0x2b0   : > { %2747 = vrsqrt.f32 %v1571_v60  ;;  %v1536_v38 = vmul.f32 %v3458_v33, %v3458_v33  ;;  %vm1586_vm7 = vmor %vm1584_vm6, %vm1585_vm5  ;;  %vm1594_vm9 = vweird.f32 %v1571_v60 }
 0x2b1   : > { %v1580_v31 = vmul.f32 %v2746_v27, %v1579_v37 }
 0x2b2   : > { %v1556_v25 = vsel %vm978_vm0, %v1536_v38, 0.0 }
 0x2b3   : > { %v1581_v8 = vmul.f32 0.5, %v1580_v31  ;;  %v1546_v19 = vpop.xlane.xlu0 %1545  ;;  %v1506_v40 = vpop.xlane.xlu2 %1505  ;;  %1557 = vadd.xlane.f32.xlu1 %v1556_v25 }
 0x2b4   : > { %v1564_v44 = vmul.f32 %v1546_v19, %v3403_v34  ;;  %v1521_v45 = vmul.f32 %v3403_v34, %v1506_v40 }
 0x2b5   : > { %v1582_v47 = vsub.f32 1.5, %v1581_v8 }
 0x2b6   : > { %v2748_v49 = vpop.eup %2747  ;;  %v1572_v51 = vadd.f32 1e-05, %v1564_v44  ;;  %v3465_v41 = vsub.f32 %v1482_v43, %v1521_v45 }
 0x2b7   : > { %v1583_v48 = vmul.f32 %v2746_v27, %v1582_v47  ;;  %v1589_v52 = vmul.f32 %v2748_v49, %v1571_v60  ;;  %vm1595_vm8 = vweird.f32 %v2748_v49 }
 0x2b8   : > { %2749 = vrsqrt.f32 %v1572_v51  ;;  %v1537_v53 = vmul.f32 %v3465_v41, %v3465_v41  ;;  %vm1596_vm10 = vmor %vm1594_vm9, %vm1595_vm8  ;;  %vm1604_vm12 = vweird.f32 %v1572_v51  ;;  %vm2307_vm9 = vcmask 1041409  }
 0x2b9   : > { %v1590_v57 = vmul.f32 %v2748_v49, %v1589_v52  ;;  %v1587_v54 = vsel %vm1586_vm7, %v2746_v27, %v1583_v48 }
 0x2ba   : > { %v1559_v58 = vsel %vm978_vm0, %v1537_v53, 0.0  ;;  %v1658_v1 = vmul.f32 %v1587_v54, %v3407_v17  ;;  %v3482_v17 = vld [vmem:[%s3882_s15] ss:$0 sm:$0xff] }
 0x2bb   : > { %v1591_v56 = vmul.f32 0.5, %v1590_v57  ;;  %1560 = vadd.xlane.f32.xlu2 %v1559_v58  ;;  %v1549_v61 = vpop.xlane.xlu1 %1548 }
 0x2bc   : > { %v1565_v62 = vmul.f32 %v1549_v61, %v3403_v34  ;;  %v1670_v16 = vmul.f32 %v3475_v12, %v1658_v1 }
 0x2bd   : > { %v1592_v43 = vsub.f32 1.5, %v1591_v56 }
 0x2be   : > { %v2750_v0 = vpop.eup %2749  ;;  %v1573_v55 = vadd.f32 1e-05, %v1565_v62  ;;  %v3487_v28 = vadd.f32 %v3482_v17, %v1670_v16 }
 0x2bf   : > { %v1593_v10 = vmul.f32 %v2748_v49, %v1592_v43  ;;  %v1599_v6 = vmul.f32 %v2750_v0, %v1572_v51  ;;  %vm1605_vm11 = vweird.f32 %v2750_v0 }
 0x2c0   : > { %2751 = vrsqrt.f32 %v1573_v55  ;;  %vm1606_vm13 = vmor %vm1604_vm12, %vm1605_vm11  ;;  %vm1614_vm15 = vweird.f32 %v1573_v55  ;;  %vm2311_vm11 = vcmask 1043459   ;;  %vm2313_vm12 = vcmask 1044484  }
 0x2c1   : > { %v1597_v11 = vsel %vm1596_vm10, %v2748_v49, %v1593_v10  ;;  %v1600_v2 = vmul.f32 %v2750_v0, %v1599_v6  ;;  %vm2309_vm10 = vcmask 1042434  }
 0x2c2   : > { %v1659_v15 = vmul.f32 %v1597_v11, %v3414_v4 }
 0x2c3   : > { %v1601_v20 = vmul.f32 0.5, %v1600_v2  ;;  %v1552_v21 = vpop.xlane.xlu2 %1551 }
 0x2c4   : > { %v1566_v13 = vmul.f32 %v1552_v21, %v3403_v34  ;;  %v1671_v46 = vmul.f32 %v3475_v12, %v1659_v15 }
 0x2c5   : > { %v1602_v23 = vsub.f32 1.5, %v1601_v20 }
 0x2c6   : > { %v2752_v24 = vpop.eup %2751  ;;  %v1574_v14 = vadd.f32 1e-05, %v1566_v13  ;;  %v3490_v4 = vadd.f32 %v3482_v17, %v1671_v46 }
 0x2c7   : > { %v1603_v29 = vmul.f32 %v2750_v0, %v1602_v23  ;;  %v1609_v30 = vmul.f32 %v2752_v24, %v1573_v55  ;;  %vm1615_vm14 = vweird.f32 %v2752_v24 }
 0x2c8   : > { %2753 = vrsqrt.f32 %v1574_v14  ;;  %v1690_v22 = vpack.c.bf16 %v3490_v4, %v3487_v28  ;;  %vm1616_vm1 = vmor %vm1614_vm15, %vm1615_vm14  ;;  %vm1624_vm4 = vweird.f32 %v1574_v14  ;;  %vm2317_vm14 = vcmask 1046534  }
 0x2c9   : > { %v1610_v26 = vmul.f32 %v2752_v24, %v1609_v30  ;;  %v1607_v32 = vsel %vm1606_vm13, %v2750_v0, %v1603_v29  ;;  %vm2315_vm13 = vcmask 1045509   ;;  %vm2319_vm15 = vcmask 1047559  }
 0x2ca   : > { %2627 = vmatmul.msk.bf16.vlgmr.msra.gmra.mxu2 %vm978_vm0, %v1690_v22  ;;  %v1660_v25 = vmul.f32 %v1607_v32, %v3422_v59 }
 0x2cb   : > { %v1611_v27 = vmul.f32 0.5, %v1610_v26  ;;  %v1555_v60 = vpop.xlane.xlu0 %1554 }
 0x2cc   : > { %v1567_v37 = vmul.f32 %v1555_v60, %v3403_v34  ;;  %v1672_v49 = vmul.f32 %v3475_v12, %v1660_v25 }
 0x2cd   : > { %v1612_v38 = vsub.f32 1.5, %v1611_v27 }
 0x2ce   : > { %v2754_v31 = vpop.eup %2753  ;;  %v1575_v8 = vadd.f32 1e-05, %v1567_v37  ;;  %v3501_v59 = vadd.f32 %v3482_v17, %v1672_v49 }
 0x2cf   : > { %v1613_v19 = vmul.f32 %v2752_v24, %v1612_v38  ;;  %v1619_v40 = vmul.f32 %v2754_v31, %v1574_v14  ;;  %vm1625_vm3 = vweird.f32 %v2754_v31 }
 0x2d0   : > { %2755 = vrsqrt.f32 %v1575_v8  ;;  %vm1626_vm5 = vmor %vm1624_vm4, %vm1625_vm3  ;;  %vm1634_vm7 = vweird.f32 %v1575_v8 }
 0x2d1   : > { %v1617_v44 = vsel %vm1616_vm1, %v2752_v24, %v1613_v19  ;;  %v1620_v45 = vmul.f32 %v2754_v31, %v1619_v40 }
 0x2d2   : > { %v1661_v47 = vmul.f32 %v1617_v44, %v3430_v3 }
 0x2d3   : > { %v1621_v51 = vmul.f32 0.5, %v1620_v45 }
 0x2d4   : > { %v1673_v48 = vmul.f32 %v3475_v12, %v1661_v47 }
 0x2d5   : > { %v1622_v52 = vsub.f32 1.5, %v1621_v51 }
 0x2d6   : > { %v2756_v53 = vpop.eup %2755  ;;  %v3504_v57 = vadd.f32 %v3482_v17, %v1673_v48 }
 0x2d7   : > { %v1623_v58 = vmul.f32 %v2754_v31, %v1622_v52  ;;  %v1629_v54 = vmul.f32 %v2756_v53, %v1575_v8  ;;  %vm1635_vm6 = vweird.f32 %v2756_v53 }
 0x2d8   : > { %v1691_v3 = vpack.c.bf16 %v3504_v57, %v3501_v59  ;;  %vm1636_vm8 = vmor %vm1634_vm7, %vm1635_vm6 }
 0x2d9   : > { %v1627_v56 = vsel %vm1626_vm5, %v2754_v31, %v1623_v58  ;;  %v1630_v61 = vmul.f32 %v2756_v53, %v1629_v54 }
 0x2da   : > { %v1662_v62 = vmul.f32 %v1627_v56, %v3436_v9  ;;  %2628 = vmatmul.msk.bf16.gmra.mxu2 %vm978_vm0, %v1691_v3 }
 0x2db   : > { %v1631_v43 = vmul.f32 0.5, %v1630_v61 }
 0x2dc   : > { %v3511_v55 = vmul.f32 %v3475_v12, %v1662_v62 }
 0x2dd   : > { %v1632_v0 = vsub.f32 1.5, %v1631_v43 }
 0x2de   : > { %v2044_v1 = vpop.permute.xlu0 %2043 }
 0x2df   : > { %v1633_v10 = vmul.f32 %v2756_v53, %v1632_v0  ;;  %v3514_v6 = vadd.f32 %v2044_v1, %v3294_v42  ;;  %v3517_v11 = vadd.f32 %v2044_v1, %v3308_v50  ;;  %v3520_v2 = vadd.f32 %v2044_v1, %v3329_v18 }
 0x2e0   : > { %v3523_v9 = vadd.f32 %v2044_v1, %v3338_v35  ;;  %v3526_v15 = vadd.f32 %v2044_v1, %v3353_v7  ;;  %v3529_v16 = vadd.f32 %v2044_v1, %v3349_v5  ;;  %v3532_v20 = vadd.f32 %v2044_v1, %v3368_v36 }
 0x2e1   : > { %v1637_v42 = vsel %vm1636_vm8, %v2756_v53, %v1633_v10  ;;  %v3535_v50 = vadd.f32 %v2044_v1, %v3372_v39  ;;  %v2053_v18 = vsel %vm1138_vm2, %v3514_v6, -inf  ;;  %v2060_v35 = vsel %vm1138_vm2, %v3517_v11, -inf }
 0x2e2   : > { %v3542_v21 = vmul.f32 %v1637_v42, %v3442_v63  ;;  %v2054_v7 = vrot.slane %v2053_v18, 4  ;;  %v2061_v13 = vrot.slane %v2060_v35, 4  ;;  %v2067_v5 = vsel %vm1138_vm2, %v3520_v2, -inf }
 0x2e3   : > { %v2068_v36 = vrot.slane %v2067_v5, 4  ;;  %v2074_v46 = vsel %vm1138_vm2, %v3523_v9, -inf  ;;  %v2081_v39 = vsel %vm1138_vm2, %v3526_v15, -inf  ;;  %v2088_v23 = vsel %vm1138_vm2, %v3529_v16, -inf }
 0x2e4   : > { %v2055_v24 = vmax.f32 %v2053_v18, %v2054_v7  ;;  %v2062_v14 = vmax.f32 %v2060_v35, %v2061_v13  ;;  %v2075_v29 = vrot.slane %v2074_v46, 4  ;;  %v2082_v63 = vrot.slane %v2081_v39, 4 }
 0x2e5   : > { %v2069_v30 = vmax.f32 %v2067_v5, %v2068_v36  ;;  %v2089_v22 = vrot.slane %v2088_v23, 4  ;;  %v2095_v26 = vsel %vm1138_vm2, %v3532_v20, -inf  ;;  %v2102_v32 = vsel %vm1138_vm2, %v3535_v50, -inf }
 0x2e6   : > { %v2056_v27 = vrot.slane %v2055_v24, 2  ;;  %v2063_v60 = vrot.slane %v2062_v14, 2  ;;  %v2076_v37 = vmax.f32 %v2074_v46, %v2075_v29  ;;  %v2083_v38 = vmax.f32 %v2081_v39, %v2082_v63 }
 0x2e7   : > { %v2070_v31 = vrot.slane %v2069_v30, 2  ;;  %v2090_v25 = vmax.f32 %v2088_v23, %v2089_v22  ;;  %v2096_v8 = vrot.slane %v2095_v26, 4  ;;  %v2103_v19 = vrot.slane %v2102_v32, 4 }
 0x2e8   : > { %v2057_v40 = vmax.f32 %v2055_v24, %v2056_v27  ;;  %v2064_v44 = vmax.f32 %v2062_v14, %v2063_v60  ;;  %v2077_v45 = vrot.slane %v2076_v37, 2  ;;  %v2084_v47 = vrot.slane %v2083_v38, 2 }
 0x2e9   : > { %v2071_v49 = vmax.f32 %v2069_v30, %v2070_v31  ;;  %v2091_v51 = vrot.slane %v2090_v25, 2  ;;  %v2097_v48 = vmax.f32 %v2095_v26, %v2096_v8  ;;  %v2104_v52 = vmax.f32 %v2102_v32, %v2103_v19 }
 0x2ea   : > { %v2058_v53 = vrot.slane %v2057_v40, 1  ;;  %v2065_v58 = vrot.slane %v2064_v44, 1  ;;  %v2078_v54 = vmax.f32 %v2076_v37, %v2077_v45  ;;  %v2085_v3 = vmax.f32 %v2083_v38, %v2084_v47 }
 0x2eb   : > { %v2072_v56 = vrot.slane %v2071_v49, 1  ;;  %v2092_v61 = vmax.f32 %v2090_v25, %v2091_v51  ;;  %v2098_v62 = vrot.slane %v2097_v48, 2  ;;  %v2105_v43 = vrot.slane %v2104_v52, 2 }
 0x2ec   : > { %v2059_v0 = vmax.f32 %v2057_v40, %v2058_v53  ;;  %v2066_v1 = vmax.f32 %v2064_v44, %v2065_v58  ;;  %v2079_v10 = vrot.slane %v2078_v54, 1  ;;  %v2086_v42 = vrot.slane %v2085_v3, 1 }
 0x2ed   : > { %v2073_v18 = vmax.f32 %v2071_v49, %v2072_v56  ;;  %v2093_v35 = vrot.slane %v2092_v61, 1  ;;  %v2099_v7 = vmax.f32 %v2097_v48, %v2098_v62  ;;  %v2106_v13 = vmax.f32 %v2104_v52, %v2105_v43 }
 0x2ee   : > { %v2080_v5 = vmax.f32 %v2078_v54, %v2079_v10  ;;  %v2087_v36 = vmax.f32 %v2085_v3, %v2086_v42  ;;  %v2109_v46 = vsub.f32 %v3514_v6, %v2059_v0  ;;  %v2110_v39 = vsub.f32 %v3517_v11, %v2066_v1 }
 0x2ef   : > { %v2094_v23 = vmax.f32 %v2092_v61, %v2093_v35  ;;  %v2100_v24 = vrot.slane %v2099_v7, 1  ;;  %v2107_v14 = vrot.slane %v2106_v13, 1  ;;  %v2111_v29 = vsub.f32 %v3520_v2, %v2073_v18 }
 0x2f0   : > { %v2112_v63 = vsub.f32 %v3523_v9, %v2080_v5  ;;  %v2113_v30 = vsub.f32 %v3526_v15, %v2087_v36  ;;  %v2117_v22 = vmul.f32 1.442695, %v2109_v46  ;;  %v2119_v26 = vmul.f32 1.442695, %v2110_v39 }
 0x2f1   : > { %v2101_v32 = vmax.f32 %v2099_v7, %v2100_v24  ;;  %v2108_v27 = vmax.f32 %v2106_v13, %v2107_v14  ;;  %v2114_v60 = vsub.f32 %v3529_v16, %v2094_v23  ;;  %v2121_v37 = vmul.f32 1.442695, %v2111_v29 }
 0x2f2   : > { %2757 = vpow2.f32 %v2117_v22  ;;  %v2123_v6 = vmul.f32 1.442695, %v2112_v63  ;;  %v2125_v38 = vmul.f32 1.442695, %v2113_v30  ;;  %v1675_v11 = vmul.f32 %v3475_v12, %v3542_v21 }
 0x2f3   : > { %v2115_v31 = vsub.f32 %v3532_v20, %v2101_v32  ;;  %v2116_v2 = vsub.f32 %v3535_v50, %v2108_v27  ;;  %2759 = vpow2.f32 %v2119_v26  ;;  %v2127_v9 = vmul.f32 1.442695, %v2114_v60 }
 0x2f4   : > { %2761 = vpow2.f32 %v2121_v37  ;;  %v3568_v15 = vadd.f32 %v3482_v17, %v3511_v55  ;;  %v3571_v16 = vadd.f32 %v3482_v17, %v1675_v11 }
 0x2f5   : > { %2763 = vpow2.f32 %v2123_v6  ;;  %v2129_v25 = vmul.f32 1.442695, %v2115_v31  ;;  %v2131_v8 = vmul.f32 1.442695, %v2116_v2 }
 0x2f6   : > { %2765 = vpow2.f32 %v2125_v38  ;;  %v1692_v21 = vpack.c.bf16 %v3571_v16, %v3568_v15 }
 0x2f7   : > { %2767 = vpow2.f32 %v2127_v9 }
 0x2f8   : > { %v3575_v20 = vpop.eup %2757  ;;  %2769 = vpow2.f32 %v2129_v25  ;;  %2629 = vmatmul.msk.bf16.gmra.mxu2 %vm978_vm0, %v1692_v21 }
 0x2f9   : > { %v3578_v50 = vpop.eup %2759  ;;  %2771 = vpow2.f32 %v2131_v8  ;;  %v2133_v55 = vsel %vm1138_vm2, %v3575_v20, 0.0 }
 0x2fa   : > { %v3582_v19 = vpop.eup %2761  ;;  %v2134_v40 = vrot.slane %v2133_v55, 4  ;;  %v2140_v44 = vsel %vm1138_vm2, %v3578_v50, 0.0 }
 0x2fb   : > { %v3586_v45 = vpop.eup %2763  ;;  %v2141_v47 = vrot.slane %v2140_v44, 4  ;;  %v2147_v49 = vsel %vm1138_vm2, %v3582_v19, 0.0 }
 0x2fc   : > { %v3590_v51 = vpop.eup %2765  ;;  %v2135_v48 = vadd.f32 %v2134_v40, %v2133_v55  ;;  %v2148_v52 = vrot.slane %v2147_v49, 4  ;;  %v2154_v53 = vsel %vm1138_vm2, %v3586_v45, 0.0 }
 0x2fd   : > { %v3594_v58 = vpop.eup %2767  ;;  %v2142_v54 = vadd.f32 %v2141_v47, %v2140_v44  ;;  %v2155_v3 = vrot.slane %v2154_v53, 4  ;;  %v2161_v56 = vsel %vm1138_vm2, %v3590_v51, 0.0 }
 0x2fe   : > { %v3598_v61 = vpop.eup %2769  ;;  %v2136_v62 = vrot.slane %v2135_v48, 2  ;;  %v2149_v43 = vadd.f32 %v2148_v52, %v2147_v49  ;;  %v2162_v0 = vrot.slane %v2161_v56, 4  ;;  %v2168_v1 = vsel %vm1138_vm2, %v3594_v58, 0.0 }
 0x2ff   : > { %v3602_v10 = vpop.eup %2771  ;;  %v2143_v42 = vrot.slane %v2142_v54, 2  ;;  %v2156_v18 = vadd.f32 %v2155_v3, %v2154_v53  ;;  %v2169_v35 = vrot.slane %v2168_v1, 4  ;;  %v2175_v7 = vsel %vm1138_vm2, %v3598_v61, 0.0 }
 0x300   : > { %v2137_v13 = vadd.f32 %v2136_v62, %v2135_v48  ;;  %v2150_v5 = vrot.slane %v2149_v43, 2  ;;  %v2163_v36 = vadd.f32 %v2162_v0, %v2161_v56  ;;  %v2176_v46 = vrot.slane %v2175_v7, 4 }
 0x301   : > { %v2144_v39 = vadd.f32 %v2143_v42, %v2142_v54  ;;  %v2157_v23 = vrot.slane %v2156_v18, 2  ;;  %v2170_v24 = vadd.f32 %v2169_v35, %v2168_v1  ;;  %v2182_v14 = vsel %vm1138_vm2, %v3602_v10, 0.0 }
 0x302   : > { %v2138_v29 = vrot.slane %v2137_v13, 1  ;;  %v2151_v63 = vadd.f32 %v2150_v5, %v2149_v43  ;;  %v2164_v30 = vrot.slane %v2163_v36, 2  ;;  %v2177_v22 = vadd.f32 %v2176_v46, %v2175_v7 }
 0x303   : > { %v2145_v26 = vrot.slane %v2144_v39, 1  ;;  %v2158_v32 = vadd.f32 %v2157_v23, %v2156_v18  ;;  %v2171_v27 = vrot.slane %v2170_v24, 2  ;;  %v2183_v60 = vrot.slane %v2182_v14, 4 }
 0x304   : > { %v2139_v37 = vadd.f32 %v2138_v29, %v2137_v13  ;;  %v2152_v6 = vrot.slane %v2151_v63, 1  ;;  %v2165_v38 = vadd.f32 %v2164_v30, %v2163_v36  ;;  %v2178_v11 = vrot.slane %v2177_v22, 2  ;;  %v957_v29 = vld [vmem:[%s910_s10] sm:$0xff]  ;;  %s3780_s10 = scalar_lea.vmem [#allocation6], %s2595_s6  ;;  %s953_s6 = scalar_lea.vmem %s3891_s24, %s3094_s0 }
 0x305   : > { %v2146_v31 = vadd.f32 %v2145_v26, %v2144_v39  ;;  %v2159_v2 = vrot.slane %v2158_v32, 1  ;;  %v2172_v9 = vadd.f32 %v2171_v27, %v2170_v24  ;;  %v2184_v25 = vadd.f32 %v2183_v60, %v2182_v14 }
 0x306   : > { %v2153_v8 = vadd.f32 %v2152_v6, %v2151_v63  ;;  %v2166_v21 = vrot.slane %v2165_v38, 1  ;;  %v2179_v55 = vadd.f32 %v2178_v11, %v2177_v22  ;;  %2773 = vrcp.f32 %v2139_v37 }
 0x307   : > { %v2160_v40 = vadd.f32 %v2159_v2, %v2158_v32  ;;  %v2173_v44 = vrot.slane %v2172_v9, 1  ;;  %v2185_v47 = vrot.slane %v2184_v25, 2  ;;  %2775 = vrcp.f32 %v2146_v31 }
 0x308   : > { %v2167_v49 = vadd.f32 %v2166_v21, %v2165_v38  ;;  %v2180_v48 = vrot.slane %v2179_v55, 1  ;;  %2777 = vrcp.f32 %v2153_v8 }
 0x309   : > { %v2174_v52 = vadd.f32 %v2173_v44, %v2172_v9  ;;  %v2186_v53 = vadd.f32 %v2185_v47, %v2184_v25  ;;  %2779 = vrcp.f32 %v2160_v40 }
 0x30a   : > { %v2181_v54 = vadd.f32 %v2180_v48, %v2179_v55  ;;  %2781 = vrcp.f32 %v2167_v49 }
 0x30b   : > { %v2187_v3 = vrot.slane %v2186_v53, 1  ;;  %2783 = vrcp.f32 %v2174_v52 }
 0x30c   : > { %v2774_v56 = vpop.eup %2773  ;;  %2785 = vrcp.f32 %v2181_v54 }
 0x30d   : > { %v2776_v62 = vpop.eup %2775  ;;  %v2188_v43 = vadd.f32 %v2187_v3, %v2186_v53  ;;  %v2197_v0 = vmul.f32 %v2774_v56, %v2139_v37 }
 0x30e   : > { %v2778_v1 = vpop.eup %2777  ;;  %v2198_v42 = vmul.f32 %v2776_v62, %v2146_v31 }
 0x30f   : > { %v2780_v18 = vpop.eup %2779  ;;  %2787 = vrcp.f32 %v2188_v43  ;;  %v2199_v35 = vmul.f32 %v2778_v1, %v2153_v8  ;;  %v2205_v7 = vsub.f32 2.0, %v2197_v0 }
 0x310   : > { %v2782_v13 = vpop.eup %2781  ;;  %v2200_v5 = vmul.f32 %v2780_v18, %v2160_v40  ;;  %v2206_v36 = vsub.f32 2.0, %v2198_v42 }
 0x311   : > { %v2784_v46 = vpop.eup %2783  ;;  %v2201_v39 = vmul.f32 %v2782_v13, %v2167_v49  ;;  %v2207_v23 = vsub.f32 2.0, %v2199_v35  ;;  %v2213_v24 = vmul.f32 %v2774_v56, %v2205_v7 }
 0x312   : > { %v2786_v14 = vpop.eup %2785  ;;  %v2202_v63 = vmul.f32 %v2784_v46, %v2174_v52  ;;  %v2208_v30 = vsub.f32 2.0, %v2200_v5  ;;  %v2214_v22 = vmul.f32 %v2776_v62, %v2206_v36 }
 0x313   : > { %v2203_v26 = vmul.f32 %v2786_v14, %v2181_v54  ;;  %v2209_v32 = vsub.f32 2.0, %v2201_v39  ;;  %v2215_v27 = vmul.f32 %v2778_v1, %v2207_v23  ;;  %v2221_v60 = vmul.f32 %v3575_v20, %v2213_v24 }
 0x314   : > { %v2210_v37 = vsub.f32 2.0, %v2202_v63  ;;  %v2216_v6 = vmul.f32 %v2780_v18, %v2208_v30  ;;  %v2222_v38 = vmul.f32 %v3578_v50, %v2214_v22 }
 0x315   : > { %v2788_v11 = vpop.eup %2787  ;;  %v2211_v31 = vsub.f32 2.0, %v2203_v26  ;;  %v2217_v2 = vmul.f32 %v2782_v13, %v2209_v32  ;;  %v2223_v9 = vmul.f32 %v3582_v19, %v2215_v27  ;;  %v2229_v25 = vmul.f32 %v2221_v60, %v957_v29 }
 0x316   : > { %v2204_v8 = vmul.f32 %v2788_v11, %v2188_v43  ;;  %v2218_v21 = vmul.f32 %v2784_v46, %v2210_v37  ;;  %v2224_v55 = vmul.f32 %v3586_v45, %v2216_v6  ;;  %v2230_v40 = vmul.f32 %v2222_v38, %v957_v29  ;;  %v2294_v37 = vld [vmem:[%s942_s8] sm:$0x1]  ;;  %s2655_s8 = sshll.u32 %s2885_s28, 6  ;;  %s2353_s28 = sshll.u32 %s3780_s10, 4  ;;  %s2354_s28 = int_to_ptr.vmem [resolvable:$true] %s2353_s28 }
 0x317   : > { %v2219_v44 = vmul.f32 %v2786_v14, %v2211_v31  ;;  %v2225_v47 = vmul.f32 %v3590_v51, %v2217_v2  ;;  %v2231_v49 = vmul.f32 %v2223_v9, %v957_v29  ;;  %v2237_v20 = vsel %vm1138_vm2, %v2229_v25, 0.0  ;;  %s2352_s1 = scalar_lea.hbm %s3889_s22, %s2655_s8 }
 0x318   : > { %v2212_v48 = vsub.f32 2.0, %v2204_v8  ;;  %v2226_v50 = vmul.f32 %v3594_v58, %v2218_v21  ;;  %v2232_v52 = vmul.f32 %v2224_v55, %v957_v29  ;;  %v2238_v53 = vrot.slane %v2237_v20, 4 }
 0x319   : > { %v2227_v54 = vmul.f32 %v3598_v61, %v2219_v44  ;;  %v2233_v19 = vmul.f32 %v2225_v47, %v957_v29  ;;  %v2244_v3 = vsel %vm1138_vm2, %v2230_v40, 0.0  ;;  %v2251_v56 = vsel %vm1138_vm2, %v2231_v49, 0.0 }
 0x31a   : > { %v2220_v45 = vmul.f32 %v2788_v11, %v2212_v48  ;;  %v2234_v62 = vmul.f32 %v2226_v50, %v957_v29  ;;  %v2239_v43 = vadd.f32 %v2238_v53, %v2237_v20  ;;  %v2245_v0 = vrot.slane %v2244_v3, 4 }
 0x31b   : > { %v2235_v51 = vmul.f32 %v2227_v54, %v957_v29  ;;  %v2252_v1 = vrot.slane %v2251_v56, 4  ;;  %v2258_v42 = vsel %vm1138_vm2, %v2232_v52, 0.0  ;;  %v2265_v58 = vsel %vm1138_vm2, %v2233_v19, 0.0 }
 0x31c   : > { %v2228_v61 = vmul.f32 %v3602_v10, %v2220_v45  ;;  %v2240_v18 = vrot.slane %v2239_v43, 2  ;;  %v2246_v35 = vadd.f32 %v2245_v0, %v2244_v3  ;;  %v2259_v7 = vrot.slane %v2258_v42, 4 }
 0x31d   : > { %v2253_v13 = vadd.f32 %v2252_v1, %v2251_v56  ;;  %v2266_v5 = vrot.slane %v2265_v58, 4  ;;  %v2272_v36 = vsel %vm1138_vm2, %v2234_v62, 0.0  ;;  %v2279_v46 = vsel %vm1138_vm2, %v2235_v51, 0.0 }
 0x31e   : > { %v2236_v39 = vmul.f32 %v2228_v61, %v957_v29  ;;  %v2241_v23 = vadd.f32 %v2240_v18, %v2239_v43  ;;  %v2247_v24 = vrot.slane %v2246_v35, 2  ;;  %v2260_v14 = vadd.f32 %v2259_v7, %v2258_v42 }
 0x31f   : > { %v2254_v63 = vrot.slane %v2253_v13, 2  ;;  %v2267_v10 = vadd.f32 %v2266_v5, %v2265_v58  ;;  %v2273_v30 = vrot.slane %v2272_v36, 4  ;;  %v2280_v22 = vrot.slane %v2279_v46, 4 }
 0x320   : > { %v2242_v26 = vrot.slane %v2241_v23, 1  ;;  %v2248_v32 = vadd.f32 %v2247_v24, %v2246_v35  ;;  %v2261_v27 = vrot.slane %v2260_v14, 2  ;;  %v2286_v60 = vsel %vm1138_vm2, %v2236_v39, 0.0  ;;  %v2736_v39 = vld [vmem:[%s939_s12] ss:$0 sm:$0xff] }
 0x321   : > { %v2255_v6 = vadd.f32 %v2254_v63, %v2253_v13  ;;  %v2268_v38 = vrot.slane %v2267_v10, 2  ;;  %v2274_v11 = vadd.f32 %v2273_v30, %v2272_v36  ;;  %v2281_v31 = vadd.f32 %v2280_v22, %v2279_v46 }
 0x322   : > { %v2243_v2 = vadd.f32 %v2242_v26, %v2241_v23  ;;  %v2249_v9 = vrot.slane %v2248_v32, 1  ;;  %v2262_v29 = vadd.f32 %v2261_v27, %v2260_v14  ;;  %v2287_v25 = vrot.slane %v2286_v60, 4 }
 0x323   : > { %v2256_v8 = vrot.slane %v2255_v6, 1  ;;  %v2269_v21 = vadd.f32 %v2268_v38, %v2267_v10  ;;  %v2275_v55 = vrot.slane %v2274_v11, 2  ;;  %v2282_v40 = vrot.slane %v2281_v31, 2  ;;  %v2654_v38 = vld [vmem:[%s3885_s18 + $0x8] sm:$0xff] }
 0x324   : > { %v2295_v44 = vadd.f32 1.0, %v2294_v37  ;;  %v2250_v47 = vadd.f32 %v2249_v9, %v2248_v32  ;;  %v2263_v49 = vrot.slane %v2262_v29, 1  ;;  %v2288_v20 = vadd.f32 %v2287_v25, %v2286_v60  ;;  %1797 = vmatpush.bf16.msra.mxu3 %v2654_v38 }
 0x325   : > { %v2257_v48 = vadd.f32 %v2256_v8, %v2255_v6  ;;  %v2270_v50 = vrot.slane %v2269_v21, 1  ;;  %v2276_v52 = vadd.f32 %v2275_v55, %v2274_v11  ;;  %v2283_v53 = vadd.f32 %v2282_v40, %v2281_v31 }
 0x326   : > { %v2264_v54 = vadd.f32 %v2263_v49, %v2262_v29  ;;  %v2289_v19 = vrot.slane %v2288_v20, 2  ;;  %v2308_v3 = vsel %vm2307_vm9, %v2250_v47, %v2243_v2  ;;  %v1558_v56 = vpop.xlane.xlu1 %1557  ;;  %v2297_v13 = vperm.slane %v2295_v44, 0  ;;  %v2653_v2 = vld [vmem:[%s3885_s18] sm:$0xff] }
 0x327   : > { %v2271_v45 = vadd.f32 %v2270_v50, %v2269_v21  ;;  %v2277_v62 = vrot.slane %v2276_v52, 1  ;;  %v2284_v43 = vrot.slane %v2283_v53, 1  ;;  %v2310_v0 = vsel %vm2309_vm10, %v2257_v48, %v2308_v3 }
 0x328   : > { %v2290_v51 = vadd.f32 %v2289_v19, %v2288_v20  ;;  %v2312_v1 = vsel %vm2311_vm11, %v2264_v54, %v2310_v0  ;;  %v1568_v42 = vmul.f32 %v1558_v56, %v3403_v34  ;;  %1798 = vmatpush.bf16.msra.mxu3 %v2653_v2 }
 0x329   : > { %v2278_v58 = vadd.f32 %v2277_v62, %v2276_v52  ;;  %v2314_v61 = vsel %vm2313_vm12, %v2271_v45, %v2312_v1  ;;  %v2285_v18 = vadd.f32 %v2284_v43, %v2283_v53 }
 0x32a   : > { %v2291_v35 = vrot.slane %v2290_v51, 1  ;;  %v1576_v7 = vadd.f32 1e-05, %v1568_v42 }
 0x32b   : > { %v2316_v5 = vsel %vm2315_vm13, %v2278_v58, %v2314_v61 }
 0x32c   : > { %v2292_v36 = vadd.f32 %v2291_v35, %v2290_v51  ;;  %v2318_v46 = vsel %vm2317_vm14, %v2285_v18, %v2316_v5  ;;  %2789 = vrsqrt.f32 %v1576_v7  ;;  %vm1644_vm3 = vweird.f32 %v1576_v7 }
 0x32e   : > { %v2320_v23 = vsel %vm2319_vm15, %v2292_v36, %v2318_v46  ;;  %v1561_v24 = vpop.xlane.xlu2 %1560 }
 0x32f   : > { %v2322_v14 = vmul.f32 %v2320_v23, %v2297_v13  ;;  %v1569_v63 = vmul.f32 %v1561_v24, %v3403_v34  ;;  %v2738_v23 = vld [vmem:[%s3886_s19] ss:$0 sm:$0xff] }
 0x331   : > { %v2326_v10 = vadd.f32 %v2736_v39, %v2322_v14  ;;  %v1577_v30 = vadd.f32 1e-05, %v1569_v63 }
 0x332   : > { %v2790_v22 = vpop.eup %2789 }
 0x333   : > { %2327 = vst.msk [vmem:[%s950_s25] sm:$0xff] %vm1138_vm2, %v2326_v10  ;;  %v1639_v26 = vmul.f32 %v2790_v22, %v1576_v7  ;;  %2791 = vrsqrt.f32 %v1577_v30  ;;  %vm1645_vm1 = vweird.f32 %v2790_v22  ;;  %vm1654_vm6 = vweird.f32 %v1577_v30  ;;  %s2355_s25 = sshll.u32 %s2352_s1, 4  ;;  %s2356_s25 = int_to_ptr.hbm [resolvable:$true] %s2355_s25 }
 0x334   : > { %vm1646_vm4 = vmor %vm1644_vm3, %vm1645_vm1 }
 0x335   : > { %v1640_v32 = vmul.f32 %v2790_v22, %v1639_v26 }
 0x337   : > { %v1641_v27 = vmul.f32 0.5, %v1640_v32 }
 0x339   : > { %v2792_v60 = vpop.eup %2791  ;;  %v1642_v37 = vsub.f32 1.5, %v1641_v27 }
 0x33a   : > { %v1649_v6 = vmul.f32 %v2792_v60, %v1577_v30  ;;  %vm1655_vm5 = vweird.f32 %v2792_v60 }
 0x33b   : > { %v1643_v11 = vmul.f32 %v2790_v22, %v1642_v37  ;;  %vm1656_vm7 = vmor %vm1654_vm6, %vm1655_vm5 }
 0x33c   : > { %v1650_v31 = vmul.f32 %v2792_v60, %v1649_v6 }
 0x33d   : > { %v1647_v9 = vsel %vm1646_vm4, %v2790_v22, %v1643_v11 }
 0x33e   : > { %v1651_v29 = vmul.f32 0.5, %v1650_v31  ;;  %v1664_v8 = vmul.f32 %v1647_v9, %v3458_v33 }
 0x340   : > { %v1652_v25 = vsub.f32 1.5, %v1651_v29  ;;  %v1676_v44 = vmul.f32 %v3475_v12, %v1664_v8 }
 0x342   : > { %v1653_v21 = vmul.f32 %v2792_v60, %v1652_v25  ;;  %v3658_v49 = vadd.f32 %v3482_v17, %v1676_v44 }
 0x344   : > { %v1657_v55 = vsel %vm1656_vm7, %v2792_v60, %v1653_v21 }
 0x345   : > { %v1665_v40 = vmul.f32 %v1657_v55, %v3465_v41  ;;  %v2737_v41 = vld [vmem:[%s3884_s17] ss:$0 sm:$0xff] }
 0x347   : > { %v1677_v47 = vmul.f32 %v3475_v12, %v1665_v40 }
 0x349   : > { %v3661_v20 = vadd.f32 %v3482_v17, %v1677_v47 }
 0x34b   : > { %v1693_v48 = vpack.c.bf16 %v3661_v20, %v3658_v49 }
 0x34d   : > { %v1727_v33 = vpop.f32.mrf.mxu2  ;;  %2630 = vmatmul.msk.bf16.gmra.mxu2 %vm978_vm0, %v1693_v48 }
 0x34e   : > { %v1728_v50 = vadd.f32 %v2737_v41, %v1727_v33 }
 0x350   : > { %v1747_v12 = vmax.f32 %v1728_v50, 0.0 }
 0x355   : > { %v1729_v52 = vpop.f32.mrf.mxu2 }
 0x356   : > { %v1730_v53 = vadd.f32 %v2737_v41, %v1729_v52 }
 0x358   : > { %v1748_v54 = vmax.f32 %v1730_v53, 0.0 }
 0x35a   : > { %v1755_v19 = vpack.c.bf16 %v1748_v54, %v1747_v12 }
 0x35c   : > { %2639 = vmatmul.msk.bf16.vlgmr.msra.gmra.mxu3 %vm1138_vm2, %v1755_v19 }
 0x35d   : > { %v1732_v17 = vpop.f32.mrf.mxu2 }
 0x35e   : > { %v1733_v3 = vadd.f32 %v2737_v41, %v1732_v17 }
 0x360   : > { %v1749_v62 = vmax.f32 %v1733_v3, 0.0 }
 0x365   : > { %v1734_v56 = vpop.f32.mrf.mxu2 }
 0x366   : > { %v1735_v45 = vadd.f32 %v2737_v41, %v1734_v56 }
 0x368   : > { %v1750_v43 = vmax.f32 %v1735_v45, 0.0 }
 0x36a   : > { %v1756_v0 = vpack.c.bf16 %v1750_v43, %v1749_v62 }
 0x36c   : > { %2640 = vmatmul.msk.bf16.gmra.mxu3 %vm1138_vm2, %v1756_v0 }
 0x37b   : > { %v1737_v51 = vpop.f32.mrf.mxu2 }
 0x37c   : > { %v1738_v1 = vadd.f32 %v2737_v41, %v1737_v51 }
 0x37e   : > { %v1751_v61 = vmax.f32 %v1738_v1, 0.0 }
 0x383   : > { %v1739_v42 = vpop.f32.mrf.mxu2 }
 0x384   : > { %v1740_v58 = vadd.f32 %v2737_v41, %v1739_v42 }
 0x386   : > { %v1752_v18 = vmax.f32 %v1740_v58, 0.0 }
 0x388   : > { %v1757_v35 = vpack.c.bf16 %v1752_v18, %v1751_v61 }
 0x38a   : > { %2641 = vmatmul.msk.bf16.gmra.mxu3 %vm1138_vm2, %v1757_v35 }
 0x3d0   : > { %v1742_v7 = vpop.f32.mrf.mxu2 }
 0x3d1   : > { %v1743_v13 = vadd.f32 %v2737_v41, %v1742_v7 }
 0x3d3   : > { %v1753_v46 = vmax.f32 %v1743_v13, 0.0 }
 0x3d8   : > { %v1744_v5 = vpop.f32.mrf.mxu2 }
 0x3d9   : > { %v1745_v36 = vadd.f32 %v2737_v41, %v1744_v5 }
 0x3db   : > { %v1754_v39 = vmax.f32 %v1745_v36, 0.0 }
 0x3dd   : > { %v1758_v24 = vpack.c.bf16 %v1754_v39, %v1753_v46 }
 0x3df   : > { %v1800_v14 = vpop.f32.mrf.mxu3  ;;  %2642 = vmatmul.msk.bf16.gmra.mxu3 %vm1138_vm2, %v1758_v24  ;;  %v2902_v24 = vmov 64.0  }
 0x3e0   : > { %v1801_v63 = vadd.f32 %v2738_v23, %v1800_v14  ;;  %2793 = vrcp.f32 %v2902_v24 }
 0x3e2   : > { %v1820_v10 = vadd.f32 %v1801_v63, %v3487_v28 }
 0x3e4   : > { %v1828_v30 = vsel %vm978_vm0, %v1820_v10, 0.0 }
 0x3e5   : > { %1829 = vadd.xlane.f32.xlu1 %v1828_v30 }
 0x3e6   : > { %v2794_v14 = vpop.eup %2793 }
 0x3e7   : > { %v1802_v22 = vpop.f32.mrf.mxu3  ;;  %v1088_v63 = vmul.f32 64.0, %v2794_v14  ;;  %vm1092_vm8 = vweird.f32 %v2794_v14 }
 0x3e8   : > { %v1803_v26 = vadd.f32 %v2738_v23, %v1802_v22 }
 0x3e9   : > { %v1089_v30 = vsub.f32 1.0, %v1088_v63 }
 0x3ea   : > { %v1821_v32 = vadd.f32 %v1803_v26, %v3490_v4 }
 0x3eb   : > { %v1090_v22 = vmul.f32 %v2794_v14, %v1089_v30 }
 0x3ec   : > { %v1831_v27 = vsel %vm978_vm0, %v1821_v32, 0.0 }
 0x3ed   : > { %1832 = vadd.xlane.f32.xlu2 %v1831_v27  ;;  %v1091_v26 = vadd.f32 %v2794_v14, %v1090_v22  ;;  %v1086_v27 = vld [vmem:[#allocation2] sm:$0x1] }
 0x3ef   : > { %v1805_v60 = vpop.f32.mrf.mxu3 }
 0x3f0   : > { %v1806_v37 = vadd.f32 %v2738_v23, %v1805_v60  ;;  %v1093_v60 = vsel %vm1092_vm8, %v2794_v14, %v1091_v26 }
 0x3f2   : > { %v1822_v6 = vadd.f32 %v1806_v37, %v3501_v59 }
 0x3f4   : > { %v1834_v38 = vsel %vm978_vm0, %v1822_v6, 0.0 }
 0x3f5   : > { %1835 = vadd.xlane.f32.xlu1 %v1834_v38 }
 0x3f7   : > { %v1807_v11 = vpop.f32.mrf.mxu3 }
 0x3f8   : > { %v1808_v31 = vadd.f32 %v2738_v23, %v1807_v11 }
 0x3fa   : > { %v1823_v28 = vadd.f32 %v1808_v31, %v3504_v57 }
 0x3fc   : > { %v1837_v2 = vsel %vm978_vm0, %v1823_v28, 0.0 }
 0x3fd   : > { %1838 = vadd.xlane.f32.xlu2 %v1837_v2  ;;  %v1095_v2 = vld [vmem:[#allocation3] sm:$0x1] }
 0x40d   : > { %v1810_v9 = vpop.f32.mrf.mxu3 }
 0x40e   : > { %v1811_v29 = vadd.f32 %v2738_v23, %v1810_v9 }
 0x410   : > { %v1824_v4 = vadd.f32 %v1811_v29, %v3568_v15 }
 0x412   : > { %v1840_v25 = vsel %vm978_vm0, %v1824_v4, 0.0 }
 0x413   : > { %1841 = vadd.xlane.f32.xlu1 %v1840_v25 }
 0x415   : > { %v1812_v8 = vpop.f32.mrf.mxu3 }
 0x416   : > { %v1813_v21 = vadd.f32 %v2738_v23, %v1812_v8 }
 0x418   : > { %v1825_v59 = vadd.f32 %v1813_v21, %v3571_v16 }
 0x41a   : > { %v1843_v55 = vsel %vm978_vm0, %v1825_v59, 0.0 }
 0x41b   : > { %1844 = vadd.xlane.f32.xlu2 %v1843_v55 }
 0x458   : > { %v1830_v40 = vpop.xlane.xlu1 %1829 }
 0x459   : > { %v1852_v57 = vmul.f32 %v1830_v40, %v3403_v34 }
 0x45b   : > { %v3692_v33 = vsub.f32 %v1820_v10, %v1852_v57  ;;  %v2903_v10 = vmov 63.0  }
 0x45c   : > { %2795 = vrcp.f32 %v2903_v10 }
 0x460   : > { %v1833_v41 = vpop.xlane.xlu2 %1832 }
 0x461   : > { %v1853_v53 = vmul.f32 %v1833_v41, %v3403_v34 }
 0x462   : > { %v1815_v44 = vpop.f32.mrf.mxu3 }
 0x463   : > { %v1816_v47 = vadd.f32 %v2738_v23, %v1815_v44  ;;  %v3707_v3 = vsub.f32 %v1821_v32, %v1853_v53  ;;  %v2796_v32 = vpop.eup %2795 }
 0x464   : > { %v1100_v37 = vmul.f32 63.0, %v2796_v32  ;;  %vm1104_vm9 = vweird.f32 %v2796_v32 }
 0x465   : > { %v3690_v48 = vadd.f32 %v1816_v47, %v3658_v49  ;;  %v1868_v49 = vmul.f32 %v3692_v33, %v3692_v33  ;;  %v1869_v51 = vmul.f32 %v3707_v3, %v3707_v3 }
 0x466   : > { %v1101_v38 = vsub.f32 1.0, %v1100_v37 }
 0x467   : > { %v1846_v15 = vsel %vm978_vm0, %v3690_v48, 0.0  ;;  %v1876_v45 = vsel %vm978_vm0, %v1868_v49, 0.0  ;;  %v1879_v42 = vsel %vm978_vm0, %v1869_v51, 0.0 }
 0x468   : > { %1847 = vadd.xlane.f32.xlu1 %v1846_v15  ;;  %v1836_v50 = vpop.xlane.xlu1 %1835  ;;  %v1102_v31 = vmul.f32 %v2796_v32, %v1101_v38 }
 0x469   : > { %v1854_v16 = vmul.f32 %v1836_v50, %v3403_v34 }
 0x46a   : > { %v1817_v52 = vpop.f32.mrf.mxu3  ;;  %v1103_v9 = vadd.f32 %v2796_v32, %v1102_v31 }
 0x46b   : > { %v3698_v12 = vsub.f32 %v1822_v6, %v1854_v16  ;;  %v1818_v54 = vadd.f32 %v2738_v23, %v1817_v52  ;;  %v3734_v6 = vmul.f32 %v1093_v60, %v1086_v27 }
 0x46d   : > { %v3703_v19 = vadd.f32 %v1818_v54, %v3661_v20  ;;  %v1870_v17 = vmul.f32 %v3698_v12, %v3698_v12  ;;  %v1096_v11 = vmul.f32 64.0, %v3734_v6 }
 0x46f   : > { %v1849_v56 = vsel %vm978_vm0, %v3703_v19, 0.0  ;;  %v1882_v62 = vsel %vm978_vm0, %v1870_v17, 0.0 }
 0x470   : > { %v1839_v43 = vpop.xlane.xlu2 %1838  ;;  %1850 = vadd.xlane.f32.xlu2 %v1849_v56  ;;  %1877 = vadd.xlane.f32.xlu1 %v1876_v45 }
 0x471   : > { %v1855_v0 = vmul.f32 %v1839_v43, %v3403_v34  ;;  %1883 = vadd.xlane.f32.xlu0 %v1882_v62 }
 0x473   : > { %v3714_v20 = vsub.f32 %v1823_v28, %v1855_v0  ;;  %v1097_v28 = vmul.f32 %v1096_v11, %v3734_v6  ;;  %v3763_v11 = vld [vmem:[%s3887_s20] ss:$0 sm:$0xff] }
 0x475   : > { %v1871_v1 = vmul.f32 %v3714_v20, %v3714_v20  ;;  %v1098_v29 = vsub.f32 %v1095_v2, %v1097_v28 }
 0x477   : > { %v1885_v58 = vsel %vm978_vm0, %v1871_v1, 0.0 }
 0x478   : > { %1880 = vadd.xlane.f32.xlu2 %v1879_v42  ;;  %1886 = vadd.xlane.f32.xlu1 %v1885_v58 }
 0x486   : > { %v1842_v61 = vpop.xlane.xlu1 %1841 }
 0x487   : > { %v1856_v18 = vmul.f32 %v1842_v61, %v3403_v34 }
 0x489   : > { %v3723_v35 = vsub.f32 %v1824_v4, %v1856_v18  ;;  %v1105_v4 = vsel %vm1104_vm9, %v2796_v32, %v1103_v9 }
 0x48a   : > { %v1106_v8 = vmul.f32 %v1105_v4, %v1098_v29  ;;  %v3770_v29 = vld [vmem:[%s3888_s21] ss:$0 sm:$0xff] }
 0x48b   : > { %v1872_v7 = vmul.f32 %v3723_v35, %v3723_v35 }
 0x48d   : > { %v1888_v13 = vsel %vm978_vm0, %v1872_v7, 0.0 }
 0x48e   : > { %v1845_v5 = vpop.xlane.xlu2 %1844  ;;  %1889 = vadd.xlane.f32.xlu2 %v1888_v13 }
 0x48f   : > { %v1857_v36 = vmul.f32 %v1845_v5, %v3403_v34 }
 0x491   : > { %v3729_v46 = vsub.f32 %v1825_v59, %v1857_v36  ;;  %v1107_v59 = vmax.f32 %v1106_v8, 0.0 }
 0x493   : > { %v1873_v39 = vmul.f32 %v3729_v46, %v3729_v46  ;;  %2797 = vrsqrt.f32 %v1107_v59  ;;  %vm1115_vm10 = vcmp.eq.f32.partialorder %v1107_v59, inf  ;;  %vm1117_vm11 = vcmp.eq.f32.partialorder %v1107_v59, 0.0 }
 0x494   : > { %v1118_v24 = vand.u32 2147483648, %v1107_v59 }
 0x495   : > { %v1891_v23 = vsel %vm978_vm0, %v1873_v39, 0.0 }
 0x496   : > { %1892 = vadd.xlane.f32.xlu1 %v1891_v23 }
 0x499   : > { %v2798_v16 = vpop.eup %2797 }
 0x49a   : > { %v1109_v54 = vmul.f32 %v2798_v16, %v1107_v59 }
 0x49c   : > { %v1110_v56 = vmul.f32 %v2798_v16, %v1109_v54 }
 0x49e   : > { %v1111_v62 = vmul.f32 0.5, %v1110_v56 }
 0x4a0   : > { %v1112_v1 = vsub.f32 1.5, %v1111_v62 }
 0x4a2   : > { %v1113_v18 = vmul.f32 %v2798_v16, %v1112_v1 }
 0x4a4   : > { %v1114_v39 = vmul.f32 %v1113_v18, %v1107_v59 }
 0x4a6   : > { %v1116_v63 = vsel %vm1115_vm10, %v1107_v59, %v1114_v39 }
 0x4a7   : > { %v1119_v30 = vsel %vm1117_vm11, %v1118_v24, %v1116_v63 }
 0x4a8   : > { %v1133_v26 = vperm.slane %v1119_v30, 0 }
 0x4aa   : > { %1134 = vrot.lane.b32.xlu0 %v1133_v26, %s2904_s30  ;;  %s2835_s30 = scalar_lea.hbm %s3889_s22, 128 }
 0x4db   : > { %v1848_v25 = vpop.xlane.xlu1 %1847 }
 0x4dc   : > { %v1858_v21 = vmul.f32 %v1848_v25, %v3403_v34 }
 0x4de   : > { %v3740_v55 = vsub.f32 %v3690_v48, %v1858_v21 }
 0x4e0   : > { %v1874_v40 = vmul.f32 %v3740_v55, %v3740_v55 }
 0x4e2   : > { %v1894_v44 = vsel %vm978_vm0, %v1874_v40, 0.0 }
 0x4e3   : > { %v1851_v57 = vpop.xlane.xlu2 %1850  ;;  %1895 = vadd.xlane.f32.xlu2 %v1894_v44  ;;  %v1878_v47 = vpop.xlane.xlu1 %1877 }
 0x4e4   : > { %v1859_v15 = vmul.f32 %v1851_v57, %v3403_v34  ;;  %v1884_v41 = vpop.xlane.xlu0 %1883  ;;  %v1900_v50 = vmul.f32 %v1878_v47, %v3403_v34 }
 0x4e5   : > { %v1902_v52 = vmul.f32 %v1884_v41, %v3403_v34 }
 0x4e6   : > { %v3749_v48 = vsub.f32 %v3703_v19, %v1859_v15  ;;  %v1908_v53 = vadd.f32 1e-05, %v1900_v50 }
 0x4e7   : > { %v1910_v49 = vadd.f32 1e-05, %v1902_v52 }
 0x4e8   : > { %2799 = vrsqrt.f32 %v1908_v53  ;;  %v1875_v17 = vmul.f32 %v3749_v48, %v3749_v48  ;;  %vm1922_vm14 = vweird.f32 %v1908_v53 }
 0x4e9   : > { %2801 = vrsqrt.f32 %v1910_v49  ;;  %vm1942_vm15 = vweird.f32 %v1910_v49 }
 0x4ea   : > { %v1897_v45 = vsel %vm978_vm0, %v1875_v17, 0.0 }
 0x4eb   : > { %v1881_v43 = vpop.xlane.xlu2 %1880  ;;  %1898 = vadd.xlane.f32.xlu1 %v1897_v45  ;;  %v1887_v0 = vpop.xlane.xlu1 %1886 }
 0x4ec   : > { %v1901_v51 = vmul.f32 %v1881_v43, %v3403_v34  ;;  %v1903_v19 = vmul.f32 %v1887_v0, %v3403_v34 }
 0x4ee   : > { %v2800_v42 = vpop.eup %2799  ;;  %v1909_v58 = vadd.f32 1e-05, %v1901_v51  ;;  %v3756_v61 = vadd.f32 1e-05, %v1903_v19  ;;  %v2742_v51 = vld [vmem:[#allocation4] ss:$0 sm:$0xff] }
 0x4ef   : > { %v2802_v7 = vpop.eup %2801  ;;  %v1917_v13 = vmul.f32 %v2800_v42, %v1908_v53  ;;  %vm1923_vm12 = vweird.f32 %v2800_v42 }
 0x4f0   : > { %v1937_v5 = vmul.f32 %v2802_v7, %v1910_v49  ;;  %2803 = vrsqrt.f32 %v1909_v58  ;;  %vm1943_vm13 = vweird.f32 %v2802_v7  ;;  %vm1924_vm1 = vmor %vm1922_vm14, %vm1923_vm12  ;;  %vm1932_vm6 = vweird.f32 %v1909_v58 }
 0x4f1   : > { %v1918_v36 = vmul.f32 %v2800_v42, %v1917_v13  ;;  %2805 = vrsqrt.f32 %v3756_v61  ;;  %vm1944_vm3 = vmor %vm1942_vm15, %vm1943_vm13  ;;  %vm1952_vm8 = vweird.f32 %v3756_v61 }
 0x4f2   : > { %v1938_v23 = vmul.f32 %v2802_v7, %v1937_v5 }
 0x4f3   : > { %v1919_v14 = vmul.f32 0.5, %v1918_v36 }
 0x4f4   : > { %v1939_v10 = vmul.f32 0.5, %v1938_v23 }
 0x4f5   : > { %v1920_v22 = vsub.f32 1.5, %v1919_v14 }
 0x4f6   : > { %v2804_v32 = vpop.eup %2803  ;;  %v1940_v27 = vsub.f32 1.5, %v1939_v10 }
 0x4f7   : > { %v2806_v60 = vpop.eup %2805  ;;  %v1921_v37 = vmul.f32 %v2800_v42, %v1920_v22  ;;  %v1927_v38 = vmul.f32 %v2804_v32, %v1909_v58  ;;  %vm1933_vm4 = vweird.f32 %v2804_v32 }
 0x4f8   : > { %v1941_v31 = vmul.f32 %v2802_v7, %v1940_v27  ;;  %v1947_v28 = vmul.f32 %v2806_v60, %v3756_v61  ;;  %vm1953_vm5 = vweird.f32 %v2806_v60  ;;  %vm1934_vm7 = vmor %vm1932_vm6, %vm1933_vm4 }
 0x4f9   : > { %v1925_v2 = vsel %vm1924_vm1, %v2800_v42, %v1921_v37  ;;  %v1928_v9 = vmul.f32 %v2804_v32, %v1927_v38  ;;  %vm1954_vm9 = vmor %vm1952_vm8, %vm1953_vm5  ;;  %vm1140_vm8 = vcmask 392192  }
 0x4fa   : > { %v1945_v4 = vsel %vm1944_vm3, %v2802_v7, %v1941_v31  ;;  %v1996_v25 = vmul.f32 %v1925_v2, %v3692_v33  ;;  %v1948_v8 = vmul.f32 %v2806_v60, %v1947_v28 }
 0x4fb   : > { %v1998_v21 = vmul.f32 %v1945_v4, %v3698_v12  ;;  %v1929_v59 = vmul.f32 0.5, %v1928_v9  ;;  %v2741_v12 = vld [vmem:[#allocation5] ss:$0 sm:$0xff]  ;;  %1124 = vrot.lane.b32.xlu2 %v2742_v51, %s2906_s2  ;;  %s2829_s2 = sshra.s32 %s2356_s25, 4  ;;  %s2830_s2 = int_to_ptr.hbm [resolvable:$true] %s2829_s2 }
 0x4fc   : > { %v2008_v40 = vmul.f32 %v3763_v11, %v1996_v25  ;;  %v1949_v44 = vmul.f32 0.5, %v1948_v8  ;;  %s2831_s8 = scalar_lea.hbm %s2830_s2, 64  ;;  %p2836_p1 = scmp.lt.s32.totalorder %s2830_s2, %s3889_s22 }
 0x4fd   : > { %v2010_v57 = vmul.f32 %v3763_v11, %v1998_v21  ;;  %v1930_v47 = vsub.f32 1.5, %v1929_v59  ;;  %p2832_p12 = scmp.ne.s32.totalorder %s2830_s2, %s2831_s8  ;;  %p2837_p2 = scmp.lt.s32.totalorder %s2835_s30, %s2831_s8 }
 0x4fe   : > { %v2020_v15 = vadd.f32 %v3770_v29, %v2008_v40  ;;  %v1950_v41 = vsub.f32 1.5, %v1949_v44 }
 0x4ff   : > { %v2022_v50 = vadd.f32 %v3770_v29, %v2010_v57  ;;  %v1931_v16 = vmul.f32 %v2804_v32, %v1930_v47  ;;  %p2833_p13 = pnand %p2832_p12, %p3074_p4  ;;  %p2838_p3 = por %p2837_p2, %p2836_p1 }
 0x500   : > { %2028 = vst.msk [vmem:[%s3780_s10] sm:$0xff] %vm978_vm0, %v2020_v15  ;;  %v1951_v33 = vmul.f32 %v2806_v60, %v1950_v41 }
 0x501   : > { %2030 = vst.msk [vmem:[%s3780_s10 + $0x10] sm:$0xff] %vm978_vm0, %v2022_v50  ;;  %v1935_v52 = vsel %vm1934_vm7, %v2804_v32, %v1931_v16  ;;  %v1890_v53 = vpop.xlane.xlu2 %1889  ;;  %p2834_p0 = pneg %p2833_p13 }
 0x502   : > { %v1997_v54 = vmul.f32 %v1935_v52, %v3707_v3  ;;  %v1955_v49 = vsel %vm1954_vm9, %v2806_v60, %v1951_v33  ;;  %v1904_v17 = vmul.f32 %v1890_v53, %v3403_v34  ;;  %vm1142_vm9 = vcmask 516096  }
 0x503   : > { %v1999_v56 = vmul.f32 %v1955_v49, %v3714_v20  ;;  %p2839_p5 = pnand %p2838_p3, %p2834_p0 }
 0x504   : > { %v2009_v45 = vmul.f32 %v3763_v11, %v1997_v54  ;;  %v1912_v62 = vadd.f32 1e-05, %v1904_v17  ;;  %1129 = vrot.lane.b32.xlu1 %v2741_v12, %s2905_s27  ;;  %s2329_s27 = scalar_lea.sflag [#allocation7], %s879_s29 }
 0x505   : > { %v2011_v43 = vmul.f32 %v3763_v11, %v1999_v56 }
 0x506   : > { %v2021_v0 = vadd.f32 %v3770_v29, %v2009_v45  ;;  %2807 = vrsqrt.f32 %v1912_v62  ;;  %vm1962_vm11 = vweird.f32 %v1912_v62 }
 0x507   : > { %v2023_v19 = vadd.f32 %v3770_v29, %v2011_v43 }
 0x508   : > { %2029 = vst.msk [vmem:[%s3780_s10 + $0x8] sm:$0xff] %vm978_vm0, %v2021_v0 }
 0x509   : > { %2031 = vst.msk [vmem:[%s3780_s10 + $0x18] sm:$0xff] %vm978_vm0, %v2023_v19  ;;  %v1893_v3 = vpop.xlane.xlu1 %1892 }
 0x50a   : > { %v1905_v20 = vmul.f32 %v1893_v3, %v3403_v34 }
 0x50c   : > { %v2808_v1 = vpop.eup %2807  ;;  %v1913_v42 = vadd.f32 1e-05, %v1905_v20 }
 0x50d   : > { %v1957_v58 = vmul.f32 %v2808_v1, %v1912_v62  ;;  %vm1963_vm10 = vweird.f32 %v2808_v1 }
 0x50e   : > { %2809 = vrsqrt.f32 %v1913_v42  ;;  %vm1964_vm12 = vmor %vm1962_vm11, %vm1963_vm10  ;;  %vm1972_vm14 = vweird.f32 %v1913_v42 }
 0x50f   : > { %v1958_v61 = vmul.f32 %v2808_v1, %v1957_v58 }
 0x511   : > { %v1959_v18 = vmul.f32 0.5, %v1958_v61 }
 0x513   : > { %v1960_v7 = vsub.f32 1.5, %v1959_v18 }
 0x514   : > { %v2810_v13 = vpop.eup %2809 }
 0x515   : > { %v1961_v5 = vmul.f32 %v2808_v1, %v1960_v7  ;;  %v1967_v36 = vmul.f32 %v2810_v13, %v1913_v42  ;;  %vm1973_vm13 = vweird.f32 %v2810_v13 }
 0x516   : > { %vm1974_vm15 = vmor %vm1972_vm14, %vm1973_vm13 }
 0x517   : > { %v1965_v39 = vsel %vm1964_vm12, %v2808_v1, %v1961_v5  ;;  %v1968_v23 = vmul.f32 %v2810_v13, %v1967_v36 }
 0x518   : > { %v2000_v24 = vmul.f32 %v1965_v39, %v3723_v35 }
 0x519   : > { %v1969_v14 = vmul.f32 0.5, %v1968_v23 }
 0x51a   : > { %v2012_v63 = vmul.f32 %v3763_v11, %v2000_v24 }
 0x51b   : > { %v1970_v10 = vsub.f32 1.5, %v1969_v14 }
 0x51c   : > { %v2024_v30 = vadd.f32 %v3770_v29, %v2012_v63  ;;  %v1135_v53 = vpop.permute.xlu0 %1134 }
 0x51d   : > { %v1971_v22 = vmul.f32 %v2810_v13, %v1970_v10 }
 0x51e   : > { %2032 = vst.msk [vmem:[%s3780_s10 + $0x20] sm:$0xff] %vm978_vm0, %v2024_v30 }
 0x51f   : > { %v1975_v26 = vsel %vm1974_vm15, %v2810_v13, %v1971_v22 }
 0x520   : > { %v2001_v32 = vmul.f32 %v1975_v26, %v3729_v46 }
 0x522   : > { %v2013_v27 = vmul.f32 %v3763_v11, %v2001_v32 }
 0x524   : > { %v2025_v60 = vadd.f32 %v3770_v29, %v2013_v27 }
 0x526   : > { %2033 = vst.msk [vmem:[%s3780_s10 + $0x28] sm:$0xff] %vm978_vm0, %v2025_v60 }
 0x556   : > { %v1896_v35 = vpop.xlane.xlu2 %1895 }
 0x557   : > { %v1906_v37 = vmul.f32 %v1896_v35, %v3403_v34 }
 0x559   : > { %v1914_v38 = vadd.f32 1e-05, %v1906_v37 }
 0x55b   : > { %2811 = vrsqrt.f32 %v1914_v38  ;;  %vm1982_vm3 = vweird.f32 %v1914_v38 }
 0x55e   : > { %v1899_v31 = vpop.xlane.xlu1 %1898  ;;  %v1125_v16 = vpop.permute.xlu2 %1124 }
 0x55f   : > { %v1907_v28 = vmul.f32 %v1899_v31, %v3403_v34  ;;  %v1137_v12 = vsel %vm978_vm0, %v3734_v6, %v1125_v16 }
 0x561   : > { %v2812_v2 = vpop.eup %2811  ;;  %v1915_v9 = vadd.f32 1e-05, %v1907_v28 }
 0x562   : > { %v1977_v4 = vmul.f32 %v2812_v2, %v1914_v38  ;;  %vm1983_vm1 = vweird.f32 %v2812_v2 }
 0x563   : > { %2813 = vrsqrt.f32 %v1915_v9  ;;  %vm1984_vm4 = vmor %vm1982_vm3, %vm1983_vm1  ;;  %vm1992_vm6 = vweird.f32 %v1915_v9 }
 0x564   : > { %v1978_v46 = vmul.f32 %v2812_v2, %v1977_v4 }
 0x566   : > { %v1979_v25 = vmul.f32 0.5, %v1978_v46 }
 0x568   : > { %v1980_v8 = vsub.f32 1.5, %v1979_v25 }
 0x569   : > { %v2814_v21 = vpop.eup %2813 }
 0x56a   : > { %v1981_v59 = vmul.f32 %v2812_v2, %v1980_v8  ;;  %v1987_v40 = vmul.f32 %v2814_v21, %v1915_v9  ;;  %vm1993_vm5 = vweird.f32 %v2814_v21 }
 0x56b   : > { %vm1994_vm7 = vmor %vm1992_vm6, %vm1993_vm5 }
 0x56c   : > { %v1985_v44 = vsel %vm1984_vm4, %v2812_v2, %v1981_v59  ;;  %v1988_v57 = vmul.f32 %v2814_v21, %v1987_v40 }
 0x56d   : > { %v2002_v47 = vmul.f32 %v1985_v44, %v3740_v55 }
 0x56e   : > { %v1989_v34 = vmul.f32 0.5, %v1988_v57 }
 0x56f   : > { %v2014_v15 = vmul.f32 %v3763_v11, %v2002_v47 }
 0x570   : > { %v1990_v41 = vsub.f32 1.5, %v1989_v34 }
 0x571   : > { %v2026_v50 = vadd.f32 %v3770_v29, %v2014_v15 }
 0x572   : > { %v1991_v33 = vmul.f32 %v2814_v21, %v1990_v41 }
 0x573   : > { %2034 = vst.msk [vmem:[%s3780_s10 + $0x30] sm:$0xff] %vm978_vm0, %v2026_v50 }
 0x574   : > { %v1995_v55 = vsel %vm1994_vm7, %v2814_v21, %v1991_v33 }
 0x575   : > { %v2003_v52 = vmul.f32 %v1995_v55, %v3749_v48 }
 0x576   : > { %v1130_v54 = vpop.permute.xlu1 %1129 }
 0x577   : > { %v2015_v49 = vmul.f32 %v3763_v11, %v2003_v52  ;;  %v1139_v17 = vsel %vm1138_vm2, %v1137_v12, %v1130_v54 }
 0x578   : > { %v1141_v6 = vsel %vm1140_vm8, %v1139_v17, %v1135_v53 }
 0x579   : > { %v2027_v48 = vadd.f32 %v3770_v29, %v2015_v49  ;;  %1143 = vst.msk [vmem:[%s953_s6] sm:$0x1] %vm1142_vm9, %v1141_v6 }
 0x57b   : > { %2035 = vst.msk [vmem:[%s3780_s10 + $0x38] sm:$0xff] %vm978_vm0, %v2027_v48 }
 0x57c   : > { %2842 = shalt.err (!%p2839_p5)
}
 0x57d   : > { %s2907_s29 = smov 128   ;;  %s2908_s10 = smov 8  }
 0x57e   : > { %2656 = dma.vmem_to_hbm [thread:$0]  (%p3074_p4), %s2354_s28, 1024, %s2356_s25, %s2329_s27, %s2907_s29, %s2907_s29, %s2908_s10  }
 0x57f PF: > { %s3936_s5 = sld [smem:[#allocation12_spill]] }
 0x580   : > { %s3937_s6 = sld [smem:[#allocation9_spill]] }
 0x585   : > { %p2662_p6 = scmp.ge.s32.totalorder %s3936_s5, 2 }
 0x586   : > { %s2376_s0 = sand.u32 1, %s3937_s6  }
 0x587   : > { %p2659_p7 = pnand %p2662_p6, %p3081_p8  ;;  %s2377_s4 = scalar_lea.sflag [#allocation7], %s2376_s0 }
 0x589   : > { %p2660_p9 = pneg %p2659_p7 }
 0x58b   : > { %2868 = dma.done.wait (%p2660_p9), %s2377_s4, 1024  }
 0x58c   : > { %2870 = vsyncadd (%p2660_p9), %s2377_s4, 4294966272  ;;  %s38_s2 = sadd.s32 1, %s3936_s5   ;;  %s3939_s8 = sld [smem:[#allocation10_spill]] }
 0x58d   : > { %p35_p10 = scmp.ge.s32.totalorder %s38_s2, 4   ;;  %s3940_s27 = sld [smem:[#allocation15_spill]] }
 0x58e   : > { %s3941_s28 = sld [smem:[#allocation11_spill]]  ;;  %s3943_s5 = smov %s2877_s26 }
 0x58f   : > { %s3942_s6 = sld [smem:[#allocation13_spill]]  ;;  %37 = sbr.rel (!%p35_p10) target bundleno = 17 (0x11), region = 202 }
 0x592   : > { %s3944_s26 = smov %s3939_s8 }
 0x594   :  { %2399 = vsyncpa [#allocation7], 1 }
 0x595   :  { %2401 = vsyncpa [#allocation7 + $0x1], 1 }

</bundles_post_ra>
